<compile_context>
chip_gen: v5e
topology: v5e:2x2
jax: 0.10.0
libtpu: 0.0.40
codegen_flags: <defaults>
</compile_context>

<pallas_src>
import math

import jax
import jax.numpy as jnp
from jax.experimental import pallas as pl
from jax.experimental.pallas import tpu as pltpu


def obs_fusion_kernel(temps_ref, appear_ref, reproj_ref, odesc_ref,
                      wa_ref, wb_ref, bias_ref, out_ref):
    # temps_ref lives in SMEM: [appear_t, rpj_t]
    appear_t = temps_ref[0]
    rpj_t = temps_ref[1]

    wa = wa_ref[...]            # (F, F)   conv weight, appearance half
    wb = wb_ref[...]            # (F, F)   conv weight, reprojection half
    bias = bias_ref[...]        # (F, 1)
    bb = appear_ref.shape[0]

    def softmax_tq(x):          # softmax over TQ == axis 0 of a (TQ, R) tile
        m = jnp.max(x, axis=0, keepdims=True)
        e = jnp.exp(x - m)
        s = jnp.sum(e, axis=0, keepdims=True)
        # Exact reciprocal: holds the 1e-4 match vs. the f32 reference.
        return e * pl.reciprocal(s, approx=False)

    def one_batch(b, carry):
        appear = appear_ref[b].astype(jnp.float32)                   # (TQ, R)
        rpj = 1.0 / (reproj_ref[b].astype(jnp.float32) + 1.2e-05)    # (TQ, R)
        od = odesc_ref[b].astype(jnp.float32)                        # (F, TQ)

        a_s = softmax_tq(appear_t * appear)                          # (TQ, R)
        r_s = softmax_tq(rpj_t * rpj)                                # (TQ, R)

        a_f = jnp.dot(od, a_s, preferred_element_type=jnp.float32)   # (F, R)
        r_f = jnp.dot(od, r_s, preferred_element_type=jnp.float32)   # (F, R)

        # 1x1 Conv1d(2F -> F): weight pre-split on the wrapper side so there is
        # no in-kernel slicing at lane offset F.
        merged = (jnp.dot(wa, a_f, preferred_element_type=jnp.float32)
                  + jnp.dot(wb, r_f, preferred_element_type=jnp.float32)
                  + bias)                                            # (F, R)
        out_ref[b] = merged.astype(out_ref.dtype)
        return carry

    if bb <= 16:
        # Short fixed trip count: fully unrolled (LLO scheduler visibility).
        for b in range(bb):
            one_batch(b, 0)
    else:
        jax.lax.fori_loop(0, bb, one_batch, 0, unroll=4)


def _tpu_vmem_and_cores():
    """Best-effort trace-time query of VMEM capacity and TensorCore count."""
    vmem_bytes = 64 << 20       # conservative default (v7x physical VMEM)
    num_cores = 1
    try:
        info = pltpu.get_tpu_info()
        v = getattr(info, "vmem_capacity_bytes", None)
        if v:
            vmem_bytes = int(v)
        for attr in ("num_tensorcores", "tensorcores_per_chip",
                     "cores_per_chip", "num_cores"):
            c = getattr(info, attr, None)
            if c:
                num_cores = max(1, int(c))
                break
    except Exception:
        pass
    return vmem_bytes, num_cores


def _choose_batch_block(B, TQ, R, F, itemsize, budget_bytes, num_cores):
    """Batch-block size BB: working set is LINEAR in BB (no BB^2 temporaries)."""
    # Pallas double-buffers the pipelined input/output blocks (x2); in-kernel
    # temporaries (softmax intermediates, a_f/r_f/merged) are linear in BB too.
    pipelined = 2 * itemsize * (2 * TQ * R + F * TQ) + 2 * 4 * F * R
    temporaries = 4 * (6 * TQ * R + 4 * F * R)
    per_b = pipelined + temporaries
    cap = max(1, budget_bytes // per_b)
    cap = min(cap, 1024)                       # bound unrolled-loop compile time
    if num_cores > 1:
        # Keep at least num_cores grid steps so every TensorCore gets work.
        cap = min(cap, max(1, -(-B // num_cores)))
    cap = min(cap, B)
    # Prefer a BB that divides B (skips wrapper-side padding copies) and, on
    # multi-core chips, makes the number of grid steps a core-count multiple.
    lo = max(1, cap // 2)
    for bb in range(cap, lo - 1, -1):
        if B % bb == 0 and (B // bb) % num_cores == 0:
            return bb
    for bb in range(cap, lo - 1, -1):
        if B % bb == 0:
            return bb
    return cap


def obs_fusion(appear_score, reproj_score, o_desc, appear_t, rpj_t, w, b,
               batch_block=None):
    """appear/reproj: (B, TQ, R); o_desc: (B, F, TQ); w: (F, 2F); b: (F,)."""
    B, TQ, R = appear_score.shape
    F = o_desc.shape[1]
    out_dtype = jnp.result_type(o_desc.dtype, w.dtype)

    vmem_bytes, num_cores = _tpu_vmem_and_cores()
    # 64 MiB scoped limit on 128 MiB chips (v5e/v6e), 32 MiB on v7x (64 MiB).
    vmem_limit = int(min(vmem_bytes // 2, 64 << 20))
    itemsize = max(jnp.dtype(appear_score.dtype).itemsize,
                   jnp.dtype(o_desc.dtype).itemsize)
    BB = batch_block if batch_block is not None else _choose_batch_block(
        B, TQ, R, F, itemsize, vmem_limit // 2, num_cores)
    nblk = -(-B // BB)
    Bp = nblk * BB

    # Inputs stay in their native dtype (bandwidth win when upstream is bf16);
    # the kernel upcasts to f32 before softmax / matmul.
    appear_p, reproj_p, odesc_p = appear_score, reproj_score, o_desc
    if Bp != B:
        pad = Bp - B
        appear_p = jnp.pad(appear_p, ((0, pad), (0, 0), (0, 0)))
        reproj_p = jnp.pad(reproj_p, ((0, pad), (0, 0), (0, 0)),
                           constant_values=1.0)      # keep 1/(x+eps) benign
        odesc_p = jnp.pad(odesc_p, ((0, pad), (0, 0), (0, 0)))

    wa = w[:, :F].astype(jnp.float32)                # pre-split conv weight:
    wb = w[:, F:].astype(jnp.float32)                # no in-kernel lane slicing
    bias2d = b.reshape(F, 1).astype(jnp.float32)
    temps = jnp.concatenate([jnp.ravel(jnp.asarray(appear_t)),
                             jnp.ravel(jnp.asarray(rpj_t))]).astype(jnp.float32)

    flops = Bp * (4 * F * TQ * R + 4 * F * F * R + 10 * TQ * R)
    transcendentals = Bp * 3 * TQ * R
    bytes_accessed = (appear_p.size * appear_p.dtype.itemsize
                      + reproj_p.size * reproj_p.dtype.itemsize
                      + odesc_p.size * odesc_p.dtype.itemsize
                      + Bp * F * R * jnp.dtype(out_dtype).itemsize
                      + (2 * F * F + F + 2) * 4)

    out = pl.pallas_call(
        obs_fusion_kernel,
        out_shape=jax.ShapeDtypeStruct((Bp, F, R), out_dtype),
        grid_spec=pltpu.PrefetchScalarGridSpec(
            num_scalar_prefetch=0,
            grid=(nblk,),
            in_specs=[
                pl.BlockSpec(memory_space=pltpu.MemorySpace.SMEM),   # temps (2,)
                pl.BlockSpec((BB, TQ, R), lambda g: (g, 0, 0)),      # appear
                pl.BlockSpec((BB, TQ, R), lambda g: (g, 0, 0)),      # reproj
                pl.BlockSpec((BB, F, TQ), lambda g: (g, 0, 0)),      # o_desc
                pl.BlockSpec((F, F), lambda g: (0, 0)),              # Wa
                pl.BlockSpec((F, F), lambda g: (0, 0)),              # Wb
                pl.BlockSpec((F, 1), lambda g: (0, 0)),              # bias
            ],
            out_specs=pl.BlockSpec((BB, F, R), lambda g: (g, 0, 0)),
        ),
        compiler_params=pltpu.CompilerParams(
            dimension_semantics=("parallel",),
            vmem_limit_bytes=vmem_limit),
        cost_estimate=pl.CostEstimate(flops=flops,
                                      transcendentals=transcendentals,
                                      bytes_accessed=bytes_accessed),
    )(temps, appear_p, reproj_p, odesc_p, wa, wb, bias2d)

    return out if Bp == B else out[:B]


def obs_fusion_ref(appear_score, reproj_score, o_desc, appear_t, rpj_t, w, b):
    """Pure-JAX reference for correctness checking."""
    rpj = 1.0 / (reproj_score + 1.2e-05)
    a_s = jax.nn.softmax(appear_t * appear_score, axis=1)
    r_s = jax.nn.softmax(rpj_t * rpj, axis=1)
    a_f = jnp.einsum('bfq,bqr->bfr', o_desc, a_s)
    r_f = jnp.einsum('bfq,bqr->bfr', o_desc, r_s)
    cat = jnp.concatenate([a_f, r_f], axis=1)                  # (B, 2F, R)
    return jnp.einsum('oc,bcr->bor', w, cat) + b[None, :, None]


if __name__ == "__main__":
    # Small shapes consistent with the module: F (=in_c) channels, num_obs=2.
    B, F, TQ, R = 8, 32, 16, 64
    beta_init = 0.5

    key = jax.random.PRNGKey(0)
    k1, k2, k3, k4, k5 = jax.random.split(key, 5)

    appear_score = jax.random.normal(k1, (B, TQ, R), dtype=jnp.float32)
    # reprojection distances are positive
    reproj_score = jax.random.uniform(k2, (B, TQ, R), dtype=jnp.float32,
                                      minval=0.01, maxval=2.0)
    o_desc = jax.random.normal(k3, (B, F, TQ), dtype=jnp.float32)

    # Parameters (deterministic init, mimicking nn.Conv1d kaiming-uniform bounds).
    appear_t = jnp.ones((1,), jnp.float32) * beta_init
    rpj_t = jnp.ones((1,), jnp.float32) * beta_init
    bound = 1.0 / math.sqrt(2.0 * F)   # fan_in = 2F * kernel_size(1)
    w = jax.random.uniform(k4, (F, 2 * F), jnp.float32, -bound, bound)
    b = jax.random.uniform(k5, (F,), jnp.float32, -bound, bound)

    out = obs_fusion(appear_score, reproj_score, o_desc, appear_t, rpj_t, w, b)
    out = jax.block_until_ready(out)

    ref = obs_fusion_ref(appear_score, reproj_score, o_desc, appear_t, rpj_t, w, b)
    assert out.shape == (B, F, R)
    assert jnp.allclose(out, ref, atol=1e-4, rtol=1e-4), "mismatch vs reference"

    print("KERNEL_OK")
</pallas_src>

<mosaic_0001>
module attributes {stable_mosaic.version = 11 : i64} {
  func.func @obs_fusion_kernel(%arg0: i32, %arg1: memref<2xf32, #tpu.memory_space<smem>>, %arg2: memref<8x16x64xf32, #tpu.memory_space<vmem>>, %arg3: memref<8x16x64xf32, #tpu.memory_space<vmem>>, %arg4: memref<8x32x16xf32, #tpu.memory_space<vmem>>, %arg5: memref<32x32xf32, #tpu.memory_space<vmem>>, %arg6: memref<32x32xf32, #tpu.memory_space<vmem>>, %arg7: memref<32x1xf32, #tpu.memory_space<vmem>>, %arg8: memref<8x32x64xf32, #tpu.memory_space<vmem>>) attributes {dimension_semantics = [#tpu.dimension_semantics<parallel>], iteration_bounds = array<i64: 1>, scalar_prefetch = 0 : i64, scratch_operands = 0 : i64, tpu.core_type = #tpu.core_type<tc>, window_params = [{transform_indices = @transform_0, window_bounds = array<i64: 2>}, {transform_indices = @transform_1, window_bounds = array<i64: 8, 16, 64>}, {transform_indices = @transform_2, window_bounds = array<i64: 8, 16, 64>}, {transform_indices = @transform_3, window_bounds = array<i64: 8, 32, 16>}, {pipeline_mode = #tpu.pipeline_mode<synchronous>, transform_indices = @transform_4, window_bounds = array<i64: 32, 32>}, {pipeline_mode = #tpu.pipeline_mode<synchronous>, transform_indices = @transform_5, window_bounds = array<i64: 32, 32>}, {pipeline_mode = #tpu.pipeline_mode<synchronous>, transform_indices = @transform_6, window_bounds = array<i64: 32, 1>}, {transform_indices = @transform_7, window_bounds = array<i64: 8, 32, 64>}]} {
    %c0 = arith.constant 0 : index
    %0 = memref.load %arg1[%c0] : memref<2xf32, #tpu.memory_space<smem>>
    %c1 = arith.constant 1 : index
    %1 = memref.load %arg1[%c1] : memref<2xf32, #tpu.memory_space<smem>>
    %c0_0 = arith.constant 0 : index
    %c0_1 = arith.constant 0 : index
    %2 = vector.load %arg5[%c0_0, %c0_1] : memref<32x32xf32, #tpu.memory_space<vmem>>, vector<32x32xf32>
    %c0_2 = arith.constant 0 : index
    %c0_3 = arith.constant 0 : index
    %3 = vector.load %arg6[%c0_2, %c0_3] : memref<32x32xf32, #tpu.memory_space<vmem>>, vector<32x32xf32>
    %c0_4 = arith.constant 0 : index
    %c0_5 = arith.constant 0 : index
    %4 = vector.load %arg7[%c0_4, %c0_5] : memref<32x1xf32, #tpu.memory_space<vmem>>, vector<32x1xf32>
    %c0_6 = arith.constant 0 : index
    %c0_7 = arith.constant 0 : index
    %c0_8 = arith.constant 0 : index
    %5 = vector.load %arg2[%c0_6, %c0_7, %c0_8] : memref<8x16x64xf32, #tpu.memory_space<vmem>>, vector<1x16x64xf32>
    %6 = vector.shape_cast %5 : vector<1x16x64xf32> to vector<16x64xf32>
    %c0_9 = arith.constant 0 : index
    %c0_10 = arith.constant 0 : index
    %c0_11 = arith.constant 0 : index
    %7 = vector.load %arg3[%c0_9, %c0_10, %c0_11] : memref<8x16x64xf32, #tpu.memory_space<vmem>>, vector<1x16x64xf32>
    %8 = vector.shape_cast %7 : vector<1x16x64xf32> to vector<16x64xf32>
    %cst = arith.constant 1.200000e-05 : f32
    %9 = vector.broadcast %cst : f32 to vector<16x64xf32>
    %10 = arith.addf %8, %9 : vector<16x64xf32>
    %cst_12 = arith.constant 1.000000e+00 : f32
    %11 = vector.broadcast %cst_12 : f32 to vector<16x64xf32>
    %12 = arith.divf %11, %10 : vector<16x64xf32>
    %c0_13 = arith.constant 0 : index
    %c0_14 = arith.constant 0 : index
    %c0_15 = arith.constant 0 : index
    %13 = vector.load %arg4[%c0_13, %c0_14, %c0_15] : memref<8x32x16xf32, #tpu.memory_space<vmem>>, vector<1x32x16xf32>
    %14 = vector.shape_cast %13 : vector<1x32x16xf32> to vector<32x16xf32>
    %15 = vector.broadcast %0 : f32 to vector<16x64xf32>
    %16 = arith.mulf %15, %6 : vector<16x64xf32>
    %cst_16 = arith.constant dense<0xFF800000> : vector<64xf32>
    %17 = vector.multi_reduction <maximumf>, %16, %cst_16 [0] : vector<16x64xf32> to vector<64xf32>
    %18 = vector.shape_cast %17 : vector<64xf32> to vector<1x64xf32>
    %19 = vector.broadcast %18 : vector<1x64xf32> to vector<16x64xf32>
    %20 = arith.subf %16, %19 : vector<16x64xf32>
    %21 = math.exp %20 : vector<16x64xf32>
    %cst_17 = arith.constant dense<0.000000e+00> : vector<64xf32>
    %22 = vector.multi_reduction <add>, %21, %cst_17 [0] : vector<16x64xf32> to vector<64xf32>
    %23 = vector.shape_cast %22 : vector<64xf32> to vector<1x64xf32>
    %24 = tpu.reciprocal %23 : vector<1x64xf32> -> vector<1x64xf32>
    %25 = vector.broadcast %24 : vector<1x64xf32> to vector<16x64xf32>
    %26 = arith.mulf %21, %25 : vector<16x64xf32>
    %27 = vector.broadcast %1 : f32 to vector<16x64xf32>
    %28 = arith.mulf %27, %12 : vector<16x64xf32>
    %cst_18 = arith.constant dense<0xFF800000> : vector<64xf32>
    %29 = vector.multi_reduction <maximumf>, %28, %cst_18 [0] : vector<16x64xf32> to vector<64xf32>
    %30 = vector.shape_cast %29 : vector<64xf32> to vector<1x64xf32>
    %31 = vector.broadcast %30 : vector<1x64xf32> to vector<16x64xf32>
    %32 = arith.subf %28, %31 : vector<16x64xf32>
    %33 = math.exp %32 : vector<16x64xf32>
    %cst_19 = arith.constant dense<0.000000e+00> : vector<64xf32>
    %34 = vector.multi_reduction <add>, %33, %cst_19 [0] : vector<16x64xf32> to vector<64xf32>
    %35 = vector.shape_cast %34 : vector<64xf32> to vector<1x64xf32>
    %36 = tpu.reciprocal %35 : vector<1x64xf32> -> vector<1x64xf32>
    %37 = vector.broadcast %36 : vector<1x64xf32> to vector<16x64xf32>
    %38 = arith.mulf %33, %37 : vector<16x64xf32>
    %cst_20 = arith.constant dense<0.000000e+00> : vector<32x64xf32>
    %39 = tpu.matmul %14, %26, %cst_20 {dimension_numbers = #tpu.dot_dimension_numbers<[1], [0], [0], [1], [0, 0, 1, 1], [], []>} : vector<32x16xf32>, vector<16x64xf32>, vector<32x64xf32> -> vector<32x64xf32>
    %cst_21 = arith.constant dense<0.000000e+00> : vector<32x64xf32>
    %40 = tpu.matmul %14, %38, %cst_21 {dimension_numbers = #tpu.dot_dimension_numbers<[1], [0], [0], [1], [0, 0, 1, 1], [], []>} : vector<32x16xf32>, vector<16x64xf32>, vector<32x64xf32> -> vector<32x64xf32>
    %cst_22 = arith.constant dense<0.000000e+00> : vector<32x64xf32>
    %41 = tpu.matmul %2, %39, %cst_22 {dimension_numbers = #tpu.dot_dimension_numbers<[1], [0], [0], [1], [0, 0, 1, 1], [], []>} : vector<32x32xf32>, vector<32x64xf32>, vector<32x64xf32> -> vector<32x64xf32>
    %cst_23 = arith.constant dense<0.000000e+00> : vector<32x64xf32>
    %42 = tpu.matmul %3, %40, %cst_23 {dimension_numbers = #tpu.dot_dimension_numbers<[1], [0], [0], [1], [0, 0, 1, 1], [], []>} : vector<32x32xf32>, vector<32x64xf32>, vector<32x64xf32> -> vector<32x64xf32>
    %43 = arith.addf %41, %42 : vector<32x64xf32>
    %44 = vector.broadcast %4 : vector<32x1xf32> to vector<32x64xf32>
    %45 = arith.addf %43, %44 : vector<32x64xf32>
    %c0_24 = arith.constant 0 : index
    %c0_25 = arith.constant 0 : index
    %c0_26 = arith.constant 0 : index
    %46 = vector.load %arg8[%c0_24, %c0_25, %c0_26] : memref<8x32x64xf32, #tpu.memory_space<vmem>>, vector<1x32x64xf32>
    %47 = vector.shape_cast %46 : vector<1x32x64xf32> to vector<32x64xf32>
    %48 = vector.shape_cast %45 : vector<32x64xf32> to vector<1x32x64xf32>
    tpu.vector_store %arg8[%c0_24, %c0_25, %c0_26], %48 {strides = array<i32>} : memref<8x32x64xf32, #tpu.memory_space<vmem>>, vector<1x32x64xf32>,
    %c1_27 = arith.constant 1 : index
    %c0_28 = arith.constant 0 : index
    %c0_29 = arith.constant 0 : index
    %49 = vector.load %arg2[%c1_27, %c0_28, %c0_29] : memref<8x16x64xf32, #tpu.memory_space<vmem>>, vector<1x16x64xf32>
    %50 = vector.shape_cast %49 : vector<1x16x64xf32> to vector<16x64xf32>
    %c1_30 = arith.constant 1 : index
    %c0_31 = arith.constant 0 : index
    %c0_32 = arith.constant 0 : index
    %51 = vector.load %arg3[%c1_30, %c0_31, %c0_32] : memref<8x16x64xf32, #tpu.memory_space<vmem>>, vector<1x16x64xf32>
    %52 = vector.shape_cast %51 : vector<1x16x64xf32> to vector<16x64xf32>
    %cst_33 = arith.constant 1.200000e-05 : f32
    %53 = vector.broadcast %cst_33 : f32 to vector<16x64xf32>
    %54 = arith.addf %52, %53 : vector<16x64xf32>
    %cst_34 = arith.constant 1.000000e+00 : f32
    %55 = vector.broadcast %cst_34 : f32 to vector<16x64xf32>
    %56 = arith.divf %55, %54 : vector<16x64xf32>
    %c1_35 = arith.constant 1 : index
    %c0_36 = arith.constant 0 : index
    %c0_37 = arith.constant 0 : index
    %57 = vector.load %arg4[%c1_35, %c0_36, %c0_37] : memref<8x32x16xf32, #tpu.memory_space<vmem>>, vector<1x32x16xf32>
    %58 = vector.shape_cast %57 : vector<1x32x16xf32> to vector<32x16xf32>
    %59 = vector.broadcast %0 : f32 to vector<16x64xf32>
    %60 = arith.mulf %59, %50 : vector<16x64xf32>
    %cst_38 = arith.constant dense<0xFF800000> : vector<64xf32>
    %61 = vector.multi_reduction <maximumf>, %60, %cst_38 [0] : vector<16x64xf32> to vector<64xf32>
    %62 = vector.shape_cast %61 : vector<64xf32> to vector<1x64xf32>
    %63 = vector.broadcast %62 : vector<1x64xf32> to vector<16x64xf32>
    %64 = arith.subf %60, %63 : vector<16x64xf32>
    %65 = math.exp %64 : vector<16x64xf32>
    %cst_39 = arith.constant dense<0.000000e+00> : vector<64xf32>
    %66 = vector.multi_reduction <add>, %65, %cst_39 [0] : vector<16x64xf32> to vector<64xf32>
    %67 = vector.shape_cast %66 : vector<64xf32> to vector<1x64xf32>
    %68 = tpu.reciprocal %67 : vector<1x64xf32> -> vector<1x64xf32>
    %69 = vector.broadcast %68 : vector<1x64xf32> to vector<16x64xf32>
    %70 = arith.mulf %65, %69 : vector<16x64xf32>
    %71 = vector.broadcast %1 : f32 to vector<16x64xf32>
    %72 = arith.mulf %71, %56 : vector<16x64xf32>
    %cst_40 = arith.constant dense<0xFF800000> : vector<64xf32>
    %73 = vector.multi_reduction <maximumf>, %72, %cst_40 [0] : vector<16x64xf32> to vector<64xf32>
    %74 = vector.shape_cast %73 : vector<64xf32> to vector<1x64xf32>
    %75 = vector.broadcast %74 : vector<1x64xf32> to vector<16x64xf32>
    %76 = arith.subf %72, %75 : vector<16x64xf32>
    %77 = math.exp %76 : vector<16x64xf32>
    %cst_41 = arith.constant dense<0.000000e+00> : vector<64xf32>
    %78 = vector.multi_reduction <add>, %77, %cst_41 [0] : vector<16x64xf32> to vector<64xf32>
    %79 = vector.shape_cast %78 : vector<64xf32> to vector<1x64xf32>
    %80 = tpu.reciprocal %79 : vector<1x64xf32> -> vector<1x64xf32>
    %81 = vector.broadcast %80 : vector<1x64xf32> to vector<16x64xf32>
    %82 = arith.mulf %77, %81 : vector<16x64xf32>
    %cst_42 = arith.constant dense<0.000000e+00> : vector<32x64xf32>
    %83 = tpu.matmul %58, %70, %cst_42 {dimension_numbers = #tpu.dot_dimension_numbers<[1], [0], [0], [1], [0, 0, 1, 1], [], []>} : vector<32x16xf32>, vector<16x64xf32>, vector<32x64xf32> -> vector<32x64xf32>
    %cst_43 = arith.constant dense<0.000000e+00> : vector<32x64xf32>
    %84 = tpu.matmul %58, %82, %cst_43 {dimension_numbers = #tpu.dot_dimension_numbers<[1], [0], [0], [1], [0, 0, 1, 1], [], []>} : vector<32x16xf32>, vector<16x64xf32>, vector<32x64xf32> -> vector<32x64xf32>
    %cst_44 = arith.constant dense<0.000000e+00> : vector<32x64xf32>
    %85 = tpu.matmul %2, %83, %cst_44 {dimension_numbers = #tpu.dot_dimension_numbers<[1], [0], [0], [1], [0, 0, 1, 1], [], []>} : vector<32x32xf32>, vector<32x64xf32>, vector<32x64xf32> -> vector<32x64xf32>
    %cst_45 = arith.constant dense<0.000000e+00> : vector<32x64xf32>
    %86 = tpu.matmul %3, %84, %cst_45 {dimension_numbers = #tpu.dot_dimension_numbers<[1], [0], [0], [1], [0, 0, 1, 1], [], []>} : vector<32x32xf32>, vector<32x64xf32>, vector<32x64xf32> -> vector<32x64xf32>
    %87 = arith.addf %85, %86 : vector<32x64xf32>
    %88 = vector.broadcast %4 : vector<32x1xf32> to vector<32x64xf32>
    %89 = arith.addf %87, %88 : vector<32x64xf32>
    %c1_46 = arith.constant 1 : index
    %c0_47 = arith.constant 0 : index
    %c0_48 = arith.constant 0 : index
    %90 = vector.load %arg8[%c1_46, %c0_47, %c0_48] : memref<8x32x64xf32, #tpu.memory_space<vmem>>, vector<1x32x64xf32>
    %91 = vector.shape_cast %90 : vector<1x32x64xf32> to vector<32x64xf32>
    %92 = vector.shape_cast %89 : vector<32x64xf32> to vector<1x32x64xf32>
    tpu.vector_store %arg8[%c1_46, %c0_47, %c0_48], %92 {strides = array<i32>} : memref<8x32x64xf32, #tpu.memory_space<vmem>>, vector<1x32x64xf32>,
    %c2 = arith.constant 2 : index
    %c0_49 = arith.constant 0 : index
    %c0_50 = arith.constant 0 : index
    %93 = vector.load %arg2[%c2, %c0_49, %c0_50] : memref<8x16x64xf32, #tpu.memory_space<vmem>>, vector<1x16x64xf32>
    %94 = vector.shape_cast %93 : vector<1x16x64xf32> to vector<16x64xf32>
    %c2_51 = arith.constant 2 : index
    %c0_52 = arith.constant 0 : index
    %c0_53 = arith.constant 0 : index
    %95 = vector.load %arg3[%c2_51, %c0_52, %c0_53] : memref<8x16x64xf32, #tpu.memory_space<vmem>>, vector<1x16x64xf32>
    %96 = vector.shape_cast %95 : vector<1x16x64xf32> to vector<16x64xf32>
    %cst_54 = arith.constant 1.200000e-05 : f32
    %97 = vector.broadcast %cst_54 : f32 to vector<16x64xf32>
    %98 = arith.addf %96, %97 : vector<16x64xf32>
    %cst_55 = arith.constant 1.000000e+00 : f32
    %99 = vector.broadcast %cst_55 : f32 to vector<16x64xf32>
    %100 = arith.divf %99, %98 : vector<16x64xf32>
    %c2_56 = arith.constant 2 : index
    %c0_57 = arith.constant 0 : index
    %c0_58 = arith.constant 0 : index
    %101 = vector.load %arg4[%c2_56, %c0_57, %c0_58] : memref<8x32x16xf32, #tpu.memory_space<vmem>>, vector<1x32x16xf32>
    %102 = vector.shape_cast %101 : vector<1x32x16xf32> to vector<32x16xf32>
    %103 = vector.broadcast %0 : f32 to vector<16x64xf32>
    %104 = arith.mulf %103, %94 : vector<16x64xf32>
    %cst_59 = arith.constant dense<0xFF800000> : vector<64xf32>
    %105 = vector.multi_reduction <maximumf>, %104, %cst_59 [0] : vector<16x64xf32> to vector<64xf32>
    %106 = vector.shape_cast %105 : vector<64xf32> to vector<1x64xf32>
    %107 = vector.broadcast %106 : vector<1x64xf32> to vector<16x64xf32>
    %108 = arith.subf %104, %107 : vector<16x64xf32>
    %109 = math.exp %108 : vector<16x64xf32>
    %cst_60 = arith.constant dense<0.000000e+00> : vector<64xf32>
    %110 = vector.multi_reduction <add>, %109, %cst_60 [0] : vector<16x64xf32> to vector<64xf32>
    %111 = vector.shape_cast %110 : vector<64xf32> to vector<1x64xf32>
    %112 = tpu.reciprocal %111 : vector<1x64xf32> -> vector<1x64xf32>
    %113 = vector.broadcast %112 : vector<1x64xf32> to vector<16x64xf32>
    %114 = arith.mulf %109, %113 : vector<16x64xf32>
    %115 = vector.broadcast %1 : f32 to vector<16x64xf32>
    %116 = arith.mulf %115, %100 : vector<16x64xf32>
    %cst_61 = arith.constant dense<0xFF800000> : vector<64xf32>
    %117 = vector.multi_reduction <maximumf>, %116, %cst_61 [0] : vector<16x64xf32> to vector<64xf32>
    %118 = vector.shape_cast %117 : vector<64xf32> to vector<1x64xf32>
    %119 = vector.broadcast %118 : vector<1x64xf32> to vector<16x64xf32>
    %120 = arith.subf %116, %119 : vector<16x64xf32>
    %121 = math.exp %120 : vector<16x64xf32>
    %cst_62 = arith.constant dense<0.000000e+00> : vector<64xf32>
    %122 = vector.multi_reduction <add>, %121, %cst_62 [0] : vector<16x64xf32> to vector<64xf32>
    %123 = vector.shape_cast %122 : vector<64xf32> to vector<1x64xf32>
    %124 = tpu.reciprocal %123 : vector<1x64xf32> -> vector<1x64xf32>
    %125 = vector.broadcast %124 : vector<1x64xf32> to vector<16x64xf32>
    %126 = arith.mulf %121, %125 : vector<16x64xf32>
    %cst_63 = arith.constant dense<0.000000e+00> : vector<32x64xf32>
    %127 = tpu.matmul %102, %114, %cst_63 {dimension_numbers = #tpu.dot_dimension_numbers<[1], [0], [0], [1], [0, 0, 1, 1], [], []>} : vector<32x16xf32>, vector<16x64xf32>, vector<32x64xf32> -> vector<32x64xf32>
    %cst_64 = arith.constant dense<0.000000e+00> : vector<32x64xf32>
    %128 = tpu.matmul %102, %126, %cst_64 {dimension_numbers = #tpu.dot_dimension_numbers<[1], [0], [0], [1], [0, 0, 1, 1], [], []>} : vector<32x16xf32>, vector<16x64xf32>, vector<32x64xf32> -> vector<32x64xf32>
    %cst_65 = arith.constant dense<0.000000e+00> : vector<32x64xf32>
    %129 = tpu.matmul %2, %127, %cst_65 {dimension_numbers = #tpu.dot_dimension_numbers<[1], [0], [0], [1], [0, 0, 1, 1], [], []>} : vector<32x32xf32>, vector<32x64xf32>, vector<32x64xf32> -> vector<32x64xf32>
    %cst_66 = arith.constant dense<0.000000e+00> : vector<32x64xf32>
    %130 = tpu.matmul %3, %128, %cst_66 {dimension_numbers = #tpu.dot_dimension_numbers<[1], [0], [0], [1], [0, 0, 1, 1], [], []>} : vector<32x32xf32>, vector<32x64xf32>, vector<32x64xf32> -> vector<32x64xf32>
    %131 = arith.addf %129, %130 : vector<32x64xf32>
    %132 = vector.broadcast %4 : vector<32x1xf32> to vector<32x64xf32>
    %133 = arith.addf %131, %132 : vector<32x64xf32>
    %c2_67 = arith.constant 2 : index
    %c0_68 = arith.constant 0 : index
    %c0_69 = arith.constant 0 : index
    %134 = vector.load %arg8[%c2_67, %c0_68, %c0_69] : memref<8x32x64xf32, #tpu.memory_space<vmem>>, vector<1x32x64xf32>
    %135 = vector.shape_cast %134 : vector<1x32x64xf32> to vector<32x64xf32>
    %136 = vector.shape_cast %133 : vector<32x64xf32> to vector<1x32x64xf32>
    tpu.vector_store %arg8[%c2_67, %c0_68, %c0_69], %136 {strides = array<i32>} : memref<8x32x64xf32, #tpu.memory_space<vmem>>, vector<1x32x64xf32>,
    %c3 = arith.constant 3 : index
    %c0_70 = arith.constant 0 : index
    %c0_71 = arith.constant 0 : index
    %137 = vector.load %arg2[%c3, %c0_70, %c0_71] : memref<8x16x64xf32, #tpu.memory_space<vmem>>, vector<1x16x64xf32>
    %138 = vector.shape_cast %137 : vector<1x16x64xf32> to vector<16x64xf32>
    %c3_72 = arith.constant 3 : index
    %c0_73 = arith.constant 0 : index
    %c0_74 = arith.constant 0 : index
    %139 = vector.load %arg3[%c3_72, %c0_73, %c0_74] : memref<8x16x64xf32, #tpu.memory_space<vmem>>, vector<1x16x64xf32>
    %140 = vector.shape_cast %139 : vector<1x16x64xf32> to vector<16x64xf32>
    %cst_75 = arith.constant 1.200000e-05 : f32
    %141 = vector.broadcast %cst_75 : f32 to vector<16x64xf32>
    %142 = arith.addf %140, %141 : vector<16x64xf32>
    %cst_76 = arith.constant 1.000000e+00 : f32
    %143 = vector.broadcast %cst_76 : f32 to vector<16x64xf32>
    %144 = arith.divf %143, %142 : vector<16x64xf32>
    %c3_77 = arith.constant 3 : index
    %c0_78 = arith.constant 0 : index
    %c0_79 = arith.constant 0 : index
    %145 = vector.load %arg4[%c3_77, %c0_78, %c0_79] : memref<8x32x16xf32, #tpu.memory_space<vmem>>, vector<1x32x16xf32>
    %146 = vector.shape_cast %145 : vector<1x32x16xf32> to vector<32x16xf32>
    %147 = vector.broadcast %0 : f32 to vector<16x64xf32>
    %148 = arith.mulf %147, %138 : vector<16x64xf32>
    %cst_80 = arith.constant dense<0xFF800000> : vector<64xf32>
    %149 = vector.multi_reduction <maximumf>, %148, %cst_80 [0] : vector<16x64xf32> to vector<64xf32>
    %150 = vector.shape_cast %149 : vector<64xf32> to vector<1x64xf32>
    %151 = vector.broadcast %150 : vector<1x64xf32> to vector<16x64xf32>
    %152 = arith.subf %148, %151 : vector<16x64xf32>
    %153 = math.exp %152 : vector<16x64xf32>
    %cst_81 = arith.constant dense<0.000000e+00> : vector<64xf32>
    %154 = vector.multi_reduction <add>, %153, %cst_81 [0] : vector<16x64xf32> to vector<64xf32>
    %155 = vector.shape_cast %154 : vector<64xf32> to vector<1x64xf32>
    %156 = tpu.reciprocal %155 : vector<1x64xf32> -> vector<1x64xf32>
    %157 = vector.broadcast %156 : vector<1x64xf32> to vector<16x64xf32>
    %158 = arith.mulf %153, %157 : vector<16x64xf32>
    %159 = vector.broadcast %1 : f32 to vector<16x64xf32>
    %160 = arith.mulf %159, %144 : vector<16x64xf32>
    %cst_82 = arith.constant dense<0xFF800000> : vector<64xf32>
    %161 = vector.multi_reduction <maximumf>, %160, %cst_82 [0] : vector<16x64xf32> to vector<64xf32>
    %162 = vector.shape_cast %161 : vector<64xf32> to vector<1x64xf32>
    %163 = vector.broadcast %162 : vector<1x64xf32> to vector<16x64xf32>
    %164 = arith.subf %160, %163 : vector<16x64xf32>
    %165 = math.exp %164 : vector<16x64xf32>
    %cst_83 = arith.constant dense<0.000000e+00> : vector<64xf32>
    %166 = vector.multi_reduction <add>, %165, %cst_83 [0] : vector<16x64xf32> to vector<64xf32>
    %167 = vector.shape_cast %166 : vector<64xf32> to vector<1x64xf32>
    %168 = tpu.reciprocal %167 : vector<1x64xf32> -> vector<1x64xf32>
    %169 = vector.broadcast %168 : vector<1x64xf32> to vector<16x64xf32>
    %170 = arith.mulf %165, %169 : vector<16x64xf32>
    %cst_84 = arith.constant dense<0.000000e+00> : vector<32x64xf32>
    %171 = tpu.matmul %146, %158, %cst_84 {dimension_numbers = #tpu.dot_dimension_numbers<[1], [0], [0], [1], [0, 0, 1, 1], [], []>} : vector<32x16xf32>, vector<16x64xf32>, vector<32x64xf32> -> vector<32x64xf32>
    %cst_85 = arith.constant dense<0.000000e+00> : vector<32x64xf32>
    %172 = tpu.matmul %146, %170, %cst_85 {dimension_numbers = #tpu.dot_dimension_numbers<[1], [0], [0], [1], [0, 0, 1, 1], [], []>} : vector<32x16xf32>, vector<16x64xf32>, vector<32x64xf32> -> vector<32x64xf32>
    %cst_86 = arith.constant dense<0.000000e+00> : vector<32x64xf32>
    %173 = tpu.matmul %2, %171, %cst_86 {dimension_numbers = #tpu.dot_dimension_numbers<[1], [0], [0], [1], [0, 0, 1, 1], [], []>} : vector<32x32xf32>, vector<32x64xf32>, vector<32x64xf32> -> vector<32x64xf32>
    %cst_87 = arith.constant dense<0.000000e+00> : vector<32x64xf32>
    %174 = tpu.matmul %3, %172, %cst_87 {dimension_numbers = #tpu.dot_dimension_numbers<[1], [0], [0], [1], [0, 0, 1, 1], [], []>} : vector<32x32xf32>, vector<32x64xf32>, vector<32x64xf32> -> vector<32x64xf32>
    %175 = arith.addf %173, %174 : vector<32x64xf32>
    %176 = vector.broadcast %4 : vector<32x1xf32> to vector<32x64xf32>
    %177 = arith.addf %175, %176 : vector<32x64xf32>
    %c3_88 = arith.constant 3 : index
    %c0_89 = arith.constant 0 : index
    %c0_90 = arith.constant 0 : index
    %178 = vector.load %arg8[%c3_88, %c0_89, %c0_90] : memref<8x32x64xf32, #tpu.memory_space<vmem>>, vector<1x32x64xf32>
    %179 = vector.shape_cast %178 : vector<1x32x64xf32> to vector<32x64xf32>
    %180 = vector.shape_cast %177 : vector<32x64xf32> to vector<1x32x64xf32>
    tpu.vector_store %arg8[%c3_88, %c0_89, %c0_90], %180 {strides = array<i32>} : memref<8x32x64xf32, #tpu.memory_space<vmem>>, vector<1x32x64xf32>,
    %c4 = arith.constant 4 : index
    %c0_91 = arith.constant 0 : index
    %c0_92 = arith.constant 0 : index
    %181 = vector.load %arg2[%c4, %c0_91, %c0_92] : memref<8x16x64xf32, #tpu.memory_space<vmem>>, vector<1x16x64xf32>
    %182 = vector.shape_cast %181 : vector<1x16x64xf32> to vector<16x64xf32>
    %c4_93 = arith.constant 4 : index
    %c0_94 = arith.constant 0 : index
    %c0_95 = arith.constant 0 : index
    %183 = vector.load %arg3[%c4_93, %c0_94, %c0_95] : memref<8x16x64xf32, #tpu.memory_space<vmem>>, vector<1x16x64xf32>
    %184 = vector.shape_cast %183 : vector<1x16x64xf32> to vector<16x64xf32>
    %cst_96 = arith.constant 1.200000e-05 : f32
    %185 = vector.broadcast %cst_96 : f32 to vector<16x64xf32>
    %186 = arith.addf %184, %185 : vector<16x64xf32>
    %cst_97 = arith.constant 1.000000e+00 : f32
    %187 = vector.broadcast %cst_97 : f32 to vector<16x64xf32>
    %188 = arith.divf %187, %186 : vector<16x64xf32>
    %c4_98 = arith.constant 4 : index
    %c0_99 = arith.constant 0 : index
    %c0_100 = arith.constant 0 : index
    %189 = vector.load %arg4[%c4_98, %c0_99, %c0_100] : memref<8x32x16xf32, #tpu.memory_space<vmem>>, vector<1x32x16xf32>
    %190 = vector.shape_cast %189 : vector<1x32x16xf32> to vector<32x16xf32>
    %191 = vector.broadcast %0 : f32 to vector<16x64xf32>
    %192 = arith.mulf %191, %182 : vector<16x64xf32>
    %cst_101 = arith.constant dense<0xFF800000> : vector<64xf32>
    %193 = vector.multi_reduction <maximumf>, %192, %cst_101 [0] : vector<16x64xf32> to vector<64xf32>
    %194 = vector.shape_cast %193 : vector<64xf32> to vector<1x64xf32>
    %195 = vector.broadcast %194 : vector<1x64xf32> to vector<16x64xf32>
    %196 = arith.subf %192, %195 : vector<16x64xf32>
    %197 = math.exp %196 : vector<16x64xf32>
    %cst_102 = arith.constant dense<0.000000e+00> : vector<64xf32>
    %198 = vector.multi_reduction <add>, %197, %cst_102 [0] : vector<16x64xf32> to vector<64xf32>
    %199 = vector.shape_cast %198 : vector<64xf32> to vector<1x64xf32>
    %200 = tpu.reciprocal %199 : vector<1x64xf32> -> vector<1x64xf32>
    %201 = vector.broadcast %200 : vector<1x64xf32> to vector<16x64xf32>
    %202 = arith.mulf %197, %201 : vector<16x64xf32>
    %203 = vector.broadcast %1 : f32 to vector<16x64xf32>
    %204 = arith.mulf %203, %188 : vector<16x64xf32>
    %cst_103 = arith.constant dense<0xFF800000> : vector<64xf32>
    %205 = vector.multi_reduction <maximumf>, %204, %cst_103 [0] : vector<16x64xf32> to vector<64xf32>
    %206 = vector.shape_cast %205 : vector<64xf32> to vector<1x64xf32>
    %207 = vector.broadcast %206 : vector<1x64xf32> to vector<16x64xf32>
    %208 = arith.subf %204, %207 : vector<16x64xf32>
    %209 = math.exp %208 : vector<16x64xf32>
    %cst_104 = arith.constant dense<0.000000e+00> : vector<64xf32>
    %210 = vector.multi_reduction <add>, %209, %cst_104 [0] : vector<16x64xf32> to vector<64xf32>
    %211 = vector.shape_cast %210 : vector<64xf32> to vector<1x64xf32>
    %212 = tpu.reciprocal %211 : vector<1x64xf32> -> vector<1x64xf32>
    %213 = vector.broadcast %212 : vector<1x64xf32> to vector<16x64xf32>
    %214 = arith.mulf %209, %213 : vector<16x64xf32>
    %cst_105 = arith.constant dense<0.000000e+00> : vector<32x64xf32>
    %215 = tpu.matmul %190, %202, %cst_105 {dimension_numbers = #tpu.dot_dimension_numbers<[1], [0], [0], [1], [0, 0, 1, 1], [], []>} : vector<32x16xf32>, vector<16x64xf32>, vector<32x64xf32> -> vector<32x64xf32>
    %cst_106 = arith.constant dense<0.000000e+00> : vector<32x64xf32>
    %216 = tpu.matmul %190, %214, %cst_106 {dimension_numbers = #tpu.dot_dimension_numbers<[1], [0], [0], [1], [0, 0, 1, 1], [], []>} : vector<32x16xf32>, vector<16x64xf32>, vector<32x64xf32> -> vector<32x64xf32>
    %cst_107 = arith.constant dense<0.000000e+00> : vector<32x64xf32>
    %217 = tpu.matmul %2, %215, %cst_107 {dimension_numbers = #tpu.dot_dimension_numbers<[1], [0], [0], [1], [0, 0, 1, 1], [], []>} : vector<32x32xf32>, vector<32x64xf32>, vector<32x64xf32> -> vector<32x64xf32>
    %cst_108 = arith.constant dense<0.000000e+00> : vector<32x64xf32>
    %218 = tpu.matmul %3, %216, %cst_108 {dimension_numbers = #tpu.dot_dimension_numbers<[1], [0], [0], [1], [0, 0, 1, 1], [], []>} : vector<32x32xf32>, vector<32x64xf32>, vector<32x64xf32> -> vector<32x64xf32>
    %219 = arith.addf %217, %218 : vector<32x64xf32>
    %220 = vector.broadcast %4 : vector<32x1xf32> to vector<32x64xf32>
    %221 = arith.addf %219, %220 : vector<32x64xf32>
    %c4_109 = arith.constant 4 : index
    %c0_110 = arith.constant 0 : index
    %c0_111 = arith.constant 0 : index
    %222 = vector.load %arg8[%c4_109, %c0_110, %c0_111] : memref<8x32x64xf32, #tpu.memory_space<vmem>>, vector<1x32x64xf32>
    %223 = vector.shape_cast %222 : vector<1x32x64xf32> to vector<32x64xf32>
    %224 = vector.shape_cast %221 : vector<32x64xf32> to vector<1x32x64xf32>
    tpu.vector_store %arg8[%c4_109, %c0_110, %c0_111], %224 {strides = array<i32>} : memref<8x32x64xf32, #tpu.memory_space<vmem>>, vector<1x32x64xf32>,
    %c5 = arith.constant 5 : index
    %c0_112 = arith.constant 0 : index
    %c0_113 = arith.constant 0 : index
    %225 = vector.load %arg2[%c5, %c0_112, %c0_113] : memref<8x16x64xf32, #tpu.memory_space<vmem>>, vector<1x16x64xf32>
    %226 = vector.shape_cast %225 : vector<1x16x64xf32> to vector<16x64xf32>
    %c5_114 = arith.constant 5 : index
    %c0_115 = arith.constant 0 : index
    %c0_116 = arith.constant 0 : index
    %227 = vector.load %arg3[%c5_114, %c0_115, %c0_116] : memref<8x16x64xf32, #tpu.memory_space<vmem>>, vector<1x16x64xf32>
    %228 = vector.shape_cast %227 : vector<1x16x64xf32> to vector<16x64xf32>
    %cst_117 = arith.constant 1.200000e-05 : f32
    %229 = vector.broadcast %cst_117 : f32 to vector<16x64xf32>
    %230 = arith.addf %228, %229 : vector<16x64xf32>
    %cst_118 = arith.constant 1.000000e+00 : f32
    %231 = vector.broadcast %cst_118 : f32 to vector<16x64xf32>
    %232 = arith.divf %231, %230 : vector<16x64xf32>
    %c5_119 = arith.constant 5 : index
    %c0_120 = arith.constant 0 : index
    %c0_121 = arith.constant 0 : index
    %233 = vector.load %arg4[%c5_119, %c0_120, %c0_121] : memref<8x32x16xf32, #tpu.memory_space<vmem>>, vector<1x32x16xf32>
    %234 = vector.shape_cast %233 : vector<1x32x16xf32> to vector<32x16xf32>
    %235 = vector.broadcast %0 : f32 to vector<16x64xf32>
    %236 = arith.mulf %235, %226 : vector<16x64xf32>
    %cst_122 = arith.constant dense<0xFF800000> : vector<64xf32>
    %237 = vector.multi_reduction <maximumf>, %236, %cst_122 [0] : vector<16x64xf32> to vector<64xf32>
    %238 = vector.shape_cast %237 : vector<64xf32> to vector<1x64xf32>
    %239 = vector.broadcast %238 : vector<1x64xf32> to vector<16x64xf32>
    %240 = arith.subf %236, %239 : vector<16x64xf32>
    %241 = math.exp %240 : vector<16x64xf32>
    %cst_123 = arith.constant dense<0.000000e+00> : vector<64xf32>
    %242 = vector.multi_reduction <add>, %241, %cst_123 [0] : vector<16x64xf32> to vector<64xf32>
    %243 = vector.shape_cast %242 : vector<64xf32> to vector<1x64xf32>
    %244 = tpu.reciprocal %243 : vector<1x64xf32> -> vector<1x64xf32>
    %245 = vector.broadcast %244 : vector<1x64xf32> to vector<16x64xf32>
    %246 = arith.mulf %241, %245 : vector<16x64xf32>
    %247 = vector.broadcast %1 : f32 to vector<16x64xf32>
    %248 = arith.mulf %247, %232 : vector<16x64xf32>
    %cst_124 = arith.constant dense<0xFF800000> : vector<64xf32>
    %249 = vector.multi_reduction <maximumf>, %248, %cst_124 [0] : vector<16x64xf32> to vector<64xf32>
    %250 = vector.shape_cast %249 : vector<64xf32> to vector<1x64xf32>
    %251 = vector.broadcast %250 : vector<1x64xf32> to vector<16x64xf32>
    %252 = arith.subf %248, %251 : vector<16x64xf32>
    %253 = math.exp %252 : vector<16x64xf32>
    %cst_125 = arith.constant dense<0.000000e+00> : vector<64xf32>
    %254 = vector.multi_reduction <add>, %253, %cst_125 [0] : vector<16x64xf32> to vector<64xf32>
    %255 = vector.shape_cast %254 : vector<64xf32> to vector<1x64xf32>
    %256 = tpu.reciprocal %255 : vector<1x64xf32> -> vector<1x64xf32>
    %257 = vector.broadcast %256 : vector<1x64xf32> to vector<16x64xf32>
    %258 = arith.mulf %253, %257 : vector<16x64xf32>
    %cst_126 = arith.constant dense<0.000000e+00> : vector<32x64xf32>
    %259 = tpu.matmul %234, %246, %cst_126 {dimension_numbers = #tpu.dot_dimension_numbers<[1], [0], [0], [1], [0, 0, 1, 1], [], []>} : vector<32x16xf32>, vector<16x64xf32>, vector<32x64xf32> -> vector<32x64xf32>
    %cst_127 = arith.constant dense<0.000000e+00> : vector<32x64xf32>
    %260 = tpu.matmul %234, %258, %cst_127 {dimension_numbers = #tpu.dot_dimension_numbers<[1], [0], [0], [1], [0, 0, 1, 1], [], []>} : vector<32x16xf32>, vector<16x64xf32>, vector<32x64xf32> -> vector<32x64xf32>
    %cst_128 = arith.constant dense<0.000000e+00> : vector<32x64xf32>
    %261 = tpu.matmul %2, %259, %cst_128 {dimension_numbers = #tpu.dot_dimension_numbers<[1], [0], [0], [1], [0, 0, 1, 1], [], []>} : vector<32x32xf32>, vector<32x64xf32>, vector<32x64xf32> -> vector<32x64xf32>
    %cst_129 = arith.constant dense<0.000000e+00> : vector<32x64xf32>
    %262 = tpu.matmul %3, %260, %cst_129 {dimension_numbers = #tpu.dot_dimension_numbers<[1], [0], [0], [1], [0, 0, 1, 1], [], []>} : vector<32x32xf32>, vector<32x64xf32>, vector<32x64xf32> -> vector<32x64xf32>
    %263 = arith.addf %261, %262 : vector<32x64xf32>
    %264 = vector.broadcast %4 : vector<32x1xf32> to vector<32x64xf32>
    %265 = arith.addf %263, %264 : vector<32x64xf32>
    %c5_130 = arith.constant 5 : index
    %c0_131 = arith.constant 0 : index
    %c0_132 = arith.constant 0 : index
    %266 = vector.load %arg8[%c5_130, %c0_131, %c0_132] : memref<8x32x64xf32, #tpu.memory_space<vmem>>, vector<1x32x64xf32>
    %267 = vector.shape_cast %266 : vector<1x32x64xf32> to vector<32x64xf32>
    %268 = vector.shape_cast %265 : vector<32x64xf32> to vector<1x32x64xf32>
    tpu.vector_store %arg8[%c5_130, %c0_131, %c0_132], %268 {strides = array<i32>} : memref<8x32x64xf32, #tpu.memory_space<vmem>>, vector<1x32x64xf32>,
    %c6 = arith.constant 6 : index
    %c0_133 = arith.constant 0 : index
    %c0_134 = arith.constant 0 : index
    %269 = vector.load %arg2[%c6, %c0_133, %c0_134] : memref<8x16x64xf32, #tpu.memory_space<vmem>>, vector<1x16x64xf32>
    %270 = vector.shape_cast %269 : vector<1x16x64xf32> to vector<16x64xf32>
    %c6_135 = arith.constant 6 : index
    %c0_136 = arith.constant 0 : index
    %c0_137 = arith.constant 0 : index
    %271 = vector.load %arg3[%c6_135, %c0_136, %c0_137] : memref<8x16x64xf32, #tpu.memory_space<vmem>>, vector<1x16x64xf32>
    %272 = vector.shape_cast %271 : vector<1x16x64xf32> to vector<16x64xf32>
    %cst_138 = arith.constant 1.200000e-05 : f32
    %273 = vector.broadcast %cst_138 : f32 to vector<16x64xf32>
    %274 = arith.addf %272, %273 : vector<16x64xf32>
    %cst_139 = arith.constant 1.000000e+00 : f32
    %275 = vector.broadcast %cst_139 : f32 to vector<16x64xf32>
    %276 = arith.divf %275, %274 : vector<16x64xf32>
    %c6_140 = arith.constant 6 : index
    %c0_141 = arith.constant 0 : index
    %c0_142 = arith.constant 0 : index
    %277 = vector.load %arg4[%c6_140, %c0_141, %c0_142] : memref<8x32x16xf32, #tpu.memory_space<vmem>>, vector<1x32x16xf32>
    %278 = vector.shape_cast %277 : vector<1x32x16xf32> to vector<32x16xf32>
    %279 = vector.broadcast %0 : f32 to vector<16x64xf32>
    %280 = arith.mulf %279, %270 : vector<16x64xf32>
    %cst_143 = arith.constant dense<0xFF800000> : vector<64xf32>
    %281 = vector.multi_reduction <maximumf>, %280, %cst_143 [0] : vector<16x64xf32> to vector<64xf32>
    %282 = vector.shape_cast %281 : vector<64xf32> to vector<1x64xf32>
    %283 = vector.broadcast %282 : vector<1x64xf32> to vector<16x64xf32>
    %284 = arith.subf %280, %283 : vector<16x64xf32>
    %285 = math.exp %284 : vector<16x64xf32>
    %cst_144 = arith.constant dense<0.000000e+00> : vector<64xf32>
    %286 = vector.multi_reduction <add>, %285, %cst_144 [0] : vector<16x64xf32> to vector<64xf32>
    %287 = vector.shape_cast %286 : vector<64xf32> to vector<1x64xf32>
    %288 = tpu.reciprocal %287 : vector<1x64xf32> -> vector<1x64xf32>
    %289 = vector.broadcast %288 : vector<1x64xf32> to vector<16x64xf32>
    %290 = arith.mulf %285, %289 : vector<16x64xf32>
    %291 = vector.broadcast %1 : f32 to vector<16x64xf32>
    %292 = arith.mulf %291, %276 : vector<16x64xf32>
    %cst_145 = arith.constant dense<0xFF800000> : vector<64xf32>
    %293 = vector.multi_reduction <maximumf>, %292, %cst_145 [0] : vector<16x64xf32> to vector<64xf32>
    %294 = vector.shape_cast %293 : vector<64xf32> to vector<1x64xf32>
    %295 = vector.broadcast %294 : vector<1x64xf32> to vector<16x64xf32>
    %296 = arith.subf %292, %295 : vector<16x64xf32>
    %297 = math.exp %296 : vector<16x64xf32>
    %cst_146 = arith.constant dense<0.000000e+00> : vector<64xf32>
    %298 = vector.multi_reduction <add>, %297, %cst_146 [0] : vector<16x64xf32> to vector<64xf32>
    %299 = vector.shape_cast %298 : vector<64xf32> to vector<1x64xf32>
    %300 = tpu.reciprocal %299 : vector<1x64xf32> -> vector<1x64xf32>
    %301 = vector.broadcast %300 : vector<1x64xf32> to vector<16x64xf32>
    %302 = arith.mulf %297, %301 : vector<16x64xf32>
    %cst_147 = arith.constant dense<0.000000e+00> : vector<32x64xf32>
    %303 = tpu.matmul %278, %290, %cst_147 {dimension_numbers = #tpu.dot_dimension_numbers<[1], [0], [0], [1], [0, 0, 1, 1], [], []>} : vector<32x16xf32>, vector<16x64xf32>, vector<32x64xf32> -> vector<32x64xf32>
    %cst_148 = arith.constant dense<0.000000e+00> : vector<32x64xf32>
    %304 = tpu.matmul %278, %302, %cst_148 {dimension_numbers = #tpu.dot_dimension_numbers<[1], [0], [0], [1], [0, 0, 1, 1], [], []>} : vector<32x16xf32>, vector<16x64xf32>, vector<32x64xf32> -> vector<32x64xf32>
    %cst_149 = arith.constant dense<0.000000e+00> : vector<32x64xf32>
    %305 = tpu.matmul %2, %303, %cst_149 {dimension_numbers = #tpu.dot_dimension_numbers<[1], [0], [0], [1], [0, 0, 1, 1], [], []>} : vector<32x32xf32>, vector<32x64xf32>, vector<32x64xf32> -> vector<32x64xf32>
    %cst_150 = arith.constant dense<0.000000e+00> : vector<32x64xf32>
    %306 = tpu.matmul %3, %304, %cst_150 {dimension_numbers = #tpu.dot_dimension_numbers<[1], [0], [0], [1], [0, 0, 1, 1], [], []>} : vector<32x32xf32>, vector<32x64xf32>, vector<32x64xf32> -> vector<32x64xf32>
    %307 = arith.addf %305, %306 : vector<32x64xf32>
    %308 = vector.broadcast %4 : vector<32x1xf32> to vector<32x64xf32>
    %309 = arith.addf %307, %308 : vector<32x64xf32>
    %c6_151 = arith.constant 6 : index
    %c0_152 = arith.constant 0 : index
    %c0_153 = arith.constant 0 : index
    %310 = vector.load %arg8[%c6_151, %c0_152, %c0_153] : memref<8x32x64xf32, #tpu.memory_space<vmem>>, vector<1x32x64xf32>
    %311 = vector.shape_cast %310 : vector<1x32x64xf32> to vector<32x64xf32>
    %312 = vector.shape_cast %309 : vector<32x64xf32> to vector<1x32x64xf32>
    tpu.vector_store %arg8[%c6_151, %c0_152, %c0_153], %312 {strides = array<i32>} : memref<8x32x64xf32, #tpu.memory_space<vmem>>, vector<1x32x64xf32>,
    %c7 = arith.constant 7 : index
    %c0_154 = arith.constant 0 : index
    %c0_155 = arith.constant 0 : index
    %313 = vector.load %arg2[%c7, %c0_154, %c0_155] : memref<8x16x64xf32, #tpu.memory_space<vmem>>, vector<1x16x64xf32>
    %314 = vector.shape_cast %313 : vector<1x16x64xf32> to vector<16x64xf32>
    %c7_156 = arith.constant 7 : index
    %c0_157 = arith.constant 0 : index
    %c0_158 = arith.constant 0 : index
    %315 = vector.load %arg3[%c7_156, %c0_157, %c0_158] : memref<8x16x64xf32, #tpu.memory_space<vmem>>, vector<1x16x64xf32>
    %316 = vector.shape_cast %315 : vector<1x16x64xf32> to vector<16x64xf32>
    %cst_159 = arith.constant 1.200000e-05 : f32
    %317 = vector.broadcast %cst_159 : f32 to vector<16x64xf32>
    %318 = arith.addf %316, %317 : vector<16x64xf32>
    %cst_160 = arith.constant 1.000000e+00 : f32
    %319 = vector.broadcast %cst_160 : f32 to vector<16x64xf32>
    %320 = arith.divf %319, %318 : vector<16x64xf32>
    %c7_161 = arith.constant 7 : index
    %c0_162 = arith.constant 0 : index
    %c0_163 = arith.constant 0 : index
    %321 = vector.load %arg4[%c7_161, %c0_162, %c0_163] : memref<8x32x16xf32, #tpu.memory_space<vmem>>, vector<1x32x16xf32>
    %322 = vector.shape_cast %321 : vector<1x32x16xf32> to vector<32x16xf32>
    %323 = vector.broadcast %0 : f32 to vector<16x64xf32>
    %324 = arith.mulf %323, %314 : vector<16x64xf32>
    %cst_164 = arith.constant dense<0xFF800000> : vector<64xf32>
    %325 = vector.multi_reduction <maximumf>, %324, %cst_164 [0] : vector<16x64xf32> to vector<64xf32>
    %326 = vector.shape_cast %325 : vector<64xf32> to vector<1x64xf32>
    %327 = vector.broadcast %326 : vector<1x64xf32> to vector<16x64xf32>
    %328 = arith.subf %324, %327 : vector<16x64xf32>
    %329 = math.exp %328 : vector<16x64xf32>
    %cst_165 = arith.constant dense<0.000000e+00> : vector<64xf32>
    %330 = vector.multi_reduction <add>, %329, %cst_165 [0] : vector<16x64xf32> to vector<64xf32>
    %331 = vector.shape_cast %330 : vector<64xf32> to vector<1x64xf32>
    %332 = tpu.reciprocal %331 : vector<1x64xf32> -> vector<1x64xf32>
    %333 = vector.broadcast %332 : vector<1x64xf32> to vector<16x64xf32>
    %334 = arith.mulf %329, %333 : vector<16x64xf32>
    %335 = vector.broadcast %1 : f32 to vector<16x64xf32>
    %336 = arith.mulf %335, %320 : vector<16x64xf32>
    %cst_166 = arith.constant dense<0xFF800000> : vector<64xf32>
    %337 = vector.multi_reduction <maximumf>, %336, %cst_166 [0] : vector<16x64xf32> to vector<64xf32>
    %338 = vector.shape_cast %337 : vector<64xf32> to vector<1x64xf32>
    %339 = vector.broadcast %338 : vector<1x64xf32> to vector<16x64xf32>
    %340 = arith.subf %336, %339 : vector<16x64xf32>
    %341 = math.exp %340 : vector<16x64xf32>
    %cst_167 = arith.constant dense<0.000000e+00> : vector<64xf32>
    %342 = vector.multi_reduction <add>, %341, %cst_167 [0] : vector<16x64xf32> to vector<64xf32>
    %343 = vector.shape_cast %342 : vector<64xf32> to vector<1x64xf32>
    %344 = tpu.reciprocal %343 : vector<1x64xf32> -> vector<1x64xf32>
    %345 = vector.broadcast %344 : vector<1x64xf32> to vector<16x64xf32>
    %346 = arith.mulf %341, %345 : vector<16x64xf32>
    %cst_168 = arith.constant dense<0.000000e+00> : vector<32x64xf32>
    %347 = tpu.matmul %322, %334, %cst_168 {dimension_numbers = #tpu.dot_dimension_numbers<[1], [0], [0], [1], [0, 0, 1, 1], [], []>} : vector<32x16xf32>, vector<16x64xf32>, vector<32x64xf32> -> vector<32x64xf32>
    %cst_169 = arith.constant dense<0.000000e+00> : vector<32x64xf32>
    %348 = tpu.matmul %322, %346, %cst_169 {dimension_numbers = #tpu.dot_dimension_numbers<[1], [0], [0], [1], [0, 0, 1, 1], [], []>} : vector<32x16xf32>, vector<16x64xf32>, vector<32x64xf32> -> vector<32x64xf32>
    %cst_170 = arith.constant dense<0.000000e+00> : vector<32x64xf32>
    %349 = tpu.matmul %2, %347, %cst_170 {dimension_numbers = #tpu.dot_dimension_numbers<[1], [0], [0], [1], [0, 0, 1, 1], [], []>} : vector<32x32xf32>, vector<32x64xf32>, vector<32x64xf32> -> vector<32x64xf32>
    %cst_171 = arith.constant dense<0.000000e+00> : vector<32x64xf32>
    %350 = tpu.matmul %3, %348, %cst_171 {dimension_numbers = #tpu.dot_dimension_numbers<[1], [0], [0], [1], [0, 0, 1, 1], [], []>} : vector<32x32xf32>, vector<32x64xf32>, vector<32x64xf32> -> vector<32x64xf32>
    %351 = arith.addf %349, %350 : vector<32x64xf32>
    %352 = vector.broadcast %4 : vector<32x1xf32> to vector<32x64xf32>
    %353 = arith.addf %351, %352 : vector<32x64xf32>
    %c7_172 = arith.constant 7 : index
    %c0_173 = arith.constant 0 : index
    %c0_174 = arith.constant 0 : index
    %354 = vector.load %arg8[%c7_172, %c0_173, %c0_174] : memref<8x32x64xf32, #tpu.memory_space<vmem>>, vector<1x32x64xf32>
    %355 = vector.shape_cast %354 : vector<1x32x64xf32> to vector<32x64xf32>
    %356 = vector.shape_cast %353 : vector<32x64xf32> to vector<1x32x64xf32>
    tpu.vector_store %arg8[%c7_172, %c0_173, %c0_174], %356 {strides = array<i32>} : memref<8x32x64xf32, #tpu.memory_space<vmem>>, vector<1x32x64xf32>,
    return
  }
  func.func @transform_0(%arg0: i32) -> i32 {
    %c0_i32 = arith.constant 0 : i32
    %c0_i32_0 = arith.constant 0 : i32
    return %c0_i32 : i32
  }
  func.func @transform_1(%arg0: i32) -> (i32, i32, i32) {
    %c0_i32 = arith.constant 0 : i32
    %c0_i32_0 = arith.constant 0 : i32
    %c0_i32_1 = arith.constant 0 : i32
    return %arg0, %c0_i32, %c0_i32_0 : i32, i32, i32
  }
  func.func @transform_2(%arg0: i32) -> (i32, i32, i32) {
    %c0_i32 = arith.constant 0 : i32
    %c0_i32_0 = arith.constant 0 : i32
    %c0_i32_1 = arith.constant 0 : i32
    return %arg0, %c0_i32, %c0_i32_0 : i32, i32, i32
  }
  func.func @transform_3(%arg0: i32) -> (i32, i32, i32) {
    %c0_i32 = arith.constant 0 : i32
    %c0_i32_0 = arith.constant 0 : i32
    %c0_i32_1 = arith.constant 0 : i32
    return %arg0, %c0_i32, %c0_i32_0 : i32, i32, i32
  }
  func.func @transform_4(%arg0: i32) -> (i32, i32) {
    %c0_i32 = arith.constant 0 : i32
    %c0_i32_0 = arith.constant 0 : i32
    %c0_i32_1 = arith.constant 0 : i32
    return %c0_i32, %c0_i32_0 : i32, i32
  }
  func.func @transform_5(%arg0: i32) -> (i32, i32) {
    %c0_i32 = arith.constant 0 : i32
    %c0_i32_0 = arith.constant 0 : i32
    %c0_i32_1 = arith.constant 0 : i32
    return %c0_i32, %c0_i32_0 : i32, i32
  }
  func.func @transform_6(%arg0: i32) -> (i32, i32) {
    %c0_i32 = arith.constant 0 : i32
    %c0_i32_0 = arith.constant 0 : i32
    %c0_i32_1 = arith.constant 0 : i32
    return %c0_i32, %c0_i32_0 : i32, i32
  }
  func.func @transform_7(%arg0: i32) -> (i32, i32, i32) {
    %c0_i32 = arith.constant 0 : i32
    %c0_i32_0 = arith.constant 0 : i32
    %c0_i32_1 = arith.constant 0 : i32
    return %arg0, %c0_i32, %c0_i32_0 : i32, i32, i32
  }
}

</mosaic_0001>

<bundles_post_ra>
// kernel: tpu_custom_call.1
= control target key start
LH: loop header
LB: loop body
LE: loop exit
PB: predicated region body
PF: predicated region fallthrough
CT: control target
= control target key end

     0   :  { %12 = vsyncpa [#allocation4], 0  ;;  %s4158_s0 = inlined_call_operand.vmem [shape: f32[2], index: 0, kind: input, shape index: {}]   ;;  %s4159_s1 = inlined_call_operand.vmem [shape: f32[8,16,64], index: 1, kind: input, shape index: {}]   ;;  %s4160_s2 = inlined_call_operand.vmem [shape: f32[8,16,64], index: 2, kind: input, shape index: {}]   ;;  %s4161_s3 = inlined_call_operand.vmem [shape: f32[8,32,16], index: 3, kind: input, shape index: {}]   ;;  %s4162_s4 = inlined_call_operand.vmem [shape: f32[32,32], index: 4, kind: input, shape index: {}]   ;;  %s4163_s5 = inlined_call_operand.vmem [shape: f32[32,32], index: 5, kind: input, shape index: {}]   ;;  %s4164_s6 = inlined_call_operand.vmem [shape: f32[32,1], index: 6, kind: input, shape index: {}]   ;;  %s4165_s7 = inlined_call_operand.hbm [shape: f32[8,32,64], index: 7, kind: output, shape index: {}]  }
   0x1   :  { %13 = vsyncpa [#allocation3], 0  ;;  %s19_s26 = sshll.u32 %s4158_s0, 4  ;;  %s2590_s27 = smov [#allocation2]   ;;  %s20_s26 = int_to_ptr.vmem [resolvable:$true] %s19_s26 }
   0x2   :  { %22 = dma.vmem_to_smem %s20_s26, 16, %s2590_s27, [#allocation4]  }
   0x3   :  { %2586 = dma.done.wait [#allocation4], 16  }
   0x4   :  { %2587 = vsyncadd [#allocation4], 4294967280 }
   0x5   :  { %39 = sfence }
   0x6   :  { %s40_s28 = sld [smem:[#allocation2]]  ;;  %v56_v0 = vld [vmem:[%s4160_s2] sm:$0xff]  ;;  %v57_v1 = vld [vmem:[%s4160_s2 + $0x8] sm:$0xff]  ;;  %v2249_v4 = vld [vmem:[%s4160_s2 + $0x10] sm:$0xff]  ;;  %vm97_vm0 = vcmask 523264   ;;  %s2217_s9 = sshll.u32 %s4165_s7, 4  ;;  %s2218_s9 = int_to_ptr.hbm [resolvable:$true] %s2217_s9 }
   0x7   :  { %v58_v2 = vadd.f32 1.2e-05, %v56_v0  ;;  %v59_v3 = vadd.f32 1.2e-05, %v57_v1  ;;  %v2250_v5 = vld [vmem:[%s4160_s2 + $0x18] sm:$0xff]  ;;  %v54_v6 = vld [vmem:[%s4159_s1] sm:$0xff] }
   0x8   :  { %v55_v7 = vld [vmem:[%s4159_s1 + $0x8] sm:$0xff]  ;;  %v2656_v8 = vadd.f32 1.2e-05, %v2249_v4  ;;  %v2658_v9 = vadd.f32 1.2e-05, %v2250_v5  ;;  %s2669_s17 = sld [smem:[#allocation2 + $0x1]] }
   0x9   :  { %2422 = vrcp.f32 %v58_v2  ;;  %v69_v13 = vand.u32 2147483647, %v58_v2  ;;  %vm65_vm1 = vweird.f32 %v58_v2  ;;  %v71_v17 = vand.u32 2147483648, %v58_v2  ;;  %v2247_v18 = vld [vmem:[%s4159_s1 + $0x10] sm:$0xff]  ;;  %v2248_v19 = vld [vmem:[%s4159_s1 + $0x18] sm:$0xff]  ;;  %s2593_s10 = smov 128  }
   0xa   :  { %2424 = vrcp.f32 %v59_v3  ;;  %vm80_vm2 = vweird.f32 %v59_v3  ;;  %v84_v25 = vand.u32 2147483647, %v59_v3  ;;  %v86_v26 = vand.u32 2147483648, %v59_v3  ;;  %s2594_s0 = smov 8  }
   0xb   :  { %2426 = vrcp.f32 %v2656_v8  ;;  %vm2690_vm4 = vcmp.eq.f32.partialorder %v69_v13, 8.507059e+37  ;;  %v72_v41 = vor.u32 1.1754944e-38, %v71_v17  ;;  %vm376_vm9 = vweird.f32 %v2656_v8 }
   0xc   :  { %v2660_v10 = vstv %s40_s28  ;;  %2428 = vrcp.f32 %v2658_v9  ;;  %v87_v43 = vor.u32 1.1754944e-38, %v86_v26  ;;  %vm85_vm8 = vcmp.eq.f32.partialorder %v84_v25, 8.507059e+37 }
   0xd   :  { %v2663_v11 = vmul.f32 %v2660_v10, %v54_v6  ;;  %v2666_v12 = vmul.f32 %v2660_v10, %v55_v7  ;;  %v2683_v23 = vmul.f32 %v2247_v18, %v2660_v10  ;;  %v2686_v27 = vmul.f32 %v2248_v19, %v2660_v10 }
   0xe   :  { %v2712_v51 = vstv %s2669_s17  ;;  %vm391_vm13 = vweird.f32 %v2658_v9 }
   0xf   :  { %v2423_v14 = vpop.eup %2422  ;;  %v98_v15 = vsel %vm97_vm0, %v2663_v11, -inf  ;;  %v99_v16 = vsel %vm97_vm0, %v2666_v12, -inf  ;;  %v408_v30 = vsel %vm97_vm0, %v2683_v23, -inf  ;;  %v409_v34 = vsel %vm97_vm0, %v2686_v27, -inf }
  0x10   :  { %v2425_v20 = vpop.eup %2424  ;;  %v100_v21 = vmax.f32 %v98_v15, %v99_v16  ;;  %v61_v22 = vmul.f32 %v2423_v14, %v58_v2  ;;  %vm66_vm3 = vweird.f32 %v2423_v14  ;;  %v410_v38 = vmax.f32 %v408_v30, %v409_v34 }
  0x11   :  { %v76_v24 = vmul.f32 %v2425_v20, %v59_v3  ;;  %v2427_v31 = vpop.eup %2426  ;;  %vm81_vm5 = vweird.f32 %v2425_v20  ;;  %vm2700_vm6 = vmor %vm65_vm1, %vm66_vm3  ;;  %v380_v2 = vand.u32 2147483647, %v2656_v8  ;;  %v382_v3 = vand.u32 2147483648, %v2656_v8 }
  0x12   :  { %v101_v28 = vrot.slane %v100_v21, 4  ;;  %v62_v29 = vsub.f32 1.0, %v61_v22  ;;  %v2696_v35 = vpop.eup %2428  ;;  %v372_v39 = vmul.f32 %v2427_v31, %v2656_v8  ;;  %vm2707_vm7 = vmor %vm80_vm2, %vm81_vm5  ;;  %v411_v48 = vrot.slane %v410_v38, 4 }
  0x13   :  { %v77_v33 = vsub.f32 1.0, %v76_v24  ;;  %v387_v44 = vmul.f32 %v2696_v35, %v2658_v9  ;;  %vm377_vm10 = vweird.f32 %v2427_v31  ;;  %vm381_vm12 = vcmp.eq.f32.partialorder %v380_v2, 8.507059e+37  ;;  %v2272_v2 = vld [vmem:[%s4159_s1 + $0x28] sm:$0xff] }
  0x14   :  { %v102_v36 = vmax.f32 %v100_v21, %v101_v28  ;;  %v63_v37 = vmul.f32 %v2423_v14, %v62_v29  ;;  %v373_v49 = vsub.f32 1.0, %v372_v39  ;;  %v412_v55 = vmax.f32 %v410_v38, %v411_v48  ;;  %vm2724_vm11 = vmor %vm376_vm9, %vm377_vm10 }
  0x15   :  { %v78_v42 = vmul.f32 %v2425_v20, %v77_v33  ;;  %v388_v52 = vsub.f32 1.0, %v387_v44  ;;  %v383_v15 = vor.u32 1.1754944e-38, %v382_v3  ;;  %vm392_vm14 = vweird.f32 %v2696_v35  ;;  %v2273_v44 = vld [vmem:[%s4160_s2 + $0x20] sm:$0xff] }
  0x16   :  { %v103_v45 = vrot.slane %v102_v36, 2  ;;  %v64_v46 = vadd.f32 %v2423_v14, %v63_v37  ;;  %v374_v56 = vmul.f32 %v2427_v31, %v373_v49  ;;  %v413_v62 = vrot.slane %v412_v55, 2  ;;  %vm2745_vm15 = vmor %vm391_vm13, %vm392_vm14 }
  0x17   :  { %v79_v50 = vadd.f32 %v2425_v20, %v78_v42  ;;  %v389_v7 = vmul.f32 %v2696_v35, %v388_v52  ;;  %v397_v28 = vand.u32 2147483648, %v2658_v9  ;;  %v2780_v48 = vadd.f32 1.2e-05, %v2273_v44 }
  0x18   :  { %v104_v53 = vmax.f32 %v102_v36, %v103_v45  ;;  %v68_v54 = vsel %vm2700_vm6, %v2423_v14, %v64_v46  ;;  %v375_v1 = vadd.f32 %v2427_v31, %v374_v56  ;;  %v414_v6 = vmax.f32 %v412_v55, %v413_v62  ;;  %v2274_v45 = vld [vmem:[%s4160_s2 + $0x28] sm:$0xff] }
  0x19   :  { %v73_v57 = vsel %vm2690_vm4, %v72_v41, %v68_v54  ;;  %v83_v58 = vsel %vm2707_vm7, %v2425_v20, %v79_v50  ;;  %v390_v20 = vadd.f32 %v2696_v35, %v389_v7  ;;  %v398_v33 = vor.u32 1.1754944e-38, %v397_v28 }
  0x1a   :  { %v105_v59 = vrot.slane %v104_v53, 1  ;;  %v88_v60 = vsel %vm85_vm8, %v87_v43, %v83_v58  ;;  %v2722_v61 = vmul.f32 %v2712_v51, %v73_v57  ;;  %v379_v14 = vsel %vm2724_vm11, %v2427_v31, %v375_v1 }
  0x1b   :  { %v2729_v0 = vmul.f32 %v2712_v51, %v88_v60  ;;  %v415_v18 = vrot.slane %v414_v6, 1  ;;  %v384_v19 = vsel %vm381_vm12, %v383_v15, %v379_v14  ;;  %v2782_v49 = vadd.f32 1.2e-05, %v2274_v45 }
  0x1c   :  { %v106_v4 = vmax.f32 %v104_v53, %v105_v59  ;;  %v141_v5 = vsel %vm97_vm0, %v2722_v61, -inf  ;;  %v2755_v29 = vmul.f32 %v384_v19, %v2712_v51  ;;  %vm640_vm3 = vweird.f32 %v2780_v48 }
  0x1d   :  { %v142_v13 = vsel %vm97_vm0, %v2729_v0, -inf  ;;  %v416_v25 = vmax.f32 %v414_v6, %v415_v18  ;;  %vm655_vm8 = vweird.f32 %v2782_v49  ;;  %vm181_vm12 = vcmask 130048  }
  0x1e   :  { %v107_v16 = vsub.f32 %v2663_v11, %v106_v4  ;;  %v108_v17 = vsub.f32 %v2666_v12, %v106_v4  ;;  %v143_v8 = vmax.f32 %v141_v5, %v142_v13  ;;  %v394_v11 = vsel %vm2745_vm15, %v2696_v35, %v390_v20 }
  0x1f   :  { %v395_v12 = vand.u32 2147483647, %v2658_v9  ;;  %v417_v31 = vsub.f32 %v2683_v23, %v416_v25  ;;  %v418_v32 = vsub.f32 %v2686_v27, %v416_v25  ;;  %v450_v39 = vsel %vm97_vm0, %v2755_v29, -inf }
  0x20   :  { %v109_v21 = vmul.f32 1.442695, %v107_v16  ;;  %v111_v22 = vmul.f32 1.442695, %v108_v17  ;;  %v144_v24 = vrot.slane %v143_v8, 4  ;;  %v2806_v5 = vmul.f32 %v2272_v2, %v2660_v10 }
  0x21   :  { %vm396_vm1 = vcmp.eq.f32.partialorder %v395_v12, 8.507059e+37  ;;  %v419_v36 = vmul.f32 1.442695, %v417_v31  ;;  %v421_v37 = vmul.f32 1.442695, %v418_v32 }
  0x22   :  { %2430 = vpow2.f32 %v109_v21  ;;  %v145_v30 = vmax.f32 %v143_v8, %v144_v24  ;;  %v399_v35 = vsel %vm396_vm1, %v398_v33, %v394_v11  ;;  %v673_v16 = vsel %vm97_vm0, %v2806_v5, -inf }
  0x23   :  { %2432 = vpow2.f32 %v111_v22  ;;  %v2760_v9 = vmul.f32 %v399_v35, %v2712_v51 }
  0x24   :  { %v146_v34 = vrot.slane %v145_v30, 2  ;;  %2434 = vpow2.f32 %v419_v36 }
  0x25   :  { %2436 = vpow2.f32 %v421_v37  ;;  %v451_v27 = vsel %vm97_vm0, %v2760_v9, -inf }
  0x26   :  { %v147_v38 = vmax.f32 %v145_v30, %v146_v34  ;;  %v452_v43 = vmax.f32 %v450_v39, %v451_v27  ;;  %2438 = vrcp.f32 %v2780_v48 }
  0x27   :  { %2440 = vrcp.f32 %v2782_v49 }
  0x28   :  { %v2764_v40 = vpop.eup %2430  ;;  %v148_v23 = vrot.slane %v147_v38, 1  ;;  %v453_v52 = vrot.slane %v452_v43, 4 }
  0x29   :  { %v2768_v41 = vpop.eup %2432  ;;  %v113_v42 = vsel %vm97_vm0, %v2764_v40, 0.0 }
  0x2a   :  { %v114_v46 = vsel %vm97_vm0, %v2768_v41, 0.0  ;;  %v149_v47 = vmax.f32 %v147_v38, %v148_v23  ;;  %v2784_v53 = vpop.eup %2434  ;;  %v454_v59 = vmax.f32 %v452_v43, %v453_v52 }
  0x2b   :  { %v115_v50 = vadd.f32 %v114_v46, %v113_v42  ;;  %v2789_v56 = vpop.eup %2436  ;;  %v423_v58 = vsel %vm97_vm0, %v2784_v53, 0.0 }
  0x2c   :  { %v150_v54 = vsub.f32 %v2722_v61, %v149_v47  ;;  %v151_v55 = vsub.f32 %v2729_v0, %v149_v47  ;;  %v424_v1 = vsel %vm97_vm0, %v2789_v56, 0.0  ;;  %v455_v61 = vrot.slane %v454_v59, 2  ;;  %v2271_v0 = vld [vmem:[%s4159_s1 + $0x20] sm:$0xff]  ;;  %v2808_v13 = vpop.eup %2438 }
  0x2d   :  { %v116_v57 = vrot.slane %v115_v50, 4  ;;  %v425_v3 = vadd.f32 %v424_v1, %v423_v58  ;;  %v2803_v4 = vmul.f32 %v2271_v0, %v2660_v10  ;;  %v2814_v17 = vpop.eup %2440  ;;  %v636_v20 = vmul.f32 %v2808_v13, %v2780_v48 }
  0x2e   :  { %v152_v60 = vmul.f32 1.442695, %v150_v54  ;;  %v154_v62 = vmul.f32 1.442695, %v151_v55  ;;  %v456_v7 = vmax.f32 %v454_v59, %v455_v61  ;;  %v651_v22 = vmul.f32 %v2814_v17, %v2782_v49 }
  0x2f   :  { %v117_v63 = vadd.f32 %v116_v57, %v115_v50  ;;  %v426_v14 = vrot.slane %v425_v3, 4  ;;  %v672_v15 = vsel %vm97_vm0, %v2803_v4, -inf  ;;  %v637_v11 = vsub.f32 1.0, %v636_v20 }
  0x30   :  { %2442 = vpow2.f32 %v152_v60  ;;  %v457_v18 = vrot.slane %v456_v7, 1  ;;  %v674_v19 = vmax.f32 %v672_v15, %v673_v16  ;;  %v652_v39 = vsub.f32 1.0, %v651_v22 }
  0x31   :  { %v118_v6 = vrot.slane %v117_v63, 2  ;;  %2444 = vpow2.f32 %v154_v62  ;;  %v427_v21 = vadd.f32 %v426_v14, %v425_v3  ;;  %v638_v38 = vmul.f32 %v2808_v13, %v637_v11 }
  0x32   :  { %v458_v25 = vmax.f32 %v456_v7, %v457_v18  ;;  %v675_v26 = vrot.slane %v674_v19, 4  ;;  %vm641_vm4 = vweird.f32 %v2808_v13  ;;  %v644_v50 = vand.u32 2147483647, %v2780_v48 }
  0x33   :  { %v119_v8 = vadd.f32 %v118_v6, %v117_v63  ;;  %v428_v28 = vrot.slane %v427_v21, 2  ;;  %vm2838_vm5 = vmor %vm640_vm3, %vm641_vm4  ;;  %v646_v55 = vand.u32 2147483648, %v2780_v48  ;;  %v653_v57 = vmul.f32 %v2814_v17, %v652_v39 }
  0x34   :  { %v459_v33 = vsub.f32 %v2755_v29, %v458_v25  ;;  %v460_v34 = vsub.f32 %v2760_v9, %v458_v25  ;;  %v676_v35 = vmax.f32 %v674_v19, %v675_v26  ;;  %v639_v29 = vadd.f32 %v2808_v13, %v638_v38 }
  0x35   :  { %v120_v24 = vrot.slane %v119_v8, 1  ;;  %v429_v37 = vadd.f32 %v428_v28, %v427_v21  ;;  %vm2851_vm7 = vcmp.eq.f32.partialorder %v644_v50, 8.507059e+37  ;;  %v647_v2 = vor.u32 1.1754944e-38, %v646_v55 }
  0x36   :  { %v2820_v12 = vpop.eup %2442  ;;  %v461_v42 = vmul.f32 1.442695, %v459_v33  ;;  %v463_v43 = vmul.f32 1.442695, %v460_v34  ;;  %v677_v45 = vrot.slane %v676_v35, 2  ;;  %v643_v63 = vsel %vm2838_vm5, %v2808_v13, %v639_v29 }
  0x37   :  { %v2822_v30 = vpop.eup %2444  ;;  %v121_v31 = vadd.f32 %v120_v24, %v119_v8  ;;  %v156_v32 = vsel %vm97_vm0, %v2820_v12, 0.0  ;;  %v430_v27 = vrot.slane %v429_v37, 1  ;;  %vm656_vm10 = vweird.f32 %v2814_v17 }
  0x38   :  { %v157_v36 = vsel %vm97_vm0, %v2822_v30, 0.0  ;;  %v678_v47 = vmax.f32 %v676_v35, %v677_v45  ;;  %v654_v14 = vadd.f32 %v2814_v17, %v653_v57  ;;  %v659_v13 = vand.u32 2147483647, %v2782_v49  ;;  %vm2869_vm11 = vmor %vm655_vm8, %vm656_vm10  ;;  %v2297_v45 = vld [vmem:[%s4160_s2 + $0x30] sm:$0xff] }
  0x39   :  { %2446 = vrcp.f32 %v121_v31  ;;  %v158_v23 = vadd.f32 %v157_v36, %v156_v32  ;;  %vm127_vm2 = vweird.f32 %v121_v31  ;;  %v131_v44 = vand.u32 2147483647, %v121_v31 }
  0x3a   :  { %v2832_v9 = vadd.f32 %v430_v27, %v429_v37  ;;  %2448 = vpow2.f32 %v461_v42  ;;  %v133_v60 = vand.u32 2147483648, %v121_v31  ;;  %v679_v62 = vrot.slane %v678_v47, 1 }
  0x3b   :  { %v159_v46 = vrot.slane %v158_v23, 4  ;;  %2450 = vpow2.f32 %v463_v43  ;;  %vm2844_vm6 = vcmp.eq.f32.partialorder %v131_v44, 8.507059e+37  ;;  %v661_v26 = vand.u32 2147483648, %v2782_v49 }
  0x3c   :  { %2452 = vrcp.f32 %v2832_v9  ;;  %v680_v48 = vmax.f32 %v678_v47, %v679_v62  ;;  %v134_v16 = vor.u32 1.1754944e-38, %v133_v60  ;;  %v648_v32 = vsel %vm2851_vm7, %v647_v2, %v643_v63 }
  0x3d   :  { %v160_v52 = vadd.f32 %v159_v46, %v158_v23  ;;  %v658_v49 = vsel %vm2869_vm11, %v2814_v17, %v654_v14  ;;  %vm2890_vm14 = vcmp.eq.f32.partialorder %v659_v13, 8.507059e+37  ;;  %v443_v37 = vand.u32 2147483648, %v2832_v9  ;;  %v2295_v14 = vld [vmem:[%s4159_s1 + $0x30] sm:$0xff]  ;;  %v2296_v13 = vld [vmem:[%s4159_s1 + $0x38] sm:$0xff] }
  0x3e   :  { %v681_v18 = vsub.f32 %v2803_v4, %v680_v48  ;;  %v682_v19 = vsub.f32 %v2806_v5, %v680_v48  ;;  %v662_v23 = vor.u32 1.1754944e-38, %v661_v26  ;;  %vm437_vm15 = vweird.f32 %v2832_v9 }
  0x3f   :  { %v2447_v58 = vpop.eup %2446  ;;  %v161_v61 = vrot.slane %v160_v52, 2  ;;  %v2902_v42 = vmul.f32 %v648_v32, %v2712_v51  ;;  %v441_v50 = vand.u32 2147483647, %v2832_v9  ;;  %v2934_v60 = vadd.f32 1.2e-05, %v2297_v45 }
  0x40   :  { %v123_v1 = vmul.f32 %v2447_v58, %v121_v31  ;;  %vm128_vm9 = vweird.f32 %v2447_v58  ;;  %v2857_v3 = vpop.eup %2448  ;;  %v683_v28 = vmul.f32 1.442695, %v681_v18  ;;  %v685_v35 = vmul.f32 1.442695, %v682_v19 }
  0x41   :  { %v162_v7 = vadd.f32 %v161_v61, %v160_v52  ;;  %v2861_v15 = vpop.eup %2450  ;;  %v465_v8 = vsel %vm97_vm0, %v2857_v3, 0.0  ;;  %vm2878_vm13 = vmor %vm127_vm2, %vm128_vm9  ;;  %v444_v52 = vor.u32 1.1754944e-38, %v443_v37  ;;  %v663_v57 = vsel %vm2890_vm14, %v662_v23, %v658_v49 }
  0x42   :  { %v124_v6 = vsub.f32 1.0, %v123_v1  ;;  %v2453_v21 = vpop.eup %2452  ;;  %v466_v25 = vsel %vm97_vm0, %v2861_v15, 0.0  ;;  %2454 = vpow2.f32 %v683_v28  ;;  %vm442_vm4 = vcmp.eq.f32.partialorder %v441_v50, 8.507059e+37 }
  0x43   :  { %v163_v24 = vrot.slane %v162_v7, 1  ;;  %v433_v5 = vmul.f32 %v2453_v21, %v2832_v9  ;;  %v467_v11 = vadd.f32 %v466_v25, %v465_v8  ;;  %vm438_vm2 = vweird.f32 %v2453_v21 }
  0x44   :  { %v125_v22 = vmul.f32 %v2447_v58, %v124_v6  ;;  %vm2911_vm3 = vmor %vm437_vm15, %vm438_vm2  ;;  %v2932_v59 = vmul.f32 %v663_v57, %v2712_v51  ;;  %v714_v61 = vsel %vm97_vm0, %v2902_v42, -inf  ;;  %v2956_v18 = vmul.f32 %v2295_v14, %v2660_v10 }
  0x45   :  { %v2885_v34 = vadd.f32 %v163_v24, %v162_v7  ;;  %v434_v36 = vsub.f32 1.0, %v433_v5  ;;  %v468_v39 = vrot.slane %v467_v11, 4  ;;  %vm904_vm9 = vweird.f32 %v2934_v60 }
  0x46   :  { %v126_v33 = vadd.f32 %v2447_v58, %v125_v22  ;;  %v715_v8 = vsel %vm97_vm0, %v2932_v59, -inf  ;;  %v936_v22 = vsel %vm97_vm0, %v2956_v18, -inf }
  0x47   :  { %2456 = vrcp.f32 %v2885_v34  ;;  %v435_v17 = vmul.f32 %v2453_v21, %v434_v36  ;;  %vm170_vm1 = vweird.f32 %v2885_v34  ;;  %v174_v29 = vand.u32 2147483647, %v2885_v34 }
  0x48   :  { %v130_v38 = vsel %vm2878_vm13, %v2447_v58, %v126_v33  ;;  %v176_v54 = vand.u32 2147483648, %v2885_v34  ;;  %v469_v55 = vadd.f32 %v468_v39, %v467_v11  ;;  %2458 = vpow2.f32 %v685_v35  ;;  %v2927_v58 = vpop.eup %2454  ;;  %v2974_v11 = vld [vmem:[%s4161_s3 + $0x8] sm:$0xff] }
  0x49   :  { %v135_v27 = vsel %vm2844_vm6, %v134_v16, %v130_v38  ;;  %v436_v46 = vadd.f32 %v2453_v21, %v435_v17  ;;  %v687_v7 = vsel %vm97_vm0, %v2927_v58, 0.0  ;;  %v716_v19 = vmax.f32 %v714_v61, %v715_v8 }
  0x4a   :  { %v137_v43 = vmul.f32 %v2768_v41, %v135_v27  ;;  %v136_v44 = vmul.f32 %v2764_v40, %v135_v27  ;;  %v2298_v40 = vld [vmem:[%s4160_s2 + $0x38] sm:$0xff]  ;;  %v2922_v41 = vld [vmem:[%s4161_s3] sm:$0xff]  ;;  %v470_v1 = vrot.slane %v469_v55, 2  ;;  %2460 = vrcp.f32 %v2934_v60 }
  0x4b   :  { %v440_v9 = vsel %vm2911_vm3, %v2453_v21, %v436_v46  ;;  %v2938_v0 = vadd.f32 1.2e-05, %v2298_v40  ;;  %v717_v4 = vrot.slane %v716_v19, 4  ;;  %v177_v32 = vor.u32 1.1754944e-38, %v176_v54 }
  0x4c   :  { %208 = vmatpush.msra.mxu0 %v137_v43  ;;  %v445_v63 = vsel %vm442_vm4, %v444_v52, %v440_v9  ;;  %v471_v16 = vadd.f32 %v470_v1, %v469_v55  ;;  %vm175_vm7 = vcmp.eq.f32.partialorder %v174_v29, 8.507059e+37 }
  0x4d   :  { %v2457_v62 = vpop.eup %2456  ;;  %v447_v2 = vmul.f32 %v2789_v56, %v445_v63  ;;  %v446_v6 = vmul.f32 %v2784_v53, %v445_v63  ;;  %v2959_v53 = vmul.f32 %v2296_v13, %v2660_v10  ;;  %2462 = vrcp.f32 %v2938_v0 }
  0x4e   :  { %209 = vmatpush.msra.mxu0 %v136_v44  ;;  %v166_v48 = vmul.f32 %v2457_v62, %v2885_v34  ;;  %vm171_vm5 = vweird.f32 %v2457_v62  ;;  %v2962_v20 = vpop.eup %2458  ;;  %v472_v21 = vrot.slane %v471_v16, 1  ;;  %v718_v36 = vmax.f32 %v716_v19, %v717_v4 }
  0x4f   :  { %2231 = vmatmul.msk.f32.vlgmr.msra.gmra.mxu0 %vm181_vm12, %v2922_v41  ;;  %v937_v24 = vsel %vm97_vm0, %v2959_v53, -inf  ;;  %v688_v26 = vsel %vm97_vm0, %v2962_v20, 0.0  ;;  %vm2979_vm6 = vmor %vm170_vm1, %vm171_vm5  ;;  %vm919_vm13 = vweird.f32 %v2938_v0 }
  0x50   :  { %v167_v56 = vsub.f32 1.0, %v166_v48  ;;  %516 = vmatpush.msrb.mxu0 %v447_v2  ;;  %v938_v5 = vmax.f32 %v936_v22, %v937_v24  ;;  %v2983_v33 = vadd.f32 %v472_v21, %v471_v16  ;;  %v689_v49 = vadd.f32 %v688_v26, %v687_v7  ;;  %v2461_v39 = vpop.eup %2460 }
  0x51   :  { %v719_v27 = vrot.slane %v718_v36, 2  ;;  %v900_v29 = vmul.f32 %v2461_v39, %v2934_v60  ;;  %vm905_vm10 = vweird.f32 %v2461_v39 }
  0x52   :  { %v168_v25 = vmul.f32 %v2457_v62, %v167_v56  ;;  %517 = vmatpush.msrb.mxu0 %v446_v6  ;;  %v939_v37 = vrot.slane %v938_v5, 4  ;;  %2464 = vrcp.f32 %v2983_v33  ;;  %v483_v35 = vand.u32 2147483647, %v2983_v33  ;;  %vm3019_vm15 = vmor %vm904_vm9, %vm905_vm10 }
  0x53   :  { %v485_v38 = vand.u32 2147483648, %v2983_v33  ;;  %v690_v23 = vrot.slane %v689_v49, 4  ;;  %v2992_v43 = vpop.eup %2462  ;;  %vm479_vm8 = vweird.f32 %v2983_v33  ;;  %v720_v52 = vmax.f32 %v718_v36, %v719_v27 }
  0x54   :  { %v169_v31 = vadd.f32 %v2457_v62, %v168_v25  ;;  %v940_v17 = vmax.f32 %v938_v5, %v939_v37  ;;  %v901_v54 = vsub.f32 1.0, %v900_v29  ;;  %vm3001_vm11 = vcmp.eq.f32.partialorder %v483_v35, 8.507059e+37 }
  0x55   :  { %v2995_v45 = vor.u32 1.1754944e-38, %v485_v38  ;;  %v691_v50 = vadd.f32 %v690_v23, %v689_v49  ;;  %v721_v9 = vrot.slane %v720_v52, 1  ;;  %v915_v48 = vmul.f32 %v2992_v43, %v2938_v0 }
  0x56   :  { %v173_v34 = vsel %vm2979_vm6, %v2457_v62, %v169_v31  ;;  %v941_v40 = vrot.slane %v940_v17, 2  ;;  %v908_v62 = vand.u32 2147483647, %v2934_v60  ;;  %v902_v61 = vmul.f32 %v2461_v39, %v901_v54 }
  0x57   :  { %2232 = vmatmul.msk.f32.gmra.mxu0 %vm181_vm12, %v2974_v11  ;;  %v178_v44 = vsel %vm175_vm7, %v177_v32, %v173_v34  ;;  %v692_v57 = vrot.slane %v691_v50, 2  ;;  %v722_v7 = vmax.f32 %v720_v52, %v721_v9  ;;  %v916_v25 = vsub.f32 1.0, %v915_v48 }
  0x58   :  { %v180_v46 = vmul.f32 %v2822_v30, %v178_v44  ;;  %v179_v47 = vmul.f32 %v2820_v12, %v178_v44  ;;  %v910_v30 = vand.u32 2147483648, %v2934_v60  ;;  %v2465_v63 = vpop.eup %2464  ;;  %v3010_v12 = vld [vmem:[%s4161_s3 + $0x10] sm:$0xff]  ;;  %v942_v1 = vmax.f32 %v940_v17, %v941_v40 }
  0x59   :  { %v475_v2 = vmul.f32 %v2465_v63, %v2983_v33  ;;  %vm480_vm14 = vweird.f32 %v2465_v63  ;;  %v693_v6 = vadd.f32 %v692_v57, %v691_v50  ;;  %v903_v16 = vadd.f32 %v2461_v39, %v902_v61  ;;  %v2321_v50 = vld [vmem:[%s4160_s2 + $0x40] sm:$0xff] }
  0x5a   :  { %237 = vmatpush.msra.mxu1 %v180_v46  ;;  %v943_v13 = vrot.slane %v942_v1, 1  ;;  %vm3025_vm1 = vcmp.eq.f32.partialorder %v908_v62, 8.507059e+37  ;;  %v911_v56 = vor.u32 1.1754944e-38, %v910_v30  ;;  %v723_v60 = vsub.f32 %v2902_v42, %v722_v7  ;;  %vm3041_vm3 = vmor %vm479_vm8, %vm480_vm14 }
  0x5b   :  { %v476_v19 = vsub.f32 1.0, %v475_v2  ;;  %v694_v21 = vrot.slane %v693_v6, 1  ;;  %v724_v22 = vsub.f32 %v2932_v59, %v722_v7  ;;  %vm920_vm2 = vweird.f32 %v2992_v43 }
  0x5c   :  { %238 = vmatpush.msra.mxu1 %v179_v47  ;;  %v944_v24 = vmax.f32 %v942_v1, %v943_v13  ;;  %v725_v5 = vmul.f32 1.442695, %v723_v60  ;;  %v917_v31 = vmul.f32 %v2992_v43, %v916_v25  ;;  %vm3053_vm4 = vmor %vm919_vm13, %vm920_vm2  ;;  %v923_v37 = vand.u32 2147483647, %v2938_v0  ;;  %v2319_v60 = vld [vmem:[%s4159_s1 + $0x40] sm:$0xff] }
  0x5d   :  { %2235 = vmatmul.msk.f32.vlgmr.msra.gmra.mxu1 %vm181_vm12, %v2922_v41  ;;  %v907_v41 = vsel %vm3019_vm15, %v2461_v39, %v903_v16  ;;  %v477_v26 = vmul.f32 %v2465_v63, %v476_v19  ;;  %v3036_v4 = vadd.f32 %v694_v21, %v693_v6  ;;  %v727_v28 = vmul.f32 1.442695, %v724_v22  ;;  %v2320_v22 = vld [vmem:[%s4159_s1 + $0x48] sm:$0xff] }
  0x5e   :  { %v945_v42 = vsub.f32 %v2956_v18, %v944_v24  ;;  %v946_v59 = vsub.f32 %v2959_v53, %v944_v24  ;;  %v912_v49 = vsel %vm3025_vm1, %v911_v56, %v907_v41  ;;  %v925_v18 = vand.u32 2147483648, %v2938_v0  ;;  %v3062_v53 = vld [vmem:[%s4161_s3 + $0x18] sm:$0xff] }
  0x5f   :  { %2233 = vmatmul.msk.f32.gmra.mxu0 %vm181_vm12, %v3010_v12  ;;  %v478_v36 = vadd.f32 %v2465_v63, %v477_v26  ;;  %2466 = vrcp.f32 %v3036_v4  ;;  %v918_v39 = vadd.f32 %v2992_v43, %v917_v31  ;;  %vm924_vm5 = vcmp.eq.f32.partialorder %v923_v37, 8.507059e+37 }
  0x60   :  { %2468 = vpow2.f32 %v725_v5  ;;  %v947_v35 = vmul.f32 1.442695, %v945_v42  ;;  %v949_v38 = vmul.f32 1.442695, %v946_v59  ;;  %v926_v23 = vor.u32 1.1754944e-38, %v925_v18 }
  0x61   :  { %v482_v34 = vsel %vm3041_vm3, %v2465_v63, %v478_v36  ;;  %2470 = vpow2.f32 %v727_v28  ;;  %v922_v27 = vsel %vm3053_vm4, %v2992_v43, %v918_v39  ;;  %v3076_v17 = vmul.f32 %v912_v49, %v2712_v51  ;;  %v3114_v63 = vld [vmem:[%s4161_s3 + $0x20] sm:$0xff] }
  0x62   :  { %v487_v0 = vsel %vm3001_vm11, %v2995_v45, %v482_v34  ;;  %2472 = vpow2.f32 %v947_v35  ;;  %v707_v45 = vand.u32 2147483648, %v3036_v4  ;;  %vm701_vm6 = vweird.f32 %v3036_v4  ;;  %v3168_v35 = vld [vmem:[%s4161_s3 + $0x28] sm:$0xff] }
  0x63   :  { %v489_v44 = vmul.f32 %v2861_v15, %v487_v0  ;;  %v488_v29 = vmul.f32 %v2857_v3, %v487_v0  ;;  %2474 = vpow2.f32 %v949_v38  ;;  %v978_v43 = vsel %vm97_vm0, %v3076_v17, -inf  ;;  %v2322_v3 = vld [vmem:[%s4160_s2 + $0x48] sm:$0xff] }
  0x64   :  { %v705_v40 = vand.u32 2147483647, %v3036_v4  ;;  %v3099_v54 = vadd.f32 1.2e-05, %v2321_v50  ;;  %v3107_v62 = vadd.f32 1.2e-05, %v2322_v3  ;;  %v3148_v25 = vmul.f32 %v2319_v60, %v2660_v10 }
  0x65   :  { %2236 = vmatmul.msk.f32.gmra.mxu1 %vm181_vm12, %v2974_v11  ;;  %v927_v11 = vsel %vm924_vm5, %v926_v23, %v922_v27  ;;  %v2467_v46 = vpop.eup %2466  ;;  %v3151_v26 = vmul.f32 %v2320_v22, %v2660_v10 }
  0x66   :  { %545 = vmatpush.msrb.mxu1 %v489_v44  ;;  %v3084_v47 = vmul.f32 %v927_v11, %v2712_v51  ;;  %v3094_v15 = vpop.eup %2468  ;;  %v697_v52 = vmul.f32 %v2467_v46, %v3036_v4  ;;  %vm702_vm7 = vweird.f32 %v2467_v46  ;;  %2476 = vrcp.f32 %v3099_v54 }
  0x67   :  { %2234 = vmatmul.msk.f32.gmra.mxu0 %vm181_vm12, %v3062_v53  ;;  %v3101_v55 = vpop.eup %2470  ;;  %v729_v57 = vsel %vm97_vm0, %v3094_v15, 0.0  ;;  %2478 = vrcp.f32 %v3107_v62  ;;  %vm3133_vm8 = vmor %vm701_vm6, %vm702_vm7  ;;  %vm3137_vm9 = vcmp.eq.f32.partialorder %v705_v40, 8.507059e+37  ;;  %v1200_v59 = vsel %vm97_vm0, %v3148_v25, -inf }
  0x68   :  { %546 = vmatpush.msrb.mxu1 %v488_v29  ;;  %v979_v9 = vsel %vm97_vm0, %v3084_v47, -inf  ;;  %v3109_v30 = vpop.eup %2472  ;;  %v698_v1 = vsub.f32 1.0, %v697_v52  ;;  %v730_v61 = vsel %vm97_vm0, %v3101_v55, 0.0  ;;  %v1201_v49 = vsel %vm97_vm0, %v3151_v26, -inf }
  0x69   :  { %v980_v48 = vmax.f32 %v978_v43, %v979_v9  ;;  %v3119_v2 = vpop.eup %2474  ;;  %v731_v6 = vadd.f32 %v730_v61, %v729_v57  ;;  %v951_v7 = vsel %vm97_vm0, %v3109_v30, 0.0  ;;  %v1202_v18 = vmax.f32 %v1200_v59, %v1201_v49 }
  0x6a   :  { %v699_v14 = vmul.f32 %v2467_v46, %v698_v1  ;;  %v952_v13 = vsel %vm97_vm0, %v3119_v2, 0.0  ;;  %v1174_v3 = vand.u32 2147483648, %v3099_v54  ;;  %vm1168_vm10 = vweird.f32 %v3099_v54 }
  0x6b   :  { %v981_v16 = vrot.slane %v980_v48, 4  ;;  %v732_v19 = vrot.slane %v731_v6, 4  ;;  %v953_v21 = vadd.f32 %v952_v13, %v951_v7  ;;  %v1203_v44 = vrot.slane %v1202_v18, 4 }
  0x6c   :  { %v700_v24 = vadd.f32 %v2467_v46, %v699_v14  ;;  %v3153_v28 = vpop.eup %2476  ;;  %v1189_v8 = vand.u32 2147483648, %v3107_v62  ;;  %vm1183_vm15 = vweird.f32 %v3107_v62 }
  0x6d   :  { %2237 = vmatmul.msk.f32.gmra.mxu1 %vm181_vm12, %v3010_v12  ;;  %v708_v12 = vor.u32 1.1754944e-38, %v707_v45  ;;  %v982_v41 = vmax.f32 %v980_v48, %v981_v16  ;;  %v733_v4 = vadd.f32 %v732_v19, %v731_v6  ;;  %v954_v5 = vrot.slane %v953_v21, 4  ;;  %v3161_v31 = vpop.eup %2478  ;;  %v3197_v6 = vld [vmem:[%s4161_s3 + $0x30] sm:$0xff] }
  0x6e   :  { %v704_v32 = vsel %vm3133_vm8, %v2467_v46, %v700_v24  ;;  %v1164_v23 = vmul.f32 %v3153_v28, %v3099_v54  ;;  %v1179_v29 = vmul.f32 %v3161_v31, %v3107_v62  ;;  %v1204_v45 = vmax.f32 %v1202_v18, %v1203_v44 }
  0x6f   :  { %2255 = vmatmul.msk.f32.vlgmr.msrb.gmra.mxu0 %vm181_vm12, %v3114_v63  ;;  %v983_v42 = vrot.slane %v982_v41, 2  ;;  %v709_v36 = vsel %vm3137_vm9, %v708_v12, %v704_v32  ;;  %v734_v33 = vrot.slane %v733_v4, 2  ;;  %v955_v37 = vadd.f32 %v954_v5, %v953_v21 }
  0x70   :  { %v711_v38 = vmul.f32 %v2962_v20, %v709_v36  ;;  %v710_v39 = vmul.f32 %v2927_v58, %v709_v36  ;;  %v1165_v46 = vsub.f32 1.0, %v1164_v23  ;;  %v1180_v52 = vsub.f32 1.0, %v1179_v29 }
  0x71   :  { %v984_v34 = vmax.f32 %v982_v41, %v983_v42  ;;  %v735_v0 = vadd.f32 %v734_v33, %v733_v4  ;;  %v956_v27 = vrot.slane %v955_v37, 2  ;;  %vm1169_vm11 = vweird.f32 %v3153_v28 }
  0x72   :  { %780 = vmatpush.msra.mxu0 %v711_v38  ;;  %v1166_v50 = vmul.f32 %v3153_v28, %v1165_v46  ;;  %vm3190_vm13 = vmor %vm1168_vm10, %vm1169_vm11  ;;  %v1172_v16 = vand.u32 2147483647, %v3099_v54  ;;  %v1175_v12 = vor.u32 1.1754944e-38, %v1174_v3  ;;  %v1181_v19 = vmul.f32 %v3161_v31, %v1180_v52  ;;  %v2345_v52 = vld [vmem:[%s4160_s2 + $0x50] sm:$0xff] }
  0x73   :  { %v985_v11 = vrot.slane %v984_v34, 1  ;;  %v736_v58 = vrot.slane %v735_v0, 1  ;;  %v957_v20 = vadd.f32 %v956_v27, %v955_v37  ;;  %vm1184_vm1 = vweird.f32 %v3161_v31 }
  0x74   :  { %781 = vmatpush.msra.mxu0 %v710_v39  ;;  %v1167_v61 = vadd.f32 %v3153_v28, %v1166_v50  ;;  %vm1173_vm14 = vcmp.eq.f32.partialorder %v1172_v16, 8.507059e+37  ;;  %vm3215_vm2 = vmor %vm1183_vm15, %vm1184_vm1  ;;  %v1187_v4 = vand.u32 2147483647, %v3107_v62  ;;  %v1190_v5 = vor.u32 1.1754944e-38, %v1189_v8  ;;  %v3235_v62 = vld [vmem:[%s4161_s3 + $0x38] sm:$0xff] }
  0x75   :  { %2238 = vmatmul.msk.f32.gmra.mxu1 %vm181_vm12, %v3062_v53  ;;  %v986_v43 = vmax.f32 %v984_v34, %v985_v11  ;;  %v3182_v40 = vadd.f32 %v736_v58, %v735_v0  ;;  %v958_v57 = vrot.slane %v957_v20, 1  ;;  %v1205_v53 = vrot.slane %v1204_v45, 2 }
  0x76   :  { %v1171_v13 = vsel %vm3190_vm13, %v3153_v28, %v1167_v61  ;;  %vm1188_vm5 = vcmp.eq.f32.partialorder %v1187_v4, 8.507059e+37  ;;  %v3287_v61 = vadd.f32 1.2e-05, %v2345_v52  ;;  %v2344_v4 = vld [vmem:[%s4159_s1 + $0x58] sm:$0xff] }
  0x77   :  { %2256 = vmatmul.msk.f32.gmra.mxu0 %vm181_vm12, %v3168_v35  ;;  %v987_v9 = vsub.f32 %v3076_v17, %v986_v43  ;;  %v988_v1 = vsub.f32 %v3084_v47, %v986_v43  ;;  %2480 = vrcp.f32 %v3182_v40  ;;  %v3199_v7 = vadd.f32 %v958_v57, %v957_v20 }
  0x78   :  { %v1206_v47 = vmax.f32 %v1204_v45, %v1205_v53  ;;  %v1176_v21 = vsel %vm1173_vm14, %v1175_v12, %v1171_v13  ;;  %v747_v24 = vand.u32 2147483647, %v3182_v40  ;;  %v749_v41 = vand.u32 2147483648, %v3182_v40  ;;  %v3298_v13 = vld [vmem:[%s4161_s3 + $0x40] sm:$0xff] }
  0x79   :  { %v989_v17 = vmul.f32 1.442695, %v987_v9  ;;  %v991_v14 = vmul.f32 1.442695, %v988_v1  ;;  %2482 = vrcp.f32 %v3199_v7  ;;  %v3226_v59 = vmul.f32 %v1176_v21, %v2712_v51 }
  0x7a   :  { %v1207_v56 = vrot.slane %v1206_v47, 1  ;;  %vm743_vm3 = vweird.f32 %v3182_v40  ;;  %vm3239_vm6 = vcmp.eq.f32.partialorder %v747_v24, 8.507059e+37  ;;  %v750_v39 = vor.u32 1.1754944e-38, %v749_v41 }
  0x7b   :  { %2484 = vpow2.f32 %v989_v17  ;;  %v1242_v44 = vsel %vm97_vm0, %v3226_v59, -inf  ;;  %vm965_vm8 = vweird.f32 %v3199_v7  ;;  %v969_v20 = vand.u32 2147483647, %v3199_v7 }
  0x7c   :  { %2486 = vpow2.f32 %v991_v14  ;;  %v1208_v54 = vmax.f32 %v1206_v47, %v1207_v56  ;;  %vm1432_vm14 = vweird.f32 %v3287_v61 }
  0x7d   :  { %2259 = vmatmul.msk.f32.vlgmr.msrb.gmra.mxu1 %vm181_vm12, %v3114_v63  ;;  %v1182_v63 = vadd.f32 %v3161_v31, %v1181_v19  ;;  %v2481_v22 = vpop.eup %2480  ;;  %vm3283_vm11 = vcmp.eq.f32.partialorder %v969_v20, 8.507059e+37 }
  0x7e   :  { %v739_v28 = vmul.f32 %v2481_v22, %v3182_v40  ;;  %v1209_v32 = vsub.f32 %v3148_v25, %v1208_v54  ;;  %v1210_v42 = vsub.f32 %v3151_v26, %v1208_v54  ;;  %vm744_vm4 = vweird.f32 %v2481_v22  ;;  %v2346_v40 = vld [vmem:[%s4160_s2 + $0x58] sm:$0xff] }
  0x7f   :  { %2257 = vmatmul.msk.f32.gmra.mxu0 %vm181_vm12, %v3197_v6  ;;  %v1186_v49 = vsel %vm3215_vm2, %v3161_v31, %v1182_v63  ;;  %v2483_v36 = vpop.eup %2482  ;;  %vm3260_vm7 = vmor %vm743_vm3, %vm744_vm4  ;;  %v3291_v14 = vadd.f32 1.2e-05, %v2346_v40 }
  0x80   :  { %v740_v25 = vsub.f32 1.0, %v739_v28  ;;  %v1211_v33 = vmul.f32 1.442695, %v1209_v32  ;;  %v1213_v26 = vmul.f32 1.442695, %v1210_v42  ;;  %v1191_v37 = vsel %vm1188_vm5, %v1190_v5, %v1186_v49 }
  0x81   :  { %v3237_v18 = vpop.eup %2484  ;;  %v961_v31 = vmul.f32 %v2483_v36, %v3199_v7  ;;  %v3245_v34 = vmul.f32 %v1191_v37, %v2712_v51  ;;  %vm966_vm9 = vweird.f32 %v2483_v36  ;;  %v3330_v32 = vmul.f32 %v2344_v4, %v2660_v10 }
  0x82   :  { %v3247_v23 = vpop.eup %2486  ;;  %v741_v0 = vmul.f32 %v2481_v22, %v740_v25  ;;  %v993_v27 = vsel %vm97_vm0, %v3237_v18, 0.0  ;;  %2488 = vpow2.f32 %v1211_v33  ;;  %vm3279_vm10 = vmor %vm965_vm8, %vm966_vm9  ;;  %vm1447_vm4 = vweird.f32 %v3291_v14 }
  0x83   :  { %v962_v11 = vsub.f32 1.0, %v961_v31  ;;  %v994_v46 = vsel %vm97_vm0, %v3247_v23, 0.0  ;;  %2490 = vpow2.f32 %v1213_v26  ;;  %v1243_v3 = vsel %vm97_vm0, %v3245_v34, -inf  ;;  %v3342_v31 = vld [vmem:[%s4161_s3 + $0x48] sm:$0xff] }
  0x84   :  { %v742_v58 = vadd.f32 %v2481_v22, %v741_v0  ;;  %v995_v50 = vadd.f32 %v994_v46, %v993_v27  ;;  %v1244_v1 = vmax.f32 %v1242_v44, %v1243_v3  ;;  %2492 = vrcp.f32 %v3287_v61 }
  0x85   :  { %2260 = vmatmul.msk.f32.gmra.mxu1 %vm181_vm12, %v3168_v35  ;;  %v971_v35 = vand.u32 2147483648, %v3199_v7  ;;  %v963_v45 = vmul.f32 %v2483_v36, %v962_v11  ;;  %2494 = vrcp.f32 %v3291_v14  ;;  %v1465_v25 = vsel %vm97_vm0, %v3330_v32, -inf }
  0x86   :  { %v746_v57 = vsel %vm3260_vm7, %v2481_v22, %v742_v58  ;;  %v996_v17 = vrot.slane %v995_v50, 4  ;;  %v1245_v56 = vrot.slane %v1244_v1, 4 }
  0x87   :  { %2258 = vmatmul.msk.f32.gmra.mxu0 %vm181_vm12, %v3235_v62  ;;  %v972_v43 = vor.u32 1.1754944e-38, %v971_v35  ;;  %v751_v48 = vsel %vm3239_vm6, %v750_v39, %v746_v57  ;;  %v964_v7 = vadd.f32 %v2483_v36, %v963_v45 }
  0x88   :  { %v3293_v47 = vpop.eup %2488  ;;  %v753_v16 = vmul.f32 %v3101_v55, %v751_v48  ;;  %v752_v8 = vmul.f32 %v3094_v15, %v751_v48  ;;  %v997_v54 = vadd.f32 %v996_v17, %v995_v50  ;;  %v1246_v63 = vmax.f32 %v1244_v1, %v1245_v56 }
  0x89   :  { %v3303_v12 = vpop.eup %2490  ;;  %v968_v19 = vsel %vm3279_vm10, %v2483_v36, %v964_v7  ;;  %v1215_v21 = vsel %vm97_vm0, %v3293_v47, 0.0  ;;  %v1436_v48 = vand.u32 2147483647, %v3287_v61 }
  0x8a   :  { %v973_v15 = vsel %vm3283_vm11, %v972_v43, %v968_v19  ;;  %v1216_v55 = vsel %vm97_vm0, %v3303_v12, 0.0  ;;  %809 = vmatpush.msra.mxu1 %v753_v16  ;;  %v998_v24 = vrot.slane %v997_v54, 2  ;;  %v1247_v5 = vrot.slane %v1246_v63, 2  ;;  %v2493_v42 = vpop.eup %2492 }
  0x8b   :  { %v975_v60 = vmul.f32 %v3119_v2, %v973_v15  ;;  %v974_v22 = vmul.f32 %v3109_v30, %v973_v15  ;;  %v1217_v41 = vadd.f32 %v1216_v55, %v1215_v21  ;;  %v3336_v33 = vpop.eup %2494  ;;  %v1428_v39 = vmul.f32 %v2493_v42, %v3287_v61 }
  0x8c   :  { %810 = vmatpush.msra.mxu1 %v752_v8  ;;  %v999_v30 = vadd.f32 %v998_v24, %v997_v54  ;;  %v1248_v49 = vmax.f32 %v1246_v63, %v1247_v5  ;;  %v1443_v27 = vmul.f32 %v3336_v33, %v3291_v14  ;;  %vm1433_vm15 = vweird.f32 %v2493_v42 }
  0x8d   :  { %2261 = vmatmul.msk.f32.gmra.mxu1 %vm181_vm12, %v3197_v6  ;;  %v2343_v6 = vld [vmem:[%s4159_s1 + $0x50] sm:$0xff]  ;;  %1044 = vmatpush.msrb.mxu0 %v975_v60  ;;  %v1218_v2 = vrot.slane %v1217_v41, 4  ;;  %v1429_v35 = vsub.f32 1.0, %v1428_v39  ;;  %vm1434_vm1 = vmor %vm1432_vm14, %vm1433_vm15  ;;  %vm1437_vm2 = vcmp.eq.f32.partialorder %v1436_v48, 8.507059e+37  ;;  %vm1448_vm5 = vweird.f32 %v3336_v33 }
  0x8e   :  { %v3327_v28 = vmul.f32 %v2343_v6, %v2660_v10  ;;  %v1000_v26 = vrot.slane %v999_v30, 1  ;;  %v1249_v0 = vrot.slane %v1248_v49, 1  ;;  %v1444_v58 = vsub.f32 1.0, %v1443_v27  ;;  %vm3378_vm6 = vmor %vm1447_vm4, %vm1448_vm5 }
  0x8f   :  { %2279 = vmatmul.msk.f32.vlgmr.msra.gmra.mxu0 %vm181_vm12, %v3298_v13  ;;  %v1219_v37 = vadd.f32 %v1218_v2, %v1217_v41  ;;  %v1451_v60 = vand.u32 2147483647, %v3291_v14 }
  0x90   :  { %v1464_v36 = vsel %vm97_vm0, %v3327_v28, -inf  ;;  %1045 = vmatpush.msrb.mxu0 %v974_v22  ;;  %v3346_v44 = vadd.f32 %v1000_v26, %v999_v30  ;;  %v1250_v46 = vmax.f32 %v1248_v49, %v1249_v0  ;;  %v1445_v16 = vmul.f32 %v3336_v33, %v1444_v58 }
  0x91   :  { %v1466_v38 = vmax.f32 %v1464_v36, %v1465_v25  ;;  %v1220_v29 = vrot.slane %v1219_v37, 2  ;;  %v1453_v22 = vand.u32 2147483648, %v3291_v14  ;;  %vm1452_vm7 = vcmp.eq.f32.partialorder %v1451_v60, 8.507059e+37 }
  0x92   :  { %2496 = vrcp.f32 %v3346_v44  ;;  %vm1007_vm13 = vweird.f32 %v3346_v44  ;;  %v1251_v45 = vsub.f32 %v3226_v59, %v1250_v46  ;;  %v1252_v43 = vsub.f32 %v3245_v34, %v1250_v46  ;;  %v3364_v34 = vld [vmem:[%s4161_s3 + $0x50] sm:$0xff] }
  0x93   :  { %v1467_v11 = vrot.slane %v1466_v38, 4  ;;  %v1221_v20 = vadd.f32 %v1220_v29, %v1219_v37  ;;  %v1011_v3 = vand.u32 2147483647, %v3346_v44  ;;  %v1013_v52 = vand.u32 2147483648, %v3346_v44 }
  0x94   :  { %v1253_v57 = vmul.f32 1.442695, %v1251_v45  ;;  %v1255_v53 = vmul.f32 1.442695, %v1252_v43  ;;  %v1438_v59 = vand.u32 2147483648, %v3287_v61  ;;  %v1446_v15 = vadd.f32 %v3336_v33, %v1445_v16 }
  0x95   :  { %2262 = vmatmul.msk.f32.gmra.mxu1 %vm181_vm12, %v3235_v62  ;;  %v1468_v50 = vmax.f32 %v1466_v38, %v1467_v11  ;;  %v1430_v62 = vmul.f32 %v2493_v42, %v1429_v35  ;;  %v1222_v40 = vrot.slane %v1221_v20, 1  ;;  %v1454_v36 = vor.u32 1.1754944e-38, %v1453_v22 }
  0x96   :  { %2498 = vpow2.f32 %v1253_v57  ;;  %v1439_v19 = vor.u32 1.1754944e-38, %v1438_v59  ;;  %v1450_v24 = vsel %vm3378_vm6, %v3336_v33, %v1446_v15  ;;  %vm1012_vm9 = vcmp.eq.f32.partialorder %v1011_v3, 8.507059e+37  ;;  %v3450_v59 = vld [vmem:[%s4161_s3 + $0x60] sm:$0xff] }
  0x97   :  { %2280 = vmatmul.msk.f32.gmra.mxu0 %vm181_vm12, %v3342_v31  ;;  %v1469_v9 = vrot.slane %v1468_v50, 2  ;;  %v1431_v1 = vadd.f32 %v2493_v42, %v1430_v62  ;;  %v3366_v7 = vadd.f32 %v1222_v40, %v1221_v20  ;;  %2500 = vpow2.f32 %v1255_v53  ;;  %v2370_v62 = vld [vmem:[%s4160_s2 + $0x68] sm:$0xff]  ;;  %v2367_v15 = vld [vmem:[%s4159_s1 + $0x60] sm:$0xff] }
  0x98   :  { %v2497_v8 = vpop.eup %2496  ;;  %v1455_v39 = vsel %vm1452_vm7, %v1454_v36, %v1450_v24  ;;  %v3443_v57 = vadd.f32 1.2e-05, %v2370_v62  ;;  %v3493_v36 = vld [vmem:[%s4161_s3 + $0x68] sm:$0xff] }
  0x99   :  { %v1470_v17 = vmax.f32 %v1468_v50, %v1469_v9  ;;  %v1435_v56 = vsel %vm1434_vm1, %v2493_v42, %v1431_v1  ;;  %v1003_v61 = vmul.f32 %v2497_v8, %v3346_v44  ;;  %vm1008_vm3 = vweird.f32 %v2497_v8 }
  0x9a   :  { %2502 = vrcp.f32 %v3366_v7  ;;  %v1440_v21 = vsel %vm1437_vm2, %v1439_v19, %v1435_v56  ;;  %vm3399_vm8 = vmor %vm1007_vm13, %vm1008_vm3  ;;  %v1014_v42 = vor.u32 1.1754944e-38, %v1013_v52  ;;  %v3420_v29 = vmul.f32 %v1455_v39, %v2712_v51  ;;  %v2369_v52 = vld [vmem:[%s4160_s2 + $0x60] sm:$0xff] }
  0x9b   :  { %v1471_v54 = vrot.slane %v1470_v17, 1  ;;  %v1004_v55 = vsub.f32 1.0, %v1003_v61  ;;  %v3388_v41 = vmul.f32 %v1440_v21, %v2712_v51  ;;  %v1235_v46 = vand.u32 2147483648, %v3366_v7 }
  0x9c   :  { %v3390_v6 = vpop.eup %2498  ;;  %vm1229_vm10 = vweird.f32 %v3366_v7  ;;  %v1233_v43 = vand.u32 2147483647, %v3366_v7  ;;  %v3441_v40 = vadd.f32 1.2e-05, %v2369_v52 }
  0x9d   :  { %2283 = vmatmul.msk.f32.vlgmr.msra.gmra.mxu1 %vm181_vm12, %v3298_v13  ;;  %v1472_v63 = vmax.f32 %v1470_v17, %v1471_v54  ;;  %v1005_v4 = vmul.f32 %v2497_v8, %v1004_v55  ;;  %v3394_v2 = vpop.eup %2500  ;;  %v1257_v49 = vsel %vm97_vm0, %v3390_v6, 0.0  ;;  %v1506_v0 = vsel %vm97_vm0, %v3388_v41, -inf }
  0x9e   :  { %v1258_v33 = vsel %vm97_vm0, %v3394_v2, 0.0  ;;  %v1236_v50 = vor.u32 1.1754944e-38, %v1235_v46  ;;  %vm1234_vm14 = vcmp.eq.f32.partialorder %v1233_v43, 8.507059e+37  ;;  %vm1696_vm2 = vweird.f32 %v3441_v40 }
  0x9f   :  { %2281 = vmatmul.msk.f32.gmra.mxu0 %vm181_vm12, %v3364_v34  ;;  %v1473_v5 = vsub.f32 %v3327_v28, %v1472_v63  ;;  %v1474_v30 = vsub.f32 %v3330_v32, %v1472_v63  ;;  %v3408_v28 = vld [vmem:[%s4161_s3 + $0x58] sm:$0xff]  ;;  %v1006_v32 = vadd.f32 %v2497_v8, %v1005_v4  ;;  %v1259_v38 = vadd.f32 %v1258_v33, %v1257_v49 }
  0xa0   :  { %v2503_v25 = vpop.eup %2502  ;;  %v3473_v63 = vmul.f32 %v2367_v15, %v2660_v10 }
  0xa1   :  { %v1475_v26 = vmul.f32 1.442695, %v1473_v5  ;;  %v1225_v37 = vmul.f32 %v2503_v25, %v3366_v7  ;;  %v1010_v27 = vsel %vm3399_vm8, %v2497_v8, %v1006_v32  ;;  %v1477_v44 = vmul.f32 1.442695, %v1474_v30 }
  0xa2   :  { %v1015_v11 = vsel %vm1012_vm9, %v1014_v42, %v1010_v27  ;;  %v1260_v58 = vrot.slane %v1259_v38, 4  ;;  %vm1230_vm11 = vweird.f32 %v2503_v25  ;;  %v1728_v4 = vsel %vm97_vm0, %v3473_v63, -inf }
  0xa3   :  { %2504 = vpow2.f32 %v1475_v26  ;;  %v1226_v35 = vsub.f32 1.0, %v1225_v37  ;;  %v1017_v20 = vmul.f32 %v3247_v23, %v1015_v11  ;;  %vm3435_vm13 = vmor %vm1229_vm10, %vm1230_vm11  ;;  %vm1711_vm8 = vweird.f32 %v3443_v57 }
  0xa4   :  { %v1261_v3 = vadd.f32 %v1260_v58, %v1259_v38  ;;  %2506 = vpow2.f32 %v1477_v44 }
  0xa5   :  { %2284 = vmatmul.msk.f32.gmra.mxu1 %vm181_vm12, %v3342_v31  ;;  %v1016_v31 = vmul.f32 %v3237_v18, %v1015_v11  ;;  %v1227_v45 = vmul.f32 %v2503_v25, %v1226_v35  ;;  %v1507_v18 = vsel %vm97_vm0, %v3420_v29, -inf  ;;  %2508 = vrcp.f32 %v3441_v40 }
  0xa6   :  { %1073 = vmatpush.msrb.mxu1 %v1017_v20  ;;  %v1262_v9 = vrot.slane %v1261_v3, 2  ;;  %v1508_v1 = vmax.f32 %v1506_v0, %v1507_v18  ;;  %2510 = vrcp.f32 %v3443_v57 }
  0xa7   :  { %2282 = vmatmul.msk.f32.gmra.mxu0 %vm181_vm12, %v3408_v28  ;;  %v1228_v53 = vadd.f32 %v2503_v25, %v1227_v45 }
  0xa8   :  { %1074 = vmatpush.msrb.mxu1 %v1016_v31  ;;  %v1263_v17 = vadd.f32 %v1262_v9, %v1261_v3  ;;  %v1509_v16 = vrot.slane %v1508_v1, 4  ;;  %v3515_v9 = vld [vmem:[%s4161_s3 + $0x70] sm:$0xff] }
  0xa9   :  { %v3445_v48 = vpop.eup %2504  ;;  %v1232_v7 = vsel %vm3435_vm13, %v2503_v25, %v1228_v53 }
  0xaa   :  { %v1237_v8 = vsel %vm1234_vm14, %v1236_v50, %v1232_v7  ;;  %v1479_v56 = vsel %vm97_vm0, %v3445_v48, 0.0  ;;  %v1264_v54 = vrot.slane %v1263_v17, 1  ;;  %v1510_v21 = vmax.f32 %v1508_v1, %v1509_v16  ;;  %v3470_v55 = vpop.eup %2506 }
  0xab   :  { %v1239_v19 = vmul.f32 %v3303_v12, %v1237_v8  ;;  %v1238_v61 = vmul.f32 %v3293_v47, %v1237_v8  ;;  %v1480_v12 = vsel %vm97_vm0, %v3470_v55, 0.0  ;;  %v3480_v22 = vpop.eup %2508  ;;  %v1700_v7 = vand.u32 2147483647, %v3441_v40 }
  0xac   :  { %v1265_v47 = vadd.f32 %v1264_v54, %v1263_v17  ;;  %v1511_v60 = vrot.slane %v1510_v21, 2  ;;  %v1481_v24 = vadd.f32 %v1480_v12, %v1479_v56  ;;  %v1692_v42 = vmul.f32 %v3480_v22, %v3441_v40  ;;  %v3488_v49 = vpop.eup %2510 }
  0xad   :  { %2285 = vmatmul.msk.f32.gmra.mxu1 %vm181_vm12, %v3364_v34  ;;  %v2368_v34 = vld [vmem:[%s4159_s1 + $0x68] sm:$0xff]  ;;  %1308 = vmatpush.msra.mxu0 %v1239_v19  ;;  %v1707_v0 = vmul.f32 %v3488_v49, %v3443_v57  ;;  %vm1697_vm4 = vweird.f32 %v3480_v22  ;;  %vm1701_vm6 = vcmp.eq.f32.partialorder %v1700_v7, 8.507059e+37  ;;  %vm1712_vm9 = vweird.f32 %v3488_v49 }
  0xae   :  { %v3476_v13 = vmul.f32 %v2368_v34, %v2660_v10  ;;  %2512 = vrcp.f32 %v1265_v47  ;;  %v1512_v30 = vmax.f32 %v1510_v21, %v1511_v60  ;;  %v1277_v25 = vand.u32 2147483648, %v1265_v47  ;;  %vm3517_vm5 = vmor %vm1696_vm2, %vm1697_vm4 }
  0xaf   :  { %2303 = vmatmul.msk.f32.vlgmr.msrb.gmra.mxu0 %vm181_vm12, %v3450_v59  ;;  %v1482_v32 = vrot.slane %v1481_v24, 4  ;;  %v1275_v33 = vand.u32 2147483647, %v1265_v47  ;;  %v1693_v39 = vsub.f32 1.0, %v1692_v42  ;;  %vm1271_vm15 = vweird.f32 %v1265_v47  ;;  %vm3545_vm10 = vmor %vm1711_vm8, %vm1712_vm9 }
  0xb0   :  { %v1729_v5 = vsel %vm97_vm0, %v3476_v13, -inf  ;;  %1309 = vmatpush.msra.mxu0 %v1238_v61  ;;  %v1513_v26 = vrot.slane %v1512_v30, 1  ;;  %v1278_v27 = vor.u32 1.1754944e-38, %v1277_v25  ;;  %v1708_v20 = vsub.f32 1.0, %v1707_v0  ;;  %v3567_v25 = vld [vmem:[%s4161_s3 + $0x78] sm:$0xff] }
  0xb1   :  { %v1730_v14 = vmax.f32 %v1728_v4, %v1729_v5  ;;  %v1483_v38 = vadd.f32 %v1482_v32, %v1481_v24  ;;  %vm3501_vm1 = vcmp.eq.f32.partialorder %v1275_v33, 8.507059e+37  ;;  %v1694_v58 = vmul.f32 %v3480_v22, %v1693_v39 }
  0xb2   :  { %v1514_v44 = vmax.f32 %v1512_v30, %v1513_v26  ;;  %v1709_v56 = vmul.f32 %v3488_v49, %v1708_v20  ;;  %v1715_v34 = vand.u32 2147483647, %v3443_v57 }
  0xb3   :  { %v1731_v37 = vrot.slane %v1730_v14, 4  ;;  %v1484_v46 = vrot.slane %v1483_v38, 2  ;;  %v1695_v62 = vadd.f32 %v3480_v22, %v1694_v58  ;;  %v2394_v58 = vld [vmem:[%s4160_s2 + $0x78] sm:$0xff] }
  0xb4   :  { %v2513_v31 = vpop.eup %2512  ;;  %v1515_v45 = vsub.f32 %v3388_v41, %v1514_v44  ;;  %v1516_v43 = vsub.f32 %v3420_v29, %v1514_v44  ;;  %v1710_v15 = vadd.f32 %v3488_v49, %v1709_v56  ;;  %vm1716_vm11 = vcmp.eq.f32.partialorder %v1715_v34, 8.507059e+37 }
  0xb5   :  { %2286 = vmatmul.msk.f32.gmra.mxu1 %vm181_vm12, %v3408_v28  ;;  %v1732_v11 = vmax.f32 %v1730_v14, %v1731_v37  ;;  %v1702_v28 = vand.u32 2147483648, %v3441_v40  ;;  %v1267_v3 = vmul.f32 %v2513_v31, %v1265_v47  ;;  %vm1272_vm3 = vweird.f32 %v2513_v31 }
  0xb6   :  { %v1485_v52 = vadd.f32 %v1484_v46, %v1483_v38  ;;  %v1517_v23 = vmul.f32 1.442695, %v1515_v45  ;;  %v1519_v18 = vmul.f32 1.442695, %v1516_v43  ;;  %v1699_v8 = vsel %vm3517_vm5, %v3480_v22, %v1695_v62  ;;  %vm3534_vm7 = vmor %vm1271_vm15, %vm1272_vm3  ;;  %v2393_v46 = vld [vmem:[%s4160_s2 + $0x70] sm:$0xff] }
  0xb7   :  { %2304 = vmatmul.msk.f32.gmra.mxu0 %vm181_vm12, %v3493_v36  ;;  %v1733_v50 = vrot.slane %v1732_v11, 2  ;;  %v1268_v41 = vsub.f32 1.0, %v1267_v3  ;;  %v1703_v17 = vor.u32 1.1754944e-38, %v1702_v28  ;;  %v1717_v22 = vand.u32 2147483648, %v3443_v57 }
  0xb8   :  { %v1486_v29 = vrot.slane %v1485_v52, 1  ;;  %2514 = vpow2.f32 %v1517_v23  ;;  %v1714_v4 = vsel %vm3545_vm10, %v3488_v49, %v1710_v15  ;;  %v3600_v3 = vadd.f32 1.2e-05, %v2394_v58  ;;  %v3609_v23 = vld [vmem:[%s4161_s3 + $0x80] sm:$0xff] }
  0xb9   :  { %v1734_v53 = vmax.f32 %v1732_v11, %v1733_v50  ;;  %v1269_v19 = vmul.f32 %v2513_v31, %v1268_v41  ;;  %2516 = vpow2.f32 %v1519_v18  ;;  %v1704_v21 = vsel %vm1701_vm6, %v1703_v17, %v1699_v8 }
  0xba   :  { %v3528_v61 = vadd.f32 %v1486_v29, %v1485_v52  ;;  %v3556_v5 = vmul.f32 %v1704_v21, %v2712_v51  ;;  %v1718_v42 = vor.u32 1.1754944e-38, %v1717_v22 }
  0xbb   :  { %v1735_v16 = vrot.slane %v1734_v53, 1 }
  0xbc   :  { %2518 = vrcp.f32 %v3528_v61  ;;  %v1719_v37 = vsel %vm1716_vm11, %v1718_v42, %v1714_v4  ;;  %vm1493_vm13 = vweird.f32 %v3528_v61  ;;  %v1497_v11 = vand.u32 2147483647, %v3528_v61 }
  0xbd   :  { %2307 = vmatmul.msk.f32.vlgmr.msrb.gmra.mxu1 %vm181_vm12, %v3450_v59  ;;  %v1736_v54 = vmax.f32 %v1734_v53, %v1735_v16  ;;  %v1270_v59 = vadd.f32 %v2513_v31, %v1269_v19  ;;  %v3578_v0 = vmul.f32 %v1719_v37, %v2712_v51  ;;  %v2391_v19 = vld [vmem:[%s4159_s1 + $0x70] sm:$0xff] }
  0xbe   :  { %v3639_v34 = vmul.f32 %v2391_v19, %v2660_v10 }
  0xbf   :  { %2305 = vmatmul.msk.f32.gmra.mxu0 %vm181_vm12, %v3515_v9  ;;  %v1737_v12 = vsub.f32 %v3473_v63, %v1736_v54  ;;  %v1738_v47 = vsub.f32 %v3476_v13, %v1736_v54  ;;  %v1274_v24 = vsel %vm3534_vm7, %v2513_v31, %v1270_v59  ;;  %v3558_v63 = vpop.eup %2514  ;;  %v1771_v35 = vsel %vm97_vm0, %v3578_v0, -inf }
  0xc0   :  { %v1279_v13 = vsel %vm3501_vm1, %v1278_v27, %v1274_v24  ;;  %v3562_v57 = vpop.eup %2516  ;;  %v1521_v32 = vsel %vm97_vm0, %v3558_v63, 0.0  ;;  %v1770_v27 = vsel %vm97_vm0, %v3556_v5, -inf  ;;  %v3596_v31 = vadd.f32 1.2e-05, %v2393_v46 }
  0xc1   :  { %v1739_v30 = vmul.f32 1.442695, %v1737_v12  ;;  %v1741_v14 = vmul.f32 1.442695, %v1738_v47  ;;  %v1281_v49 = vmul.f32 %v3394_v2, %v1279_v13  ;;  %v1280_v33 = vmul.f32 %v3390_v6, %v1279_v13 }
  0xc2   :  { %v1522_v26 = vsel %vm97_vm0, %v3562_v57, 0.0  ;;  %v2519_v38 = vpop.eup %2518  ;;  %v1499_v2 = vand.u32 2147483648, %v3528_v61  ;;  %v1772_v20 = vmax.f32 %v1770_v27, %v1771_v35  ;;  %vm1498_vm1 = vcmp.eq.f32.partialorder %v1497_v11, 8.507059e+37 }
  0xc3   :  { %2520 = vpow2.f32 %v1739_v30  ;;  %v1523_v39 = vadd.f32 %v1522_v26, %v1521_v32  ;;  %1337 = vmatpush.msra.mxu1 %v1281_v49  ;;  %v1489_v6 = vmul.f32 %v2519_v38, %v3528_v61  ;;  %vm1494_vm14 = vweird.f32 %v2519_v38  ;;  %v2392_v61 = vld [vmem:[%s4159_s1 + $0x78] sm:$0xff]  ;;  %v3661_v30 = vld [vmem:[%s4161_s3 + $0x88] sm:$0xff] }
  0xc4   :  { %2522 = vpow2.f32 %v1741_v14  ;;  %v1500_v50 = vor.u32 1.1754944e-38, %v1499_v2  ;;  %vm3614_vm15 = vmor %vm1493_vm13, %vm1494_vm14  ;;  %v1773_v29 = vrot.slane %v1772_v20, 4  ;;  %v3642_v12 = vmul.f32 %v2392_v61, %v2660_v10 }
  0xc5   :  { %2308 = vmatmul.msk.f32.gmra.mxu1 %vm181_vm12, %v3493_v36  ;;  %v1524_v44 = vrot.slane %v1523_v39, 4  ;;  %v1490_v36 = vsub.f32 1.0, %v1489_v6  ;;  %2524 = vrcp.f32 %v3596_v31  ;;  %v1992_v4 = vsel %vm97_vm0, %v3639_v34, -inf }
  0xc6   :  { %1338 = vmatpush.msra.mxu1 %v1280_v33  ;;  %v1774_v8 = vmax.f32 %v1772_v20, %v1773_v29  ;;  %2526 = vrcp.f32 %v3600_v3  ;;  %vm1960_vm3 = vweird.f32 %v3596_v31  ;;  %vm1975_vm7 = vweird.f32 %v3600_v3 }
  0xc7   :  { %2306 = vmatmul.msk.f32.gmra.mxu0 %vm181_vm12, %v3567_v25  ;;  %v1525_v28 = vadd.f32 %v1524_v44, %v1523_v39  ;;  %v1491_v43 = vmul.f32 %v2519_v38, %v1490_v36  ;;  %v1966_v44 = vand.u32 2147483648, %v3596_v31 }
  0xc8   :  { %v1775_v21 = vrot.slane %v1774_v8, 2 }
  0xc9   :  { %v3598_v45 = vpop.eup %2520  ;;  %v1526_v53 = vrot.slane %v1525_v28, 2  ;;  %v1492_v1 = vadd.f32 %v2519_v38, %v1491_v43 }
  0xca   :  { %v3602_v52 = vpop.eup %2522  ;;  %v1743_v41 = vsel %vm97_vm0, %v3598_v45, 0.0  ;;  %v1776_v24 = vmax.f32 %v1774_v8, %v1775_v21  ;;  %v1981_v21 = vand.u32 2147483648, %v3600_v3 }
  0xcb   :  { %v1744_v7 = vsel %vm97_vm0, %v3602_v52, 0.0  ;;  %v1527_v17 = vadd.f32 %v1526_v53, %v1525_v28  ;;  %v1496_v56 = vsel %vm3614_vm15, %v2519_v38, %v1492_v1  ;;  %v3644_v47 = vpop.eup %2524  ;;  %v1964_v1 = vand.u32 2147483647, %v3596_v31 }
  0xcc   :  { %v3604_v62 = vpop.f32.mrf.mxu0  ;;  %v1745_v16 = vadd.f32 %v1744_v7, %v1743_v41  ;;  %v3654_v13 = vpop.eup %2526  ;;  %v1777_v42 = vrot.slane %v1776_v24, 1  ;;  %vm1961_vm4 = vweird.f32 %v3644_v47  ;;  %v3692_v41 = vld [vmem:[%s4161_s3 + $0x90] sm:$0xff]  ;;  %vm252_vm15 = vcmask 261120  }
  0xcd   :  { %2309 = vmatmul.msk.f32.gmra.mxu1 %vm181_vm12, %v3515_v9  ;;  %v1501_v9 = vsel %vm1498_vm1, %v1500_v50, %v1496_v56  ;;  %v1528_v40 = vrot.slane %v1527_v17, 1  ;;  %v1971_v6 = vmul.f32 %v3654_v13, %v3600_v3  ;;  %vm3682_vm5 = vmor %vm1960_vm3, %vm1961_vm4  ;;  %vm1965_vm8 = vcmp.eq.f32.partialorder %v1964_v1, 8.507059e+37 }
  0xce   :  { %v1746_v54 = vrot.slane %v1745_v16, 4  ;;  %v1503_v15 = vmul.f32 %v3470_v55, %v1501_v9  ;;  %v1502_v59 = vmul.f32 %v3445_v48, %v1501_v9  ;;  %v1993_v55 = vsel %vm97_vm0, %v3642_v12, -inf }
  0xcf   :  { %2327 = vmatmul.msk.f32.vlgmr.msra.gmra.mxu0 %vm181_vm12, %v3609_v23  ;;  %v3646_v60 = vadd.f32 %v1528_v40, %v1527_v17  ;;  %v1956_v48 = vmul.f32 %v3644_v47, %v3596_v31  ;;  %v1994_v49 = vmax.f32 %v1992_v4, %v1993_v55  ;;  %v1778_v37 = vmax.f32 %v1776_v24, %v1777_v42 }
  0xd0   :  { %v1747_v22 = vadd.f32 %v1746_v54, %v1745_v16  ;;  %1572 = vmatpush.msrb.mxu0 %v1503_v15  ;;  %v1972_v7 = vsub.f32 1.0, %v1971_v6  ;;  %vm1976_vm9 = vweird.f32 %v3654_v13  ;;  %v1979_v9 = vand.u32 2147483647, %v3600_v3 }
  0xd1   :  { %2528 = vrcp.f32 %v3646_v60  ;;  %v1957_v32 = vsub.f32 1.0, %v1956_v48  ;;  %v1541_v33 = vand.u32 2147483648, %v3646_v60  ;;  %vm1535_vm2 = vweird.f32 %v3646_v60  ;;  %vm3706_vm10 = vmor %vm1975_vm7, %vm1976_vm9 }
  0xd2   :  { %v1748_v14 = vrot.slane %v1747_v22, 2  ;;  %1573 = vmatpush.msrb.mxu0 %v1502_v59  ;;  %v1995_v38 = vrot.slane %v1994_v49, 4  ;;  %v1779_v27 = vsub.f32 %v3556_v5, %v1778_v37  ;;  %v1539_v46 = vand.u32 2147483647, %v3646_v60 }
  0xd3   :  { %v1958_v39 = vmul.f32 %v3644_v47, %v1957_v32  ;;  %v1967_v5 = vor.u32 1.1754944e-38, %v1966_v44  ;;  %v1973_v8 = vmul.f32 %v3654_v13, %v1972_v7  ;;  %v1542_v40 = vor.u32 1.1754944e-38, %v1541_v33 }
  0xd4   :  { %v3656_v10 = vpop.f32.mrf.mxu0  ;;  %v1749_v26 = vadd.f32 %v1748_v14, %v1747_v22  ;;  %v1996_v36 = vmax.f32 %v1994_v49, %v1995_v38  ;;  %v1781_v28 = vmul.f32 1.442695, %v1779_v27  ;;  %vm3720_vm13 = vcmp.eq.f32.partialorder %v1539_v46, 8.507059e+37 }
  0xd5   :  { %2310 = vmatmul.msk.f32.gmra.mxu1 %vm181_vm12, %v3567_v25  ;;  %v1780_v25 = vsub.f32 %v3578_v0, %v1778_v37  ;;  %v1959_v11 = vadd.f32 %v3644_v47, %v1958_v39  ;;  %v1974_v54 = vadd.f32 %v3654_v13, %v1973_v8  ;;  %vm3724_vm14 = vcmp.eq.f32.partialorder %v1979_v9, 8.507059e+37 }
  0xd6   :  { %v1750_v2 = vrot.slane %v1749_v26, 1  ;;  %v1997_v18 = vrot.slane %v1996_v36, 2  ;;  %v1982_v4 = vor.u32 1.1754944e-38, %v1981_v21 }
  0xd7   :  { %2328 = vmatmul.msk.f32.gmra.mxu0 %vm181_vm12, %v3661_v30  ;;  %v2529_v35 = vpop.eup %2528  ;;  %v1783_v50 = vmul.f32 1.442695, %v1780_v25  ;;  %v1963_v29 = vsel %vm3682_vm5, %v3644_v47, %v1959_v11  ;;  %v1978_v24 = vsel %vm3706_vm10, %v3654_v13, %v1974_v54 }
  0xd8   :  { %v3680_v58 = vadd.f32 %v1750_v2, %v1749_v26  ;;  %v1531_v43 = vmul.f32 %v2529_v35, %v3646_v60  ;;  %vm1536_vm6 = vweird.f32 %v2529_v35  ;;  %v1998_v16 = vmax.f32 %v1996_v36, %v1997_v18  ;;  %v3748_v26 = vld [vmem:[%s4161_s3 + $0x98] sm:$0xff] }
  0xd9   :  { %v1968_v19 = vsel %vm1965_vm8, %v1967_v5, %v1963_v29  ;;  %vm3714_vm11 = vmor %vm1535_vm2, %vm1536_vm6  ;;  %v1983_v39 = vsel %vm3724_vm14, %v1982_v4, %v1978_v24  ;;  %v51_v24 = vld [vmem:[%s4164_s6 + $0x8] sm:$0xff] }
  0xda   :  { %v3686_v0 = vpop.f32.mrf.mxu1  ;;  %2530 = vrcp.f32 %v3680_v58  ;;  %v1532_v17 = vsub.f32 1.0, %v1531_v43  ;;  %v1999_v31 = vrot.slane %v1998_v16, 1  ;;  %v3732_v55 = vmul.f32 %v1968_v19, %v2712_v51 }
  0xdb   :  { %2532 = vpow2.f32 %v1781_v28  ;;  %v3763_v36 = vmul.f32 %v1983_v39, %v2712_v51  ;;  %vm1757_vm1 = vweird.f32 %v3680_v58  ;;  %v3776_v51 = vld [vmem:[%s4162_s4] sm:$0xff] }
  0xdc   :  { %v217_v53 = vpop.f32.mrf.mxu0  ;;  %2534 = vpow2.f32 %v1783_v50  ;;  %v1533_v56 = vmul.f32 %v2529_v35, %v1532_v17  ;;  %v2000_v47 = vmax.f32 %v1998_v16, %v1999_v31  ;;  %v2034_v11 = vsel %vm97_vm0, %v3732_v55, -inf }
  0xdd   :  { %2331 = vmatmul.msk.f32.vlgmr.msra.gmra.mxu1 %vm181_vm12, %v3609_v23  ;;  %v2035_v5 = vsel %vm97_vm0, %v3763_v36, -inf  ;;  %v2591_v16 = vmov 0  }
  0xde   :  { %v1534_v15 = vadd.f32 %v2529_v35, %v1533_v56  ;;  %v2001_v49 = vsub.f32 %v3639_v34, %v2000_v47  ;;  %v2002_v32 = vsub.f32 %v3642_v12, %v2000_v47  ;;  %2420 = vset.pattern.permute.xlu0 %v2591_v16  ;;  %2421 = vset.pattern.permute.xlu1 %v2591_v16  ;;  %v3823_v47 = vld [vmem:[%s4161_s3 + $0xa8] sm:$0xff] }
  0xdf   :  { %2329 = vmatmul.msk.f32.gmra.mxu0 %vm181_vm12, %v3692_v41 }
  0xe0   :  { %v2531_v60 = vpop.eup %2530  ;;  %v1538_v14 = vsel %vm3714_vm11, %v2529_v35, %v1534_v15  ;;  %v2003_v25 = vmul.f32 1.442695, %v2001_v49  ;;  %v2005_v44 = vmul.f32 1.442695, %v2002_v32 }
  0xe1   :  { %v3734_v3 = vpop.eup %2532  ;;  %v1753_v42 = vmul.f32 %v2531_v60, %v3680_v58  ;;  %v1543_v37 = vsel %vm3720_vm13, %v1542_v40, %v1538_v14  ;;  %vm1758_vm2 = vweird.f32 %v2531_v60 }
  0xe2   :  { %v3736_v48 = vpop.f32.mrf.mxu1  ;;  %v3743_v33 = vpop.eup %2534  ;;  %v1785_v38 = vsel %vm97_vm0, %v3734_v3, 0.0  ;;  %v1545_v34 = vmul.f32 %v3562_v57, %v1543_v37  ;;  %v1544_v12 = vmul.f32 %v3558_v63, %v1543_v37  ;;  %v1763_v63 = vand.u32 2147483648, %v3680_v58  ;;  %vm3778_vm3 = vmor %vm1757_vm1, %vm1758_vm2 }
  0xe3   :  { %v1754_v6 = vsub.f32 1.0, %v1753_v42  ;;  %v1786_v2 = vsel %vm97_vm0, %v3743_v33, 0.0  ;;  %2536 = vpow2.f32 %v2003_v25  ;;  %v3838_v42 = vld [vmem:[%s4163_s5] sm:$0xff] }
  0xe4   :  { %v220_v13 = vpop.f32.mrf.mxu0  ;;  %v1787_v27 = vadd.f32 %v1786_v2, %v1785_v38  ;;  %1601 = vmatpush.msrb.mxu1 %v1545_v34  ;;  %v1764_v20 = vor.u32 1.1754944e-38, %v1763_v63  ;;  %2538 = vpow2.f32 %v2005_v44  ;;  %v52_v44 = vld [vmem:[%s4164_s6 + $0x10] sm:$0xff]  ;;  %v3869_v63 = vld [vmem:[%s4163_s5 + $0x8] sm:$0xff] }
  0xe5   :  { %318 = vmatpush.msra.mxu3 %v220_v13  ;;  %2332 = vmatmul.msk.f32.gmra.mxu1 %vm181_vm12, %v3661_v30  ;;  %v1755_v57 = vmul.f32 %v2531_v60, %v1754_v6  ;;  %v1761_v30 = vand.u32 2147483647, %v3680_v58  ;;  %v3855_v6 = vld [vmem:[%s4161_s3 + $0xb0] sm:$0xff] }
  0xe6   :  { %v1788_v35 = vrot.slane %v1787_v27, 4  ;;  %1602 = vmatpush.msrb.mxu1 %v1544_v12  ;;  %347 = vperm.xlu1 %2421, %v52_v44  }
  0xe7   :  { %319 = vmatpush.msra.mxu3 %v217_v53  ;;  %2330 = vmatmul.msk.f32.gmra.mxu0 %vm181_vm12, %v3748_v26  ;;  %v1756_v46 = vadd.f32 %v2531_v60, %v1755_v57  ;;  %vm1762_vm4 = vcmp.eq.f32.partialorder %v1761_v30, 8.507059e+37  ;;  %v3792_v53 = vld [vmem:[%s4161_s3 + $0xa0] sm:$0xff] }
  0xe8   :  { %v1789_v58 = vadd.f32 %v1788_v35, %v1787_v27  ;;  %v3875_v35 = vld [vmem:[%s4162_s4 + $0x18] sm:$0xff] }
  0xe9   :  { %320 = vmatpush.msra.mxu3 %v3656_v10  ;;  %v2036_v10 = vmax.f32 %v2034_v11, %v2035_v5  ;;  %v1760_v50 = vsel %vm3778_vm3, %v2531_v60, %v1756_v46  ;;  %v3803_v19 = vpop.eup %2536 }
  0xea   :  { %v246_v43 = vpop.f32.mrf.mxu1  ;;  %v1765_v29 = vsel %vm1762_vm4, %v1764_v20, %v1760_v50  ;;  %v1790_v1 = vrot.slane %v1789_v58, 2  ;;  %v2007_v9 = vsel %vm97_vm0, %v3803_v19, 0.0 }
  0xeb   :  { %321 = vmatpush.msra.mxu3 %v3604_v62  ;;  %v2037_v7 = vrot.slane %v2036_v10, 4  ;;  %v1767_v17 = vmul.f32 %v3602_v52, %v1765_v29  ;;  %v50_v62 = vld [vmem:[%s4164_s6] sm:$0xff]  ;;  %v1766_v8 = vmul.f32 %v3598_v45, %v1765_v29  ;;  %v3807_v52 = vpop.eup %2538  ;;  %v3814_v45 = vld [vmem:[%s4162_s4 + $0x8] sm:$0xff] }
  0xec   :  { %v3787_v18 = vpop.f32.mrf.mxu0  ;;  %2243 = vmatmul.msk.f32.vlgmr.msra.gmra.mxu3 %vm252_vm15, %v3776_v51  ;;  %v1791_v56 = vadd.f32 %v1790_v1, %v1789_v58  ;;  %337 = vperm.xlu0 %2420, %v50_v62  }
  0xed   :  { %2333 = vmatmul.msk.f32.gmra.mxu1 %vm181_vm12, %v3692_v41  ;;  %v2038_v31 = vmax.f32 %v2036_v10, %v2037_v7  ;;  %1836 = vmatpush.msra.mxu0 %v1767_v17  ;;  %v2008_v41 = vsel %vm97_vm0, %v3807_v52, 0.0  ;;  %v53_v7 = vld [vmem:[%s4164_s6 + $0x18] sm:$0xff] }
  0xee   :  { %v1792_v61 = vrot.slane %v1791_v56, 1  ;;  %v2009_v54 = vadd.f32 %v2008_v41, %v2007_v9  ;;  %352 = vperm.xlu1 %2421, %v53_v7  }
  0xef   :  { %2351 = vmatmul.msk.f32.vlgmr.msrb.gmra.mxu0 %vm181_vm12, %v3792_v53  ;;  %v2039_v23 = vrot.slane %v2038_v31, 2 }
  0xf0   :  { %1837 = vmatpush.msra.mxu0 %v1766_v8  ;;  %v1793_v40 = vadd.f32 %v1792_v61, %v1791_v56  ;;  %v2010_v22 = vrot.slane %v2009_v54, 4 }
  0xf1   :  { %v2040_v21 = vmax.f32 %v2038_v31, %v2039_v23 }
  0xf2   :  { %v249_v15 = vpop.f32.mrf.mxu1  ;;  %2540 = vrcp.f32 %v1793_v40  ;;  %v2011_v4 = vadd.f32 %v2010_v22, %v2009_v54  ;;  %vm1799_vm5 = vweird.f32 %v1793_v40  ;;  %v1805_v2 = vand.u32 2147483648, %v1793_v40  ;;  %v2371_v54 = vld [vmem:[%s4161_s3 + $0xc0] sm:$0xff]  ;;  %v3925_v22 = vld [vmem:[%s4163_s5 + $0x18] sm:$0xff] }
  0xf3   :  { %277 = vmatpush.msra.mxu2 %v249_v15  ;;  %v2041_v60 = vrot.slane %v2040_v21, 1  ;;  %v1803_v25 = vand.u32 2147483647, %v1793_v40 }
  0xf4   :  { %v3818_v59 = vpop.f32.mrf.mxu0  ;;  %2244 = vmatmul.msk.f32.gmra.mxu3 %vm252_vm15, %v3814_v45  ;;  %342 = vperm.xlu0 %2420, %v51_v24   ;;  %v2012_v49 = vrot.slane %v2011_v4, 2  ;;  %v1806_v11 = vor.u32 1.1754944e-38, %v1805_v2 }
  0xf5   :  { %278 = vmatpush.msra.mxu2 %v246_v43  ;;  %2334 = vmatmul.msk.f32.gmra.mxu1 %vm181_vm12, %v3748_v26  ;;  %v2042_v14 = vmax.f32 %v2040_v21, %v2041_v60  ;;  %v3845_v26 = vld [vmem:[%s4162_s4 + $0x10] sm:$0xff]  ;;  %vm1804_vm8 = vcmp.eq.f32.partialorder %v1803_v25, 8.507059e+37  ;;  %v2350_v43 = vld [vmem:[%s4161_s3 + $0xb8] sm:$0xff] }
  0xf6   :  { %v2013_v38 = vadd.f32 %v2012_v49, %v2011_v4 }
  0xf7   :  { %2352 = vmatmul.msk.f32.gmra.mxu0 %vm181_vm12, %v3823_v47  ;;  %279 = vmatpush.msra.mxu2 %v3736_v48  ;;  %v2043_v32 = vsub.f32 %v3732_v55, %v2042_v14  ;;  %v2044_v13 = vsub.f32 %v3763_v36, %v2042_v14 }
  0xf8   :  { %v2541_v37 = vpop.eup %2540 }
  0xf9   :  { %280 = vmatpush.msra.mxu2 %v3686_v0  ;;  %v2045_v48 = vmul.f32 1.442695, %v2043_v32  ;;  %v2047_v39 = vmul.f32 1.442695, %v2044_v13  ;;  %v1795_v12 = vmul.f32 %v2541_v37, %v1793_v40  ;;  %v2014_v0 = vrot.slane %v2013_v38, 1  ;;  %v2372_v13 = vld [vmem:[%s4161_s3 + $0xc8] sm:$0xff] }
  0xfa   :  { %v3848_v34 = vpop.f32.mrf.mxu1  ;;  %2239 = vmatmul.msk.f32.vlgmr.msra.gmra.mxu2 %vm252_vm15, %v3838_v42  ;;  %vm1800_vm6 = vweird.f32 %v2541_v37 }
  0xfb   :  { %2542 = vpow2.f32 %v2045_v48  ;;  %v1796_v27 = vsub.f32 1.0, %v1795_v12  ;;  %v2015_v36 = vadd.f32 %v2014_v0, %v2013_v38  ;;  %vm1801_vm7 = vmor %vm1799_vm5, %vm1800_vm6 }
  0xfc   :  { %v525_v55 = vpop.f32.mrf.mxu0  ;;  %2245 = vmatmul.msk.f32.gmra.mxu3 %vm252_vm15, %v3845_v26  ;;  %2544 = vpow2.f32 %v2047_v39  ;;  %v2373_v39 = vld [vmem:[%s4161_s3 + $0xd0] sm:$0xff] }
  0xfd   :  { %2355 = vmatmul.msk.f32.vlgmr.msrb.gmra.mxu1 %vm181_vm12, %v3792_v53  ;;  %v1797_v57 = vmul.f32 %v2541_v37, %v1796_v27  ;;  %2546 = vrcp.f32 %v2015_v36  ;;  %vm2021_vm9 = vweird.f32 %v2015_v36  ;;  %v2027_v56 = vand.u32 2147483648, %v2015_v36 }
  0xfe   :  { %v2025_v61 = vand.u32 2147483647, %v2015_v36 }
  0xff   :  { %2353 = vmatmul.msk.f32.gmra.mxu0 %vm181_vm12, %v3855_v6  ;;  %v1798_v30 = vadd.f32 %v2541_v37, %v1797_v57  ;;  %v2028_v21 = vor.u32 1.1754944e-38, %v2027_v56 }
 0x100   :  { %vm2026_vm13 = vcmp.eq.f32.partialorder %v2025_v61, 8.507059e+37 }
 0x101   :  { %v3877_v46 = vpop.eup %2542  ;;  %v1802_v5 = vsel %vm1801_vm7, %v2541_v37, %v1798_v30 }
 0x102   :  { %v3879_v28 = vpop.eup %2544  ;;  %v3881_v20 = vpop.f32.mrf.mxu1  ;;  %2240 = vmatmul.msk.f32.gmra.mxu2 %vm252_vm15, %v3869_v63  ;;  %v2049_v58 = vsel %vm97_vm0, %v3877_v46, 0.0  ;;  %v1807_v50 = vsel %vm1804_vm8, %v1806_v11, %v1802_v5 }
 0x103   :  { %v2050_v53 = vsel %vm97_vm0, %v3879_v28, 0.0  ;;  %v1809_v29 = vmul.f32 %v3743_v33, %v1807_v50  ;;  %v2547_v17 = vpop.eup %2546  ;;  %v1808_v16 = vmul.f32 %v3734_v3, %v1807_v50  ;;  %v3905_v33 = vld [vmem:[%s4163_s5 + $0x10] sm:$0xff] }
 0x104   :  { %v528_v10 = vpop.f32.mrf.mxu0  ;;  %2246 = vmatmul.msk.f32.gmra.mxu3 %vm252_vm15, %v3875_v35  ;;  %v2051_v1 = vadd.f32 %v2050_v53, %v2049_v58  ;;  %v2017_v62 = vmul.f32 %v2547_v17, %v2015_v36  ;;  %vm2022_vm10 = vweird.f32 %v2547_v17  ;;  %v2374_v36 = vld [vmem:[%s4161_s3 + $0xd8] sm:$0xff]  ;;  %v2396_v58 = vld [vmem:[%s4161_s3 + $0xe8] sm:$0xff]  ;;  %v2397_v50 = vld [vmem:[%s4161_s3 + $0xf0] sm:$0xff] }
 0x105   :  { %601 = vmatpush.msrb.mxu3 %v528_v10  ;;  %2356 = vmatmul.msk.f32.gmra.mxu1 %vm181_vm12, %v3823_v47  ;;  %vm2023_vm11 = vmor %vm2021_vm9, %vm2022_vm10 }
 0x106   :  { %v2052_v8 = vrot.slane %v2051_v1, 4  ;;  %1865 = vmatpush.msra.mxu1 %v1809_v29  ;;  %v2018_v31 = vsub.f32 1.0, %v2017_v62 }
 0x107   :  { %602 = vmatpush.msrb.mxu3 %v525_v55  ;;  %2354 = vmatmul.msk.f32.gmra.mxu0 %vm181_vm12, %v2350_v43 }
 0x108   :  { %v2053_v3 = vadd.f32 %v2052_v8, %v2051_v1  ;;  %1866 = vmatpush.msra.mxu1 %v1808_v16  ;;  %v2019_v23 = vmul.f32 %v2547_v17, %v2018_v31  ;;  %v2398_v1 = vld [vmem:[%s4161_s3 + $0xf8] sm:$0xff] }
 0x109   :  { %603 = vmatpush.msrb.mxu3 %v3818_v59 }
 0x10a   :  { %v554_v9 = vpop.f32.mrf.mxu1  ;;  %2241 = vmatmul.msk.f32.gmra.mxu2 %vm252_vm15, %v3905_v33  ;;  %v2054_v41 = vrot.slane %v2053_v3, 2  ;;  %v2020_v15 = vadd.f32 %v2547_v17, %v2019_v23 }
 0x10b   :  { %604 = vmatpush.msrb.mxu3 %v3787_v18 }
 0x10c   :  { %v3911_v40 = vpop.f32.mrf.mxu0  ;;  %2267 = vmatmul.msk.f32.vlgmr.msrb.gmra.mxu3 %vm252_vm15, %v3776_v51  ;;  %v2055_v18 = vadd.f32 %v2054_v41, %v2053_v3  ;;  %v2024_v59 = vsel %vm2023_vm11, %v2547_v17, %v2020_v15 }
 0x10d   :  { %2357 = vmatmul.msk.f32.gmra.mxu1 %vm181_vm12, %v3855_v6  ;;  %v2029_v60 = vsel %vm2026_vm13, %v2028_v21, %v2024_v59 }
 0x10e   :  { %v2056_v47 = vrot.slane %v2055_v18, 1  ;;  %v2031_v24 = vmul.f32 %v3807_v52, %v2029_v60  ;;  %v2030_v4 = vmul.f32 %v3803_v19, %v2029_v60 }
 0x10f   :  { %2375 = vmatmul.msk.f32.vlgmr.msra.gmra.mxu0 %vm181_vm12, %v2371_v54 }
 0x110   :  { %v2057_v14 = vadd.f32 %v2056_v47, %v2055_v18  ;;  %2100 = vmatpush.msrb.mxu0 %v2031_v24 }
 0x112   :  { %v557_v49 = vpop.f32.mrf.mxu1  ;;  %2242 = vmatmul.msk.f32.gmra.mxu2 %vm252_vm15, %v3925_v22  ;;  %2548 = vrcp.f32 %v2057_v14  ;;  %2101 = vmatpush.msrb.mxu0 %v2030_v4  ;;  %v2069_v38 = vand.u32 2147483648, %v2057_v14  ;;  %vm2063_vm14 = vweird.f32 %v2057_v14  ;;  %v2067_v55 = vand.u32 2147483647, %v2057_v14 }
 0x113   :  { %572 = vmatpush.msrb.mxu2 %v557_v49 }
 0x114   :  { %v786_v32 = vpop.f32.mrf.mxu0  ;;  %2268 = vmatmul.msk.f32.gmra.mxu3 %vm252_vm15, %v3814_v45  ;;  %v2070_v6 = vor.u32 1.1754944e-38, %v2069_v38  ;;  %vm2068_vm3 = vcmp.eq.f32.partialorder %v2067_v55, 8.507059e+37 }
 0x115   :  { %573 = vmatpush.msrb.mxu2 %v554_v9  ;;  %2358 = vmatmul.msk.f32.gmra.mxu1 %vm181_vm12, %v2350_v43 }
 0x117   :  { %2376 = vmatmul.msk.f32.gmra.mxu0 %vm181_vm12, %v2372_v13  ;;  %574 = vmatpush.msrb.mxu2 %v3881_v20  ;;  %v2395_v20 = vld [vmem:[%s4161_s3 + $0xe0] sm:$0xff]  ;;  %s2592_s3 = smov [#allocation5]  }
 0x118   :  { %v2549_v19 = vpop.eup %2548  ;;  %s2215_s30 = sshll.u32 %s2592_s3, 4  ;;  %s2216_s30 = int_to_ptr.vmem [resolvable:$true] %s2215_s30 }
 0x119   :  { %575 = vmatpush.msrb.mxu2 %v3848_v34  ;;  %v2059_v52 = vmul.f32 %v2549_v19, %v2057_v14  ;;  %vm2064_vm1 = vweird.f32 %v2549_v19 }
 0x11a   :  { %v812_v37 = vpop.f32.mrf.mxu1  ;;  %2263 = vmatmul.msk.f32.vlgmr.msrb.gmra.mxu2 %vm252_vm15, %v3838_v42  ;;  %vm2065_vm2 = vmor %vm2063_vm14, %vm2064_vm1 }
 0x11b   :  { %v2060_v12 = vsub.f32 1.0, %v2059_v52 }
 0x11c   :  { %v789_v48 = vpop.f32.mrf.mxu0  ;;  %2269 = vmatmul.msk.f32.gmra.mxu3 %vm252_vm15, %v3845_v26 }
 0x11d   :  { %2379 = vmatmul.msk.f32.vlgmr.msra.gmra.mxu1 %vm181_vm12, %v2371_v54  ;;  %v2061_v34 = vmul.f32 %v2549_v19, %v2060_v12 }
 0x11f   :  { %2377 = vmatmul.msk.f32.gmra.mxu0 %vm181_vm12, %v2373_v39  ;;  %v2062_v2 = vadd.f32 %v2549_v19, %v2061_v34 }
 0x121   :  { %v2066_v0 = vsel %vm2065_vm2, %v2549_v19, %v2062_v2 }
 0x122   :  { %v815_v27 = vpop.f32.mrf.mxu1  ;;  %2264 = vmatmul.msk.f32.gmra.mxu2 %vm252_vm15, %v3869_v63  ;;  %v2071_v25 = vsel %vm2068_vm3, %v2070_v6, %v2066_v0 }
 0x123   :  { %v2073_v57 = vmul.f32 %v3879_v28, %v2071_v25  ;;  %v2072_v11 = vmul.f32 %v3877_v46, %v2071_v25 }
 0x124   :  { %v792_v44 = vpop.f32.mrf.mxu0  ;;  %2270 = vmatmul.msk.f32.gmra.mxu3 %vm252_vm15, %v3875_v35 }
 0x125   :  { %865 = vmatpush.msra.mxu3 %v792_v44  ;;  %2380 = vmatmul.msk.f32.gmra.mxu1 %vm181_vm12, %v2372_v13 }
 0x126   :  { %2129 = vmatpush.msrb.mxu1 %v2073_v57 }
 0x127   :  { %866 = vmatpush.msra.mxu3 %v789_v48  ;;  %2378 = vmatmul.msk.f32.gmra.mxu0 %vm181_vm12, %v2374_v36 }
 0x128   :  { %2130 = vmatpush.msrb.mxu1 %v2072_v11 }
 0x129   :  { %867 = vmatpush.msra.mxu3 %v786_v32 }
 0x12a   :  { %v818_v30 = vpop.f32.mrf.mxu1  ;;  %2265 = vmatmul.msk.f32.gmra.mxu2 %vm252_vm15, %v3905_v33 }
 0x12b   :  { %868 = vmatpush.msra.mxu3 %v3911_v40 }
 0x12c   :  { %v1047_v28 = vpop.f32.mrf.mxu0  ;;  %2291 = vmatmul.msk.f32.vlgmr.msra.gmra.mxu3 %vm252_vm15, %v3776_v51 }
 0x12d   :  { %2381 = vmatmul.msk.f32.gmra.mxu1 %vm181_vm12, %v2373_v39 }
 0x12f   :  { %2399 = vmatmul.msk.f32.vlgmr.msrb.gmra.mxu0 %vm181_vm12, %v2395_v20 }
 0x132   :  { %v821_v46 = vpop.f32.mrf.mxu1  ;;  %2266 = vmatmul.msk.f32.gmra.mxu2 %vm252_vm15, %v3925_v22 }
 0x133   :  { %836 = vmatpush.msra.mxu2 %v821_v46 }
 0x134   :  { %v1050_v5 = vpop.f32.mrf.mxu0  ;;  %2292 = vmatmul.msk.f32.gmra.mxu3 %vm252_vm15, %v3814_v45 }
 0x135   :  { %837 = vmatpush.msra.mxu2 %v818_v30  ;;  %2382 = vmatmul.msk.f32.gmra.mxu1 %vm181_vm12, %v2374_v36 }
 0x137   :  { %2400 = vmatmul.msk.f32.gmra.mxu0 %vm181_vm12, %v2396_v58  ;;  %838 = vmatpush.msra.mxu2 %v815_v27 }
 0x139   :  { %839 = vmatpush.msra.mxu2 %v812_v37 }
 0x13a   :  { %v1076_v10 = vpop.f32.mrf.mxu1  ;;  %2287 = vmatmul.msk.f32.vlgmr.msra.gmra.mxu2 %vm252_vm15, %v3838_v42 }
 0x13c   :  { %v1053_v43 = vpop.f32.mrf.mxu0  ;;  %2293 = vmatmul.msk.f32.gmra.mxu3 %vm252_vm15, %v3845_v26 }
 0x13d   :  { %2403 = vmatmul.msk.f32.vlgmr.msrb.gmra.mxu1 %vm181_vm12, %v2395_v20 }
 0x13f   :  { %2401 = vmatmul.msk.f32.gmra.mxu0 %vm181_vm12, %v2397_v50 }
 0x142   :  { %v1079_v53 = vpop.f32.mrf.mxu1  ;;  %2288 = vmatmul.msk.f32.gmra.mxu2 %vm252_vm15, %v3869_v63 }
 0x144   :  { %v1056_v29 = vpop.f32.mrf.mxu0  ;;  %2294 = vmatmul.msk.f32.gmra.mxu3 %vm252_vm15, %v3875_v35 }
 0x145   :  { %1129 = vmatpush.msrb.mxu3 %v1056_v29  ;;  %2404 = vmatmul.msk.f32.gmra.mxu1 %vm181_vm12, %v2396_v58 }
 0x147   :  { %1130 = vmatpush.msrb.mxu3 %v1053_v43  ;;  %2402 = vmatmul.msk.f32.gmra.mxu0 %vm181_vm12, %v2398_v1 }
 0x149   :  { %1131 = vmatpush.msrb.mxu3 %v1050_v5 }
 0x14a   :  { %v1082_v7 = vpop.f32.mrf.mxu1  ;;  %2289 = vmatmul.msk.f32.gmra.mxu2 %vm252_vm15, %v3905_v33 }
 0x14b   :  { %1132 = vmatpush.msrb.mxu3 %v1047_v28 }
 0x14c   :  { %v1311_v17 = vpop.f32.mrf.mxu0  ;;  %2315 = vmatmul.msk.f32.vlgmr.msrb.gmra.mxu3 %vm252_vm15, %v3776_v51 }
 0x14d   :  { %2405 = vmatmul.msk.f32.gmra.mxu1 %vm181_vm12, %v2397_v50 }
 0x152   :  { %v1085_v16 = vpop.f32.mrf.mxu1  ;;  %2290 = vmatmul.msk.f32.gmra.mxu2 %vm252_vm15, %v3925_v22 }
 0x153   :  { %1100 = vmatpush.msrb.mxu2 %v1085_v16 }
 0x154   :  { %v1314_v62 = vpop.f32.mrf.mxu0  ;;  %2316 = vmatmul.msk.f32.gmra.mxu3 %vm252_vm15, %v3814_v45 }
 0x155   :  { %1101 = vmatpush.msrb.mxu2 %v1082_v7  ;;  %2406 = vmatmul.msk.f32.gmra.mxu1 %vm181_vm12, %v2398_v1 }
 0x157   :  { %1102 = vmatpush.msrb.mxu2 %v1079_v53 }
 0x158   :  { %v4041_v48 = vpop.permute.xlu1 %347 }
 0x159   :  { %1103 = vmatpush.msrb.mxu2 %v1076_v10 }
 0x15a   :  { %v1340_v8 = vpop.f32.mrf.mxu1  ;;  %2311 = vmatmul.msk.f32.vlgmr.msrb.gmra.mxu2 %vm252_vm15, %v3838_v42 }
 0x15c   :  { %v1317_v56 = vpop.f32.mrf.mxu0  ;;  %2317 = vmatmul.msk.f32.gmra.mxu3 %vm252_vm15, %v3845_v26 }
 0x15e   :  { %v4025_v18 = vpop.permute.xlu0 %337 }
 0x160   :  { %v4051_v27 = vpop.permute.xlu1 %352 }
 0x162   :  { %v1343_v31 = vpop.f32.mrf.mxu1  ;;  %2312 = vmatmul.msk.f32.gmra.mxu2 %vm252_vm15, %v3869_v63 }
 0x164   :  { %v1320_v61 = vpop.f32.mrf.mxu0  ;;  %2318 = vmatmul.msk.f32.gmra.mxu3 %vm252_vm15, %v3875_v35 }
 0x165   :  { %1393 = vmatpush.msra.mxu3 %v1320_v61 }
 0x166   :  { %v4035_v32 = vpop.permute.xlu0 %342 }
 0x167   :  { %1394 = vmatpush.msra.mxu3 %v1317_v56 }
 0x169   :  { %1395 = vmatpush.msra.mxu3 %v1314_v62 }
 0x16a   :  { %v1346_v3 = vpop.f32.mrf.mxu1  ;;  %2313 = vmatmul.msk.f32.gmra.mxu2 %vm252_vm15, %v3905_v33 }
 0x16b   :  { %1396 = vmatpush.msra.mxu3 %v1311_v17 }
 0x16c   :  { %v1575_v9 = vpop.f32.mrf.mxu0  ;;  %2339 = vmatmul.msk.f32.vlgmr.msra.gmra.mxu3 %vm252_vm15, %v3776_v51 }
 0x16f   :  { %v323_v23 = vpop.f32.mrf.mxu3 }
 0x172   :  { %v1349_v41 = vpop.f32.mrf.mxu1  ;;  %2314 = vmatmul.msk.f32.gmra.mxu2 %vm252_vm15, %v3925_v22 }
 0x173   :  { %1364 = vmatpush.msra.mxu2 %v1349_v41 }
 0x174   :  { %v1578_v40 = vpop.f32.mrf.mxu0  ;;  %2340 = vmatmul.msk.f32.gmra.mxu3 %vm252_vm15, %v3814_v45 }
 0x175   :  { %1365 = vmatpush.msra.mxu2 %v1346_v3 }
 0x177   :  { %v326_v54 = vpop.f32.mrf.mxu3  ;;  %1366 = vmatpush.msra.mxu2 %v1343_v31 }
 0x179   :  { %1367 = vmatpush.msra.mxu2 %v1340_v8 }
 0x17a   :  { %v1604_v21 = vpop.f32.mrf.mxu1  ;;  %2335 = vmatmul.msk.f32.vlgmr.msra.gmra.mxu2 %vm252_vm15, %v3838_v42 }
 0x17c   :  { %v1581_v15 = vpop.f32.mrf.mxu0  ;;  %2341 = vmatmul.msk.f32.gmra.mxu3 %vm252_vm15, %v3845_v26 }
 0x17d   :  { %v282_v59 = vpop.f32.mrf.mxu2 }
 0x17e   :  { %v324_v47 = vadd.f32 %v323_v23, %v282_v59 }
 0x17f   :  { %v329_v60 = vpop.f32.mrf.mxu3 }
 0x180   :  { %v355_v24 = vadd.f32 %v4025_v18, %v324_v47 }
 0x182   :  { %v1607_v4 = vpop.f32.mrf.mxu1  ;;  %2336 = vmatmul.msk.f32.gmra.mxu2 %vm252_vm15, %v3869_v63  ;;  %359 = vst.msk [vmem:[#allocation5] sm:$0xff] %vm97_vm0, %v355_v24 }
 0x184   :  { %v1584_v14 = vpop.f32.mrf.mxu0  ;;  %2342 = vmatmul.msk.f32.gmra.mxu3 %vm252_vm15, %v3875_v35 }
 0x185   :  { %1657 = vmatpush.msrb.mxu3 %v1584_v14  ;;  %v285_v49 = vpop.f32.mrf.mxu2 }
 0x186   :  { %v327_v13 = vadd.f32 %v326_v54, %v285_v49 }
 0x187   :  { %1658 = vmatpush.msrb.mxu3 %v1581_v15  ;;  %v332_v19 = vpop.f32.mrf.mxu3 }
 0x188   :  { %v356_v52 = vadd.f32 %v4035_v32, %v327_v13 }
 0x189   :  { %1659 = vmatpush.msrb.mxu3 %v1578_v40 }
 0x18a   :  { %v1610_v37 = vpop.f32.mrf.mxu1  ;;  %2337 = vmatmul.msk.f32.gmra.mxu2 %vm252_vm15, %v3905_v33  ;;  %360 = vst.msk [vmem:[#allocation5 + $0x8] sm:$0xff] %vm97_vm0, %v356_v52 }
 0x18b   :  { %1660 = vmatpush.msrb.mxu3 %v1575_v9 }
 0x18c   :  { %v1839_v38 = vpop.f32.mrf.mxu0  ;;  %2363 = vmatmul.msk.f32.vlgmr.msrb.gmra.mxu3 %vm252_vm15, %v3776_v51 }
 0x18d   :  { %v288_v39 = vpop.f32.mrf.mxu2 }
 0x18e   :  { %v330_v12 = vadd.f32 %v329_v60, %v288_v39 }
 0x18f   :  { %v606_v55 = vpop.f32.mrf.mxu3 }
 0x190   :  { %v357_v34 = vadd.f32 %v4041_v48, %v330_v12 }
 0x192   :  { %v1613_v6 = vpop.f32.mrf.mxu1  ;;  %2338 = vmatmul.msk.f32.gmra.mxu2 %vm252_vm15, %v3925_v22  ;;  %361 = vst.msk [vmem:[#allocation5 + $0x10] sm:$0xff] %vm97_vm0, %v357_v34 }
 0x193   :  { %1628 = vmatpush.msrb.mxu2 %v1613_v6 }
 0x194   :  { %v1842_v2 = vpop.f32.mrf.mxu0  ;;  %2364 = vmatmul.msk.f32.gmra.mxu3 %vm252_vm15, %v3814_v45 }
 0x195   :  { %1629 = vmatpush.msrb.mxu2 %v1610_v37  ;;  %v291_v0 = vpop.f32.mrf.mxu2 }
 0x196   :  { %v333_v25 = vadd.f32 %v332_v19, %v291_v0 }
 0x197   :  { %v609_v44 = vpop.f32.mrf.mxu3  ;;  %1630 = vmatpush.msrb.mxu2 %v1607_v4 }
 0x198   :  { %v358_v36 = vadd.f32 %v4051_v27, %v333_v25 }
 0x199   :  { %1631 = vmatpush.msrb.mxu2 %v1604_v21 }
 0x19a   :  { %v1868_v57 = vpop.f32.mrf.mxu1  ;;  %2359 = vmatmul.msk.f32.vlgmr.msrb.gmra.mxu2 %vm252_vm15, %v3838_v42  ;;  %362 = vst.msk [vmem:[#allocation5 + $0x18] sm:$0xff] %vm97_vm0, %v358_v36 }
 0x19c   :  { %v1845_v11 = vpop.f32.mrf.mxu0  ;;  %2365 = vmatmul.msk.f32.gmra.mxu3 %vm252_vm15, %v3845_v26 }
 0x19d   :  { %v577_v30 = vpop.f32.mrf.mxu2 }
 0x19e   :  { %v607_v28 = vadd.f32 %v606_v55, %v577_v30 }
 0x19f   :  { %v612_v20 = vpop.f32.mrf.mxu3 }
 0x1a0   :  { %v618_v46 = vadd.f32 %v607_v28, %v4025_v18 }
 0x1a2   :  { %v1871_v5 = vpop.f32.mrf.mxu1  ;;  %623 = vst.msk [vmem:[#allocation5 + $0x20] sm:$0xff] %vm97_vm0, %v618_v46  ;;  %2360 = vmatmul.msk.f32.gmra.mxu2 %vm252_vm15, %v3869_v63 }
 0x1a4   :  { %v1848_v58 = vpop.f32.mrf.mxu0  ;;  %2366 = vmatmul.msk.f32.gmra.mxu3 %vm252_vm15, %v3875_v35 }
 0x1a5   :  { %1921 = vmatpush.msra.mxu3 %v1848_v58  ;;  %v580_v10 = vpop.f32.mrf.mxu2 }
 0x1a6   :  { %v610_v43 = vadd.f32 %v609_v44, %v580_v10 }
 0x1a7   :  { %1922 = vmatpush.msra.mxu3 %v1845_v11  ;;  %v615_v50 = vpop.f32.mrf.mxu3 }
 0x1a8   :  { %v619_v53 = vadd.f32 %v610_v43, %v4035_v32 }
 0x1a9   :  { %1923 = vmatpush.msra.mxu3 %v1842_v2 }
 0x1aa   :  { %v1874_v29 = vpop.f32.mrf.mxu1  ;;  %624 = vst.msk [vmem:[#allocation5 + $0x28] sm:$0xff] %vm97_vm0, %v619_v53  ;;  %2361 = vmatmul.msk.f32.gmra.mxu2 %vm252_vm15, %v3905_v33 }
 0x1ab   :  { %1924 = vmatpush.msra.mxu3 %v1839_v38 }
 0x1ac   :  { %v2103_v1 = vpop.f32.mrf.mxu0  ;;  %2387 = vmatmul.msk.f32.vlgmr.msra.gmra.mxu3 %vm252_vm15, %v3776_v51 }
 0x1ad   :  { %v583_v7 = vpop.f32.mrf.mxu2 }
 0x1ae   :  { %v613_v17 = vadd.f32 %v612_v20, %v583_v7 }
 0x1af   :  { %v870_v16 = vpop.f32.mrf.mxu3 }
 0x1b0   :  { %v620_v62 = vadd.f32 %v613_v17, %v4041_v48 }
 0x1b2   :  { %v1877_v8 = vpop.f32.mrf.mxu1  ;;  %625 = vst.msk [vmem:[#allocation5 + $0x30] sm:$0xff] %vm97_vm0, %v620_v62  ;;  %2362 = vmatmul.msk.f32.gmra.mxu2 %vm252_vm15, %v3925_v22 }
 0x1b3   :  { %1892 = vmatpush.msra.mxu2 %v1877_v8 }
 0x1b4   :  { %v2106_v56 = vpop.f32.mrf.mxu0  ;;  %2388 = vmatmul.msk.f32.gmra.mxu3 %vm252_vm15, %v3814_v45 }
 0x1b5   :  { %1893 = vmatpush.msra.mxu2 %v1874_v29  ;;  %v586_v31 = vpop.f32.mrf.mxu2 }
 0x1b6   :  { %v616_v61 = vadd.f32 %v615_v50, %v586_v31 }
 0x1b7   :  { %v873_v3 = vpop.f32.mrf.mxu3  ;;  %1894 = vmatpush.msra.mxu2 %v1871_v5 }
 0x1b8   :  { %v621_v9 = vadd.f32 %v616_v61, %v4051_v27 }
 0x1b9   :  { %1895 = vmatpush.msra.mxu2 %v1868_v57 }
 0x1ba   :  { %v2132_v23 = vpop.f32.mrf.mxu1  ;;  %626 = vst.msk [vmem:[#allocation5 + $0x38] sm:$0xff] %vm97_vm0, %v621_v9  ;;  %2383 = vmatmul.msk.f32.vlgmr.msra.gmra.mxu2 %vm252_vm15, %v3838_v42 }
 0x1bc   :  { %v2109_v41 = vpop.f32.mrf.mxu0  ;;  %2389 = vmatmul.msk.f32.gmra.mxu3 %vm252_vm15, %v3845_v26 }
 0x1bd   :  { %v841_v40 = vpop.f32.mrf.mxu2 }
 0x1be   :  { %v871_v54 = vadd.f32 %v870_v16, %v841_v40 }
 0x1bf   :  { %v876_v21 = vpop.f32.mrf.mxu3 }
 0x1c0   :  { %v882_v15 = vadd.f32 %v871_v54, %v4025_v18 }
 0x1c2   :  { %v2135_v59 = vpop.f32.mrf.mxu1  ;;  %887 = vst.msk [vmem:[#allocation5 + $0x40] sm:$0xff] %vm97_vm0, %v882_v15  ;;  %2384 = vmatmul.msk.f32.gmra.mxu2 %vm252_vm15, %v3869_v63 }
 0x1c4   :  { %v2112_v47 = vpop.f32.mrf.mxu0  ;;  %2390 = vmatmul.msk.f32.gmra.mxu3 %vm252_vm15, %v3875_v35 }
 0x1c5   :  { %2185 = vmatpush.msrb.mxu3 %v2112_v47  ;;  %v844_v60 = vpop.f32.mrf.mxu2 }
 0x1c6   :  { %v874_v24 = vadd.f32 %v873_v3, %v844_v60 }
 0x1c7   :  { %2186 = vmatpush.msrb.mxu3 %v2109_v41  ;;  %v879_v4 = vpop.f32.mrf.mxu3 }
 0x1c8   :  { %v883_v14 = vadd.f32 %v874_v24, %v4035_v32 }
 0x1c9   :  { %2187 = vmatpush.msrb.mxu3 %v2106_v56 }
 0x1ca   :  { %v2138_v49 = vpop.f32.mrf.mxu1  ;;  %888 = vst.msk [vmem:[#allocation5 + $0x48] sm:$0xff] %vm97_vm0, %v883_v14  ;;  %2385 = vmatmul.msk.f32.gmra.mxu2 %vm252_vm15, %v3905_v33 }
 0x1cb   :  { %2188 = vmatpush.msrb.mxu3 %v2103_v1 }
 0x1cc   :  { %2411 = vmatmul.msk.f32.vlgmr.msrb.gmra.mxu3 %vm252_vm15, %v3776_v51 }
 0x1cd   :  { %v847_v13 = vpop.f32.mrf.mxu2 }
 0x1ce   :  { %v877_v19 = vadd.f32 %v876_v21, %v847_v13 }
 0x1cf   :  { %v1134_v52 = vpop.f32.mrf.mxu3 }
 0x1d0   :  { %v884_v37 = vadd.f32 %v877_v19, %v4041_v48 }
 0x1d2   :  { %v2141_v38 = vpop.f32.mrf.mxu1  ;;  %889 = vst.msk [vmem:[#allocation5 + $0x50] sm:$0xff] %vm97_vm0, %v884_v37  ;;  %2386 = vmatmul.msk.f32.gmra.mxu2 %vm252_vm15, %v3925_v22 }
 0x1d3   :  { %2156 = vmatpush.msrb.mxu2 %v2141_v38 }
 0x1d4   :  { %2412 = vmatmul.msk.f32.gmra.mxu3 %vm252_vm15, %v3814_v45 }
 0x1d5   :  { %2157 = vmatpush.msrb.mxu2 %v2138_v49  ;;  %v850_v39 = vpop.f32.mrf.mxu2 }
 0x1d6   :  { %v880_v12 = vadd.f32 %v879_v4, %v850_v39 }
 0x1d7   :  { %v1137_v55 = vpop.f32.mrf.mxu3  ;;  %2158 = vmatpush.msrb.mxu2 %v2135_v59 }
 0x1d8   :  { %v885_v51 = vadd.f32 %v880_v12, %v4051_v27 }
 0x1d9   :  { %2159 = vmatpush.msrb.mxu2 %v2132_v23 }
 0x1da   :  { %890 = vst.msk [vmem:[#allocation5 + $0x58] sm:$0xff] %vm97_vm0, %v885_v51  ;;  %2407 = vmatmul.msk.f32.vlgmr.msrb.gmra.mxu2 %vm252_vm15, %v3838_v42 }
 0x1dc   :  { %2413 = vmatmul.msk.f32.gmra.mxu3 %vm252_vm15, %v3845_v26 }
 0x1dd   :  { %v1105_v34 = vpop.f32.mrf.mxu2 }
 0x1de   :  { %v1135_v6 = vadd.f32 %v1134_v52, %v1105_v34 }
 0x1df   :  { %v1140_v2 = vpop.f32.mrf.mxu3 }
 0x1e0   :  { %v1146_v45 = vadd.f32 %v1135_v6, %v4025_v18 }
 0x1e2   :  { %1151 = vst.msk [vmem:[#allocation5 + $0x60] sm:$0xff] %vm97_vm0, %v1146_v45  ;;  %2408 = vmatmul.msk.f32.gmra.mxu2 %vm252_vm15, %v3869_v63 }
 0x1e4   :  { %2414 = vmatmul.msk.f32.gmra.mxu3 %vm252_vm15, %v3875_v35 }
 0x1e5   :  { %v1108_v0 = vpop.f32.mrf.mxu2 }
 0x1e6   :  { %v1138_v25 = vadd.f32 %v1137_v55, %v1108_v0 }
 0x1e7   :  { %v1143_v44 = vpop.f32.mrf.mxu3 }
 0x1e8   :  { %v1147_v42 = vadd.f32 %v1138_v25, %v4035_v32 }
 0x1ea   :  { %1152 = vst.msk [vmem:[#allocation5 + $0x68] sm:$0xff] %vm97_vm0, %v1147_v42  ;;  %2409 = vmatmul.msk.f32.gmra.mxu2 %vm252_vm15, %v3905_v33 }
 0x1ed   :  { %v1111_v26 = vpop.f32.mrf.mxu2 }
 0x1ee   :  { %v1141_v36 = vadd.f32 %v1140_v2, %v1111_v26 }
 0x1ef   :  { %v1398_v57 = vpop.f32.mrf.mxu3 }
 0x1f0   :  { %v1148_v11 = vadd.f32 %v1141_v36, %v4041_v48 }
 0x1f2   :  { %1153 = vst.msk [vmem:[#allocation5 + $0x70] sm:$0xff] %vm97_vm0, %v1148_v11  ;;  %2410 = vmatmul.msk.f32.gmra.mxu2 %vm252_vm15, %v3925_v22 }
 0x1f5   :  { %v1114_v63 = vpop.f32.mrf.mxu2 }
 0x1f6   :  { %v1144_v35 = vadd.f32 %v1143_v44, %v1114_v63 }
 0x1f7   :  { %v1401_v30 = vpop.f32.mrf.mxu3 }
 0x1f8   :  { %v1149_v28 = vadd.f32 %v1144_v35, %v4051_v27 }
 0x1fa   :  { %1154 = vst.msk [vmem:[#allocation5 + $0x78] sm:$0xff] %vm97_vm0, %v1149_v28 }
 0x1fd   :  { %v1369_v20 = vpop.f32.mrf.mxu2 }
 0x1fe   :  { %v1399_v46 = vadd.f32 %v1398_v57, %v1369_v20 }
 0x1ff   :  { %v1404_v33 = vpop.f32.mrf.mxu3 }
 0x200   :  { %v1410_v5 = vadd.f32 %v1399_v46, %v4025_v18 }
 0x202   :  { %1415 = vst.msk [vmem:[#allocation5 + $0x80] sm:$0xff] %vm97_vm0, %v1410_v5 }
 0x205   :  { %v1372_v58 = vpop.f32.mrf.mxu2 }
 0x206   :  { %v1402_v10 = vadd.f32 %v1401_v30, %v1372_v58 }
 0x207   :  { %v1407_v43 = vpop.f32.mrf.mxu3 }
 0x208   :  { %v1411_v50 = vadd.f32 %v1402_v10, %v4035_v32 }
 0x20a   :  { %1416 = vst.msk [vmem:[#allocation5 + $0x88] sm:$0xff] %vm97_vm0, %v1411_v50 }
 0x20d   :  { %v1375_v22 = vpop.f32.mrf.mxu2 }
 0x20e   :  { %v1405_v53 = vadd.f32 %v1404_v33, %v1375_v22 }
 0x20f   :  { %v1662_v29 = vpop.f32.mrf.mxu3 }
 0x210   :  { %v1412_v1 = vadd.f32 %v1405_v53, %v4041_v48 }
 0x212   :  { %1417 = vst.msk [vmem:[#allocation5 + $0x90] sm:$0xff] %vm97_vm0, %v1412_v1 }
 0x215   :  { %v1378_v7 = vpop.f32.mrf.mxu2 }
 0x216   :  { %v1408_v17 = vadd.f32 %v1407_v43, %v1378_v7 }
 0x217   :  { %v1665_v16 = vpop.f32.mrf.mxu3 }
 0x218   :  { %v1413_v62 = vadd.f32 %v1408_v17, %v4051_v27 }
 0x21a   :  { %1418 = vst.msk [vmem:[#allocation5 + $0x98] sm:$0xff] %vm97_vm0, %v1413_v62 }
 0x21d   :  { %v1633_v8 = vpop.f32.mrf.mxu2 }
 0x21e   :  { %v1663_v56 = vadd.f32 %v1662_v29, %v1633_v8 }
 0x21f   :  { %v1668_v31 = vpop.f32.mrf.mxu3 }
 0x220   :  { %v1674_v61 = vadd.f32 %v1663_v56, %v4025_v18 }
 0x222   :  { %1679 = vst.msk [vmem:[#allocation5 + $0xa0] sm:$0xff] %vm97_vm0, %v1674_v61 }
 0x225   :  { %v1636_v3 = vpop.f32.mrf.mxu2 }
 0x226   :  { %v1666_v9 = vadd.f32 %v1665_v16, %v1636_v3 }
 0x227   :  { %v1671_v23 = vpop.f32.mrf.mxu3 }
 0x228   :  { %v1675_v41 = vadd.f32 %v1666_v9, %v4035_v32 }
 0x22a   :  { %1680 = vst.msk [vmem:[#allocation5 + $0xa8] sm:$0xff] %vm97_vm0, %v1675_v41 }
 0x22d   :  { %v1639_v40 = vpop.f32.mrf.mxu2 }
 0x22e   :  { %v1669_v54 = vadd.f32 %v1668_v31, %v1639_v40 }
 0x22f   :  { %v1926_v21 = vpop.f32.mrf.mxu3 }
 0x230   :  { %v1676_v15 = vadd.f32 %v1669_v54, %v4041_v48 }
 0x232   :  { %1681 = vst.msk [vmem:[#allocation5 + $0xb0] sm:$0xff] %vm97_vm0, %v1676_v15 }
 0x235   :  { %v1642_v59 = vpop.f32.mrf.mxu2 }
 0x236   :  { %v1672_v47 = vadd.f32 %v1671_v23, %v1642_v59 }
 0x237   :  { %v1929_v60 = vpop.f32.mrf.mxu3 }
 0x238   :  { %v1677_v24 = vadd.f32 %v1672_v47, %v4051_v27 }
 0x23a   :  { %1682 = vst.msk [vmem:[#allocation5 + $0xb8] sm:$0xff] %vm97_vm0, %v1677_v24 }
 0x23d   :  { %v1897_v4 = vpop.f32.mrf.mxu2 }
 0x23e   :  { %v1927_v14 = vadd.f32 %v1926_v21, %v1897_v4 }
 0x23f   :  { %v1932_v13 = vpop.f32.mrf.mxu3 }
 0x240   :  { %v1938_v49 = vadd.f32 %v1927_v14, %v4025_v18 }
 0x242   :  { %1943 = vst.msk [vmem:[#allocation5 + $0xc0] sm:$0xff] %vm97_vm0, %v1938_v49 }
 0x245   :  { %v1900_v19 = vpop.f32.mrf.mxu2 }
 0x246   :  { %v1930_v52 = vadd.f32 %v1929_v60, %v1900_v19 }
 0x247   :  { %v1935_v38 = vpop.f32.mrf.mxu3 }
 0x248   :  { %v1939_v37 = vadd.f32 %v1930_v52, %v4035_v32 }
 0x24a   :  { %1944 = vst.msk [vmem:[#allocation5 + $0xc8] sm:$0xff] %vm97_vm0, %v1939_v37 }
 0x24d   :  { %v1903_v39 = vpop.f32.mrf.mxu2 }
 0x24e   :  { %v1933_v12 = vadd.f32 %v1932_v13, %v1903_v39 }
 0x24f   :  { %v2190_v34 = vpop.f32.mrf.mxu3 }
 0x250   :  { %v1940_v55 = vadd.f32 %v1933_v12, %v4041_v48 }
 0x252   :  { %1945 = vst.msk [vmem:[#allocation5 + $0xd0] sm:$0xff] %vm97_vm0, %v1940_v55 }
 0x255   :  { %v1906_v51 = vpop.f32.mrf.mxu2 }
 0x256   :  { %v1936_v6 = vadd.f32 %v1935_v38, %v1906_v51 }
 0x257   :  { %v2193_v25 = vpop.f32.mrf.mxu3 }
 0x258   :  { %v1941_v2 = vadd.f32 %v1936_v6, %v4051_v27 }
 0x25a   :  { %1946 = vst.msk [vmem:[#allocation5 + $0xd8] sm:$0xff] %vm97_vm0, %v1941_v2 }
 0x25d   :  { %v2161_v45 = vpop.f32.mrf.mxu2 }
 0x25e   :  { %v2191_v0 = vadd.f32 %v2190_v34, %v2161_v45 }
 0x25f   :  { %v2196_v57 = vpop.f32.mrf.mxu3 }
 0x260   :  { %v2202_v44 = vadd.f32 %v2191_v0, %v4025_v18 }
 0x262   :  { %2207 = vst.msk [vmem:[#allocation5 + $0xe0] sm:$0xff] %vm97_vm0, %v2202_v44 }
 0x265   :  { %v2164_v42 = vpop.f32.mrf.mxu2 }
 0x266   :  { %v2194_v26 = vadd.f32 %v2193_v25, %v2164_v42 }
 0x267   :  { %v2199_v30 = vpop.f32.mrf.mxu3 }
 0x268   :  { %v2203_v36 = vadd.f32 %v2194_v26, %v4035_v32 }
 0x26a   :  { %2208 = vst.msk [vmem:[#allocation5 + $0xe8] sm:$0xff] %vm97_vm0, %v2203_v36 }
 0x26d   :  { %v2167_v11 = vpop.f32.mrf.mxu2 }
 0x26e   :  { %v2197_v63 = vadd.f32 %v2196_v57, %v2167_v11 }
 0x270   :  { %v2204_v35 = vadd.f32 %v2197_v63, %v4041_v48 }
 0x272   :  { %2209 = vst.msk [vmem:[#allocation5 + $0xf0] sm:$0xff] %vm97_vm0, %v2204_v35 }
 0x275   :  { %v2170_v18 = vpop.f32.mrf.mxu2 }
 0x276   :  { %v2200_v28 = vadd.f32 %v2199_v30, %v2170_v18 }
 0x278   :  { %v2205_v32 = vadd.f32 %v2200_v28, %v4051_v27 }
 0x27a   :  { %2210 = vst.msk [vmem:[#allocation5 + $0xf8] sm:$0xff] %vm97_vm0, %v2205_v32 }
 0x27b   :  { %2223 = dma.vmem_to_hbm [thread:$0]  %s2216_s30, 4096, %s2218_s9, [#allocation3], %s2593_s10, %s2593_s10, %s2594_s0  }
 0x27c   :  { %2588 = dma.done.wait [#allocation3], 4096  }
 0x27d   :  { %2589 = vsyncadd [#allocation3], 4294963200 }
 0x27e   :  { %2228 = vsyncpa [#allocation3], 1 }
 0x27f   :  { %2229 = vsyncpa [#allocation4], 1 }

</bundles_post_ra>
